<compile_context>
chip_gen: v5e
topology: v5e:2x2
jax: 0.10.0
libtpu: 0.0.40
codegen_flags: <defaults>
</compile_context>

<pallas_src>
import functools
import math

import numpy as np
import jax
import jax.numpy as jnp
from jax.experimental import pallas as pl
from jax.experimental.pallas import tpu as pltpu


class Config:
    batch_size = 2
    features = 8        # decoder sequence length
    d_model = 32
    heads = 4
    mlp_size = 64
    layers = 2
    dropout_rate = 0.0  # inference: dropout == identity
    enc_seq = 8         # encoder_output sequence length


EPS = 1e-5  # nn.LayerNorm default


# ---------------------------------------------------------------------------
# shared math helpers
# ---------------------------------------------------------------------------
def _layernorm(x, g, b):
    mu = jnp.mean(x, axis=-1, keepdims=True)
    var = jnp.mean((x - mu) ** 2, axis=-1, keepdims=True)
    return (x - mu) * jax.lax.rsqrt(var + EPS) * g + b


def _split_heads(x2d, heads, d_k):
    """(S, D) -> (H, S, d_k); heads partition the last dim contiguously,
    exactly matching view(B,-1,H,dk).transpose(1,2)."""
    s = x2d.shape[0]
    return x2d.reshape(s, heads, d_k).transpose(1, 0, 2)


def _mha_batched_heads(q2d, kv2d, heads, d_k):
    """All heads in two batched MXU matmuls. q2d: (Sq, D), kv2d: (Sk, D).
    k and v are the same tensor in this module (self/cross attention without
    projections), so split heads only once for both."""
    scale = 1.0 / math.sqrt(d_k)
    q = _split_heads(q2d * scale, heads, d_k)   # fold 1/sqrt(d_k) into q once
    k = _split_heads(kv2d, heads, d_k)
    v = k
    # scores: contract d_k directly (no materialized k.T), batch over heads
    s = jnp.einsum('hqd,hkd->hqk', q, k, preferred_element_type=jnp.float32)
    s = s - jnp.max(s, axis=-1, keepdims=True)
    e = jnp.exp(s)
    p = e * pl.reciprocal(jnp.sum(e, axis=-1, keepdims=True), approx=True)
    o = jnp.einsum('hqk,hkd->hqd', p, v, preferred_element_type=jnp.float32)
    sq = q2d.shape[0]
    return o.transpose(1, 0, 2).reshape(sq, heads * d_k)   # (Sq, D)


# per-head reference MHA (independent formulation, used only by the JAX ref)
def _mha_ref(q, k, v, heads, d_k):
    scale = 1.0 / math.sqrt(d_k)
    outs = []
    for h in range(heads):
        qh = q[:, h * d_k:(h + 1) * d_k]
        kh = k[:, h * d_k:(h + 1) * d_k]
        vh = v[:, h * d_k:(h + 1) * d_k]
        s = jnp.dot(qh, kh.T) * scale
        s = s - jnp.max(s, axis=-1, keepdims=True)
        e = jnp.exp(s)
        p = e / jnp.sum(e, axis=-1, keepdims=True)
        outs.append(jnp.dot(p, vh))
    return jnp.concatenate(outs, axis=-1)


# ---------------------------------------------------------------------------
# fused Pallas kernel: all decoder layers + final LayerNorm
# ---------------------------------------------------------------------------
def decoder_kernel(x_ref, enc_ref,
                   g1_ref, b1_ref, g2_ref, b2_ref, g3_ref, b3_ref,
                   w1_ref, bb1_ref, w2_ref, bb2_ref,
                   gn_ref, bn_ref, o_ref,
                   *, B, S, Se, heads, d_k, layers):
    x = x_ref[...]      # (B*S, D) merged-row activation slab
    enc = enc_ref[...]  # (B*Se, D)

    g1, b1 = g1_ref[...], b1_ref[...]   # (L, D)
    g2, b2 = g2_ref[...], b2_ref[...]
    g3, b3 = g3_ref[...], b3_ref[...]
    w1, bb1 = w1_ref[...], bb1_ref[...]  # (L, D, M), (L, M)
    w2, bb2 = w2_ref[...], bb2_ref[...]  # (L, M, D), (L, D)

    for l in range(layers):  # static unroll, layers == 2
        # --- masked self-attention sublayer (mask=None in the spec) ---
        x1 = _layernorm(x, g1[l], b1[l])
        att = [_mha_batched_heads(x1[b * S:(b + 1) * S, :],
                                  x1[b * S:(b + 1) * S, :], heads, d_k)
               for b in range(B)]
        x = x + jnp.concatenate(att, axis=0)

        # --- cross-attention sublayer ---
        x1 = _layernorm(x, g2[l], b2[l])
        att = [_mha_batched_heads(x1[b * S:(b + 1) * S, :],
                                  enc[b * Se:(b + 1) * Se, :], heads, d_k)
               for b in range(B)]
        x = x + jnp.concatenate(att, axis=0)

        # --- feed-forward sublayer: full (B*S, D) @ (D, M) in one push ---
        x1 = _layernorm(x, g3[l], b3[l])
        h = jnp.maximum(
            jnp.dot(x1, w1[l], preferred_element_type=jnp.float32) + bb1[l], 0.0)
        x = x + jnp.dot(h, w2[l], preferred_element_type=jnp.float32) + bb2[l]

    # --- final LayerNorm fused into the same kernel ---
    o_ref[...] = _layernorm(x, gn_ref[0], bn_ref[0]).astype(o_ref.dtype)


def decoder_stack_pallas(x_emb, enc, params):
    """x_emb: (B, S, D) post embedding+PE; enc: (B, Se, D). One pallas_call."""
    B, S, D = x_emb.shape
    _, Se, _ = enc.shape
    L = Config.layers
    M = Config.mlp_size

    x2d = x_emb.reshape(B * S, D)   # wrapper-side reshape: free at HBM level
    e2d = enc.reshape(B * Se, D)
    st = params["stacked"]

    kernel = functools.partial(decoder_kernel, B=B, S=S, Se=Se,
                               heads=Config.heads, d_k=D // Config.heads,
                               layers=L)

    def full(shape):
        # whole (small) array resident in VMEM; single grid step
        return pl.BlockSpec(shape, lambda i, _n=len(shape): (0,) * _n)

    out2d = pl.pallas_call(
        kernel,
        out_shape=jax.ShapeDtypeStruct((B * S, D), x_emb.dtype),
        grid_spec=pltpu.PrefetchScalarGridSpec(
            num_scalar_prefetch=0,
            grid=(1,),
            in_specs=[
                full((B * S, D)), full((B * Se, D)),
                full((L, D)), full((L, D)),
                full((L, D)), full((L, D)),
                full((L, D)), full((L, D)),
                full((L, D, M)), full((L, M)),
                full((L, M, D)), full((L, D)),
                full((1, D)), full((1, D)),
            ],
            out_specs=full((B * S, D)),
        ),
        # single-TC, single-step workload: no benefit from "parallel" here
        compiler_params=pltpu.CompilerParams(
            dimension_semantics=("arbitrary",)),
    )(x2d, e2d,
      st["g1"], st["b1"], st["g2"], st["b2"], st["g3"], st["b3"],
      st["w1"], st["bb1"], st["w2"], st["bb2"],
      params["norm_g"], params["norm_b"])
    return out2d.reshape(B, S, D)


# ---------------------------------------------------------------------------
# glue: Embedding + PositionalEncoding (elementwise; plain JAX, one fusion)
# ---------------------------------------------------------------------------
def make_positional_encoding():
    D = Config.d_model
    pe = np.zeros((1000, D), dtype=np.float32)
    position = np.arange(0, 1000, dtype=np.float32)[:, None]
    div_term = np.exp(np.arange(0, D, 2, dtype=np.float32) * (-np.log(10000.0) / D))
    pe[:, 0::2] = np.sin(position * div_term)
    pe[:, 1::2] = np.cos(position * div_term)
    pe = pe[:, None, :]                 # unsqueeze(0).transpose(0,1) -> (1000,1,D)
    pe = pe[:, :Config.features, :]     # dim-1 has size 1 -> unchanged (as in PyTorch)
    return jnp.asarray(pe)


def embed_and_pe(x, emb_w, emb_b, pe_buf):
    B, F = x.shape
    D = Config.d_model
    h = x.reshape(B, F, 1) * emb_w + emb_b     # Embedding
    h = h * math.sqrt(D)                       # PositionalEncoding scale
    p = pe_buf[:B]                             # (B, 1, D) — faithful to pe[:x.size(0)]
    return h + p


# ---------------------------------------------------------------------------
# full Decoder forward
# ---------------------------------------------------------------------------
def decoder_forward(x, encoder_output, params):
    h = embed_and_pe(x, params["emb_w"], params["emb_b"], params["pe"])
    return decoder_stack_pallas(h, encoder_output, params)


# pure-JAX reference (per-head loop formulation) for a correctness check
def decoder_forward_ref(x, encoder_output, params):
    h = embed_and_pe(x, params["emb_w"], params["emb_b"], params["pe"])
    heads, d_k = Config.heads, Config.d_model // Config.heads
    for p in params["layers"]:
        def one(xb, eb, p=p):
            x1 = _layernorm(xb, p["g1"], p["b1"])
            xb = xb + _mha_ref(x1, x1, x1, heads, d_k)
            x1 = _layernorm(xb, p["g2"], p["b2"])
            xb = xb + _mha_ref(x1, eb, eb, heads, d_k)
            x1 = _layernorm(xb, p["g3"], p["b3"])
            ff = jnp.maximum(x1 @ p["w1"] + p["bb1"], 0.0)
            return xb + ff @ p["w2"] + p["bb2"]
        h = jax.vmap(one)(h, encoder_output)
    return jax.vmap(
        lambda hb: _layernorm(hb, params["norm_g"][0], params["norm_b"][0]))(h)


# ---------------------------------------------------------------------------
# deterministic parameter init
# ---------------------------------------------------------------------------
def init_params(key):
    B, F, D, M = Config.batch_size, Config.features, Config.d_model, Config.mlp_size
    n_layer_keys = 4 * Config.layers
    keys = jax.random.split(key, 2 + n_layer_keys)
    params = {
        "emb_w": jax.random.normal(keys[0], (B, F, D), jnp.float32),
        "emb_b": jax.random.normal(keys[1], (B, F, D), jnp.float32),
        "pe": make_positional_encoding(),
        "norm_g": jnp.ones((1, D), jnp.float32),
        "norm_b": jnp.zeros((1, D), jnp.float32),
        "layers": [],
    }
    for li in range(Config.layers):
        k = keys[2 + 4 * li: 2 + 4 * (li + 1)]
        lp = {
            "g1": jnp.ones((D,), jnp.float32), "b1": jnp.zeros((D,), jnp.float32),
            "g2": jnp.ones((D,), jnp.float32), "b2": jnp.zeros((D,), jnp.float32),
            "g3": jnp.ones((D,), jnp.float32), "b3": jnp.zeros((D,), jnp.float32),
            "w1": jax.random.normal(k[0], (D, M), jnp.float32) * (1.0 / math.sqrt(D)),
            "bb1": jax.random.normal(k[1], (M,), jnp.float32) * 0.01,
            "w2": jax.random.normal(k[2], (M, D), jnp.float32) * (1.0 / math.sqrt(M)),
            "bb2": jax.random.normal(k[3], (D,), jnp.float32) * 0.01,
        }
        params["layers"].append(lp)
    # stacked copies (leading layer dim) for the fused kernel
    params["stacked"] = {
        name: jnp.stack([lp[name] for lp in params["layers"]], axis=0)
        for name in params["layers"][0]
    }
    return params


if __name__ == "__main__":
    key = jax.random.PRNGKey(0)
    kx, kenc, kp = jax.random.split(key, 3)

    params = init_params(kp)
    x = jax.random.normal(kx, (Config.batch_size, Config.features), jnp.float32)
    encoder_output = jax.random.normal(
        kenc, (Config.batch_size, Config.enc_seq, Config.d_model), jnp.float32)

    out = decoder_forward(x, encoder_output, params)
    out = jax.block_until_ready(out)

    ref = jax.block_until_ready(decoder_forward_ref(x, encoder_output, params))
    # tolerance accounts for the EUP approximate reciprocal in the softmax
    if not np.allclose(np.asarray(out), np.asarray(ref), atol=1e-2, rtol=1e-2):
        diff = float(np.max(np.abs(np.asarray(out) - np.asarray(ref))))
        raise AssertionError(f"Pallas decoder output mismatch vs JAX reference "
                             f"(max abs diff = {diff})")

    print("KERNEL_OK")
</pallas_src>

<mosaic_0001>
module attributes {stable_mosaic.version = 11 : i64} {
  func.func @decoder_kernel(%arg0: i32, %arg1: memref<16x32xf32, #tpu.memory_space<vmem>>, %arg2: memref<16x32xf32, #tpu.memory_space<vmem>>, %arg3: memref<2x32xf32, #tpu.memory_space<vmem>>, %arg4: memref<2x32xf32, #tpu.memory_space<vmem>>, %arg5: memref<2x32xf32, #tpu.memory_space<vmem>>, %arg6: memref<2x32xf32, #tpu.memory_space<vmem>>, %arg7: memref<2x32xf32, #tpu.memory_space<vmem>>, %arg8: memref<2x32xf32, #tpu.memory_space<vmem>>, %arg9: memref<2x32x64xf32, #tpu.memory_space<vmem>>, %arg10: memref<2x64xf32, #tpu.memory_space<vmem>>, %arg11: memref<2x64x32xf32, #tpu.memory_space<vmem>>, %arg12: memref<2x32xf32, #tpu.memory_space<vmem>>, %arg13: memref<1x32xf32, #tpu.memory_space<vmem>>, %arg14: memref<1x32xf32, #tpu.memory_space<vmem>>, %arg15: memref<16x32xf32, #tpu.memory_space<vmem>>) attributes {dimension_semantics = [#tpu.dimension_semantics<arbitrary>], iteration_bounds = array<i64: 1>, scalar_prefetch = 0 : i64, scratch_operands = 0 : i64, tpu.core_type = #tpu.core_type<tc>, window_params = [{pipeline_mode = #tpu.pipeline_mode<synchronous>, transform_indices = @transform_0, window_bounds = array<i64: 16, 32>}, {pipeline_mode = #tpu.pipeline_mode<synchronous>, transform_indices = @transform_1, window_bounds = array<i64: 16, 32>}, {pipeline_mode = #tpu.pipeline_mode<synchronous>, transform_indices = @transform_2, window_bounds = array<i64: 2, 32>}, {pipeline_mode = #tpu.pipeline_mode<synchronous>, transform_indices = @transform_3, window_bounds = array<i64: 2, 32>}, {pipeline_mode = #tpu.pipeline_mode<synchronous>, transform_indices = @transform_4, window_bounds = array<i64: 2, 32>}, {pipeline_mode = #tpu.pipeline_mode<synchronous>, transform_indices = @transform_5, window_bounds = array<i64: 2, 32>}, {pipeline_mode = #tpu.pipeline_mode<synchronous>, transform_indices = @transform_6, window_bounds = array<i64: 2, 32>}, {pipeline_mode = #tpu.pipeline_mode<synchronous>, transform_indices = @transform_7, window_bounds = array<i64: 2, 32>}, {pipeline_mode = #tpu.pipeline_mode<synchronous>, transform_indices = @transform_8, window_bounds = array<i64: 2, 32, 64>}, {pipeline_mode = #tpu.pipeline_mode<synchronous>, transform_indices = @transform_9, window_bounds = array<i64: 2, 64>}, {pipeline_mode = #tpu.pipeline_mode<synchronous>, transform_indices = @transform_10, window_bounds = array<i64: 2, 64, 32>}, {pipeline_mode = #tpu.pipeline_mode<synchronous>, transform_indices = @transform_11, window_bounds = array<i64: 2, 32>}, {pipeline_mode = #tpu.pipeline_mode<synchronous>, transform_indices = @transform_12, window_bounds = array<i64: 1, 32>}, {pipeline_mode = #tpu.pipeline_mode<synchronous>, transform_indices = @transform_13, window_bounds = array<i64: 1, 32>}, {pipeline_mode = #tpu.pipeline_mode<synchronous>, transform_indices = @transform_14, window_bounds = array<i64: 16, 32>}]} {
    %c0 = arith.constant 0 : index
    %c0_0 = arith.constant 0 : index
    %0 = vector.load %arg1[%c0, %c0_0] : memref<16x32xf32, #tpu.memory_space<vmem>>, vector<16x32xf32>
    %c0_1 = arith.constant 0 : index
    %c0_2 = arith.constant 0 : index
    %1 = vector.load %arg2[%c0_1, %c0_2] : memref<16x32xf32, #tpu.memory_space<vmem>>, vector<16x32xf32>
    %c0_3 = arith.constant 0 : index
    %c0_4 = arith.constant 0 : index
    %2 = vector.load %arg3[%c0_3, %c0_4] : memref<2x32xf32, #tpu.memory_space<vmem>>, vector<2x32xf32>
    %c0_5 = arith.constant 0 : index
    %c0_6 = arith.constant 0 : index
    %3 = vector.load %arg4[%c0_5, %c0_6] : memref<2x32xf32, #tpu.memory_space<vmem>>, vector<2x32xf32>
    %c0_7 = arith.constant 0 : index
    %c0_8 = arith.constant 0 : index
    %4 = vector.load %arg5[%c0_7, %c0_8] : memref<2x32xf32, #tpu.memory_space<vmem>>, vector<2x32xf32>
    %c0_9 = arith.constant 0 : index
    %c0_10 = arith.constant 0 : index
    %5 = vector.load %arg6[%c0_9, %c0_10] : memref<2x32xf32, #tpu.memory_space<vmem>>, vector<2x32xf32>
    %c0_11 = arith.constant 0 : index
    %c0_12 = arith.constant 0 : index
    %6 = vector.load %arg7[%c0_11, %c0_12] : memref<2x32xf32, #tpu.memory_space<vmem>>, vector<2x32xf32>
    %c0_13 = arith.constant 0 : index
    %c0_14 = arith.constant 0 : index
    %7 = vector.load %arg8[%c0_13, %c0_14] : memref<2x32xf32, #tpu.memory_space<vmem>>, vector<2x32xf32>
    %c0_15 = arith.constant 0 : index
    %c0_16 = arith.constant 0 : index
    %c0_17 = arith.constant 0 : index
    %8 = vector.load %arg9[%c0_15, %c0_16, %c0_17] : memref<2x32x64xf32, #tpu.memory_space<vmem>>, vector<2x32x64xf32>
    %c0_18 = arith.constant 0 : index
    %c0_19 = arith.constant 0 : index
    %9 = vector.load %arg10[%c0_18, %c0_19] : memref<2x64xf32, #tpu.memory_space<vmem>>, vector<2x64xf32>
    %c0_20 = arith.constant 0 : index
    %c0_21 = arith.constant 0 : index
    %c0_22 = arith.constant 0 : index
    %10 = vector.load %arg11[%c0_20, %c0_21, %c0_22] : memref<2x64x32xf32, #tpu.memory_space<vmem>>, vector<2x64x32xf32>
    %c0_23 = arith.constant 0 : index
    %c0_24 = arith.constant 0 : index
    %11 = vector.load %arg12[%c0_23, %c0_24] : memref<2x32xf32, #tpu.memory_space<vmem>>, vector<2x32xf32>
    %12 = vector.extract_strided_slice %2 {offsets = [0, 0], sizes = [1, 32], strides = [1, 1]} : vector<2x32xf32> to vector<1x32xf32>
    %13 = vector.shape_cast %12 : vector<1x32xf32> to vector<32xf32>
    %14 = vector.extract_strided_slice %3 {offsets = [0, 0], sizes = [1, 32], strides = [1, 1]} : vector<2x32xf32> to vector<1x32xf32>
    %15 = vector.shape_cast %14 : vector<1x32xf32> to vector<32xf32>
    %cst = arith.constant dense<0.000000e+00> : vector<16xf32>
    %16 = vector.multi_reduction <add>, %0, %cst [1] : vector<16x32xf32> to vector<16xf32>
    %17 = vector.shape_cast %16 : vector<16xf32> to vector<16x1xf32>
    %cst_25 = arith.constant 3.200000e+01 : f32
    %18 = vector.broadcast %cst_25 : f32 to vector<16x1xf32>
    %19 = arith.divf %17, %18 : vector<16x1xf32>
    %20 = vector.broadcast %19 : vector<16x1xf32> to vector<16x32xf32>
    %21 = arith.subf %0, %20 : vector<16x32xf32>
    %22 = arith.mulf %21, %21 : vector<16x32xf32>
    %cst_26 = arith.constant dense<0.000000e+00> : vector<16xf32>
    %23 = vector.multi_reduction <add>, %22, %cst_26 [1] : vector<16x32xf32> to vector<16xf32>
    %24 = vector.shape_cast %23 : vector<16xf32> to vector<16x1xf32>
    %cst_27 = arith.constant 3.200000e+01 : f32
    %25 = vector.broadcast %cst_27 : f32 to vector<16x1xf32>
    %26 = arith.divf %24, %25 : vector<16x1xf32>
    %27 = vector.broadcast %19 : vector<16x1xf32> to vector<16x32xf32>
    %28 = arith.subf %0, %27 : vector<16x32xf32>
    %cst_28 = arith.constant 9.99999974E-6 : f32
    %29 = vector.broadcast %cst_28 : f32 to vector<16x1xf32>
    %30 = arith.addf %26, %29 : vector<16x1xf32>
    %31 = math.rsqrt %30 : vector<16x1xf32>
    %32 = vector.broadcast %31 : vector<16x1xf32> to vector<16x32xf32>
    %33 = arith.mulf %28, %32 : vector<16x32xf32>
    %34 = vector.shape_cast %13 : vector<32xf32> to vector<1x32xf32>
    %35 = vector.broadcast %34 : vector<1x32xf32> to vector<16x32xf32>
    %36 = arith.mulf %33, %35 : vector<16x32xf32>
    %37 = vector.shape_cast %15 : vector<32xf32> to vector<1x32xf32>
    %38 = vector.broadcast %37 : vector<1x32xf32> to vector<16x32xf32>
    %39 = arith.addf %36, %38 : vector<16x32xf32>
    %40 = vector.extract_strided_slice %39 {offsets = [0, 0], sizes = [8, 32], strides = [1, 1]} : vector<16x32xf32> to vector<8x32xf32>
    %41 = vector.extract_strided_slice %39 {offsets = [0, 0], sizes = [8, 32], strides = [1, 1]} : vector<16x32xf32> to vector<8x32xf32>
    %cst_29 = arith.constant 0.353553385 : f32
    %42 = vector.broadcast %cst_29 : f32 to vector<8x32xf32>
    %43 = arith.mulf %40, %42 : vector<8x32xf32>
    %44 = vector.shape_cast %43 : vector<8x32xf32> to vector<8x4x8xf32>
    %45 = tpu.transpose %44, [1, 0, 2] : vector<8x4x8xf32> -> vector<4x8x8xf32>
    %46 = vector.shape_cast %41 : vector<8x32xf32> to vector<8x4x8xf32>
    %47 = tpu.transpose %46, [1, 0, 2] : vector<8x4x8xf32> -> vector<4x8x8xf32>
    "tpu.trace_start"() <{level = 10 : i32, message = "hqd,hkd->hqk"}> : () -> ()
    %cst_30 = arith.constant dense<0.000000e+00> : vector<4x8x8xf32>
    %48 = tpu.matmul %45, %47, %cst_30 {dimension_numbers = #tpu.dot_dimension_numbers<[2], [2], [1], [1], [0, 0, 0, 1, 1, 1], [0], [0]>} : vector<4x8x8xf32>, vector<4x8x8xf32>, vector<4x8x8xf32> -> vector<4x8x8xf32>
    "tpu.trace_stop"() : () -> ()
    %cst_31 = arith.constant dense<0xFF800000> : vector<4x8xf32>
    %49 = vector.multi_reduction <maximumf>, %48, %cst_31 [2] : vector<4x8x8xf32> to vector<4x8xf32>
    %50 = vector.shape_cast %49 : vector<4x8xf32> to vector<4x8x1xf32>
    %51 = vector.broadcast %50 : vector<4x8x1xf32> to vector<4x8x8xf32>
    %52 = arith.subf %48, %51 : vector<4x8x8xf32>
    %53 = math.exp %52 : vector<4x8x8xf32>
    %cst_32 = arith.constant dense<0.000000e+00> : vector<4x8xf32>
    %54 = vector.multi_reduction <add>, %53, %cst_32 [2] : vector<4x8x8xf32> to vector<4x8xf32>
    %55 = vector.shape_cast %54 : vector<4x8xf32> to vector<4x8x1xf32>
    %56 = tpu.reciprocal %55 {approx = true} : vector<4x8x1xf32> -> vector<4x8x1xf32>
    %57 = vector.broadcast %56 : vector<4x8x1xf32> to vector<4x8x8xf32>
    %58 = arith.mulf %53, %57 : vector<4x8x8xf32>
    "tpu.trace_start"() <{level = 10 : i32, message = "hqk,hkd->hqd"}> : () -> ()
    %cst_33 = arith.constant dense<0.000000e+00> : vector<4x8x8xf32>
    %59 = tpu.matmul %58, %47, %cst_33 {dimension_numbers = #tpu.dot_dimension_numbers<[2], [1], [1], [2], [0, 0, 0, 1, 1, 2], [0], [0]>} : vector<4x8x8xf32>, vector<4x8x8xf32>, vector<4x8x8xf32> -> vector<4x8x8xf32>
    "tpu.trace_stop"() : () -> ()
    %60 = tpu.transpose %59, [1, 0, 2] : vector<4x8x8xf32> -> vector<8x4x8xf32>
    %61 = vector.shape_cast %60 : vector<8x4x8xf32> to vector<8x32xf32>
    %62 = vector.extract_strided_slice %39 {offsets = [8, 0], sizes = [8, 32], strides = [1, 1]} : vector<16x32xf32> to vector<8x32xf32>
    %63 = vector.extract_strided_slice %39 {offsets = [8, 0], sizes = [8, 32], strides = [1, 1]} : vector<16x32xf32> to vector<8x32xf32>
    %cst_34 = arith.constant 0.353553385 : f32
    %64 = vector.broadcast %cst_34 : f32 to vector<8x32xf32>
    %65 = arith.mulf %62, %64 : vector<8x32xf32>
    %66 = vector.shape_cast %65 : vector<8x32xf32> to vector<8x4x8xf32>
    %67 = tpu.transpose %66, [1, 0, 2] : vector<8x4x8xf32> -> vector<4x8x8xf32>
    %68 = vector.shape_cast %63 : vector<8x32xf32> to vector<8x4x8xf32>
    %69 = tpu.transpose %68, [1, 0, 2] : vector<8x4x8xf32> -> vector<4x8x8xf32>
    "tpu.trace_start"() <{level = 10 : i32, message = "hqd,hkd->hqk"}> : () -> ()
    %cst_35 = arith.constant dense<0.000000e+00> : vector<4x8x8xf32>
    %70 = tpu.matmul %67, %69, %cst_35 {dimension_numbers = #tpu.dot_dimension_numbers<[2], [2], [1], [1], [0, 0, 0, 1, 1, 1], [0], [0]>} : vector<4x8x8xf32>, vector<4x8x8xf32>, vector<4x8x8xf32> -> vector<4x8x8xf32>
    "tpu.trace_stop"() : () -> ()
    %cst_36 = arith.constant dense<0xFF800000> : vector<4x8xf32>
    %71 = vector.multi_reduction <maximumf>, %70, %cst_36 [2] : vector<4x8x8xf32> to vector<4x8xf32>
    %72 = vector.shape_cast %71 : vector<4x8xf32> to vector<4x8x1xf32>
    %73 = vector.broadcast %72 : vector<4x8x1xf32> to vector<4x8x8xf32>
    %74 = arith.subf %70, %73 : vector<4x8x8xf32>
    %75 = math.exp %74 : vector<4x8x8xf32>
    %cst_37 = arith.constant dense<0.000000e+00> : vector<4x8xf32>
    %76 = vector.multi_reduction <add>, %75, %cst_37 [2] : vector<4x8x8xf32> to vector<4x8xf32>
    %77 = vector.shape_cast %76 : vector<4x8xf32> to vector<4x8x1xf32>
    %78 = tpu.reciprocal %77 {approx = true} : vector<4x8x1xf32> -> vector<4x8x1xf32>
    %79 = vector.broadcast %78 : vector<4x8x1xf32> to vector<4x8x8xf32>
    %80 = arith.mulf %75, %79 : vector<4x8x8xf32>
    "tpu.trace_start"() <{level = 10 : i32, message = "hqk,hkd->hqd"}> : () -> ()
    %cst_38 = arith.constant dense<0.000000e+00> : vector<4x8x8xf32>
    %81 = tpu.matmul %80, %69, %cst_38 {dimension_numbers = #tpu.dot_dimension_numbers<[2], [1], [1], [2], [0, 0, 0, 1, 1, 2], [0], [0]>} : vector<4x8x8xf32>, vector<4x8x8xf32>, vector<4x8x8xf32> -> vector<4x8x8xf32>
    "tpu.trace_stop"() : () -> ()
    %82 = tpu.transpose %81, [1, 0, 2] : vector<4x8x8xf32> -> vector<8x4x8xf32>
    %83 = vector.shape_cast %82 : vector<8x4x8xf32> to vector<8x32xf32>
    %84 = tpu.concatenate %61, %83 in 0 : vector<8x32xf32>, vector<8x32xf32> -> vector<16x32xf32>
    %85 = arith.addf %0, %84 : vector<16x32xf32>
    %86 = vector.extract_strided_slice %4 {offsets = [0, 0], sizes = [1, 32], strides = [1, 1]} : vector<2x32xf32> to vector<1x32xf32>
    %87 = vector.shape_cast %86 : vector<1x32xf32> to vector<32xf32>
    %88 = vector.extract_strided_slice %5 {offsets = [0, 0], sizes = [1, 32], strides = [1, 1]} : vector<2x32xf32> to vector<1x32xf32>
    %89 = vector.shape_cast %88 : vector<1x32xf32> to vector<32xf32>
    %cst_39 = arith.constant dense<0.000000e+00> : vector<16xf32>
    %90 = vector.multi_reduction <add>, %85, %cst_39 [1] : vector<16x32xf32> to vector<16xf32>
    %91 = vector.shape_cast %90 : vector<16xf32> to vector<16x1xf32>
    %cst_40 = arith.constant 3.200000e+01 : f32
    %92 = vector.broadcast %cst_40 : f32 to vector<16x1xf32>
    %93 = arith.divf %91, %92 : vector<16x1xf32>
    %94 = vector.broadcast %93 : vector<16x1xf32> to vector<16x32xf32>
    %95 = arith.subf %85, %94 : vector<16x32xf32>
    %96 = arith.mulf %95, %95 : vector<16x32xf32>
    %cst_41 = arith.constant dense<0.000000e+00> : vector<16xf32>
    %97 = vector.multi_reduction <add>, %96, %cst_41 [1] : vector<16x32xf32> to vector<16xf32>
    %98 = vector.shape_cast %97 : vector<16xf32> to vector<16x1xf32>
    %cst_42 = arith.constant 3.200000e+01 : f32
    %99 = vector.broadcast %cst_42 : f32 to vector<16x1xf32>
    %100 = arith.divf %98, %99 : vector<16x1xf32>
    %101 = vector.broadcast %93 : vector<16x1xf32> to vector<16x32xf32>
    %102 = arith.subf %85, %101 : vector<16x32xf32>
    %cst_43 = arith.constant 9.99999974E-6 : f32
    %103 = vector.broadcast %cst_43 : f32 to vector<16x1xf32>
    %104 = arith.addf %100, %103 : vector<16x1xf32>
    %105 = math.rsqrt %104 : vector<16x1xf32>
    %106 = vector.broadcast %105 : vector<16x1xf32> to vector<16x32xf32>
    %107 = arith.mulf %102, %106 : vector<16x32xf32>
    %108 = vector.shape_cast %87 : vector<32xf32> to vector<1x32xf32>
    %109 = vector.broadcast %108 : vector<1x32xf32> to vector<16x32xf32>
    %110 = arith.mulf %107, %109 : vector<16x32xf32>
    %111 = vector.shape_cast %89 : vector<32xf32> to vector<1x32xf32>
    %112 = vector.broadcast %111 : vector<1x32xf32> to vector<16x32xf32>
    %113 = arith.addf %110, %112 : vector<16x32xf32>
    %114 = vector.extract_strided_slice %113 {offsets = [0, 0], sizes = [8, 32], strides = [1, 1]} : vector<16x32xf32> to vector<8x32xf32>
    %115 = vector.extract_strided_slice %1 {offsets = [0, 0], sizes = [8, 32], strides = [1, 1]} : vector<16x32xf32> to vector<8x32xf32>
    %cst_44 = arith.constant 0.353553385 : f32
    %116 = vector.broadcast %cst_44 : f32 to vector<8x32xf32>
    %117 = arith.mulf %114, %116 : vector<8x32xf32>
    %118 = vector.shape_cast %117 : vector<8x32xf32> to vector<8x4x8xf32>
    %119 = tpu.transpose %118, [1, 0, 2] : vector<8x4x8xf32> -> vector<4x8x8xf32>
    %120 = vector.shape_cast %115 : vector<8x32xf32> to vector<8x4x8xf32>
    %121 = tpu.transpose %120, [1, 0, 2] : vector<8x4x8xf32> -> vector<4x8x8xf32>
    "tpu.trace_start"() <{level = 10 : i32, message = "hqd,hkd->hqk"}> : () -> ()
    %cst_45 = arith.constant dense<0.000000e+00> : vector<4x8x8xf32>
    %122 = tpu.matmul %119, %121, %cst_45 {dimension_numbers = #tpu.dot_dimension_numbers<[2], [2], [1], [1], [0, 0, 0, 1, 1, 1], [0], [0]>} : vector<4x8x8xf32>, vector<4x8x8xf32>, vector<4x8x8xf32> -> vector<4x8x8xf32>
    "tpu.trace_stop"() : () -> ()
    %cst_46 = arith.constant dense<0xFF800000> : vector<4x8xf32>
    %123 = vector.multi_reduction <maximumf>, %122, %cst_46 [2] : vector<4x8x8xf32> to vector<4x8xf32>
    %124 = vector.shape_cast %123 : vector<4x8xf32> to vector<4x8x1xf32>
    %125 = vector.broadcast %124 : vector<4x8x1xf32> to vector<4x8x8xf32>
    %126 = arith.subf %122, %125 : vector<4x8x8xf32>
    %127 = math.exp %126 : vector<4x8x8xf32>
    %cst_47 = arith.constant dense<0.000000e+00> : vector<4x8xf32>
    %128 = vector.multi_reduction <add>, %127, %cst_47 [2] : vector<4x8x8xf32> to vector<4x8xf32>
    %129 = vector.shape_cast %128 : vector<4x8xf32> to vector<4x8x1xf32>
    %130 = tpu.reciprocal %129 {approx = true} : vector<4x8x1xf32> -> vector<4x8x1xf32>
    %131 = vector.broadcast %130 : vector<4x8x1xf32> to vector<4x8x8xf32>
    %132 = arith.mulf %127, %131 : vector<4x8x8xf32>
    "tpu.trace_start"() <{level = 10 : i32, message = "hqk,hkd->hqd"}> : () -> ()
    %cst_48 = arith.constant dense<0.000000e+00> : vector<4x8x8xf32>
    %133 = tpu.matmul %132, %121, %cst_48 {dimension_numbers = #tpu.dot_dimension_numbers<[2], [1], [1], [2], [0, 0, 0, 1, 1, 2], [0], [0]>} : vector<4x8x8xf32>, vector<4x8x8xf32>, vector<4x8x8xf32> -> vector<4x8x8xf32>
    "tpu.trace_stop"() : () -> ()
    %134 = tpu.transpose %133, [1, 0, 2] : vector<4x8x8xf32> -> vector<8x4x8xf32>
    %135 = vector.shape_cast %134 : vector<8x4x8xf32> to vector<8x32xf32>
    %136 = vector.extract_strided_slice %113 {offsets = [8, 0], sizes = [8, 32], strides = [1, 1]} : vector<16x32xf32> to vector<8x32xf32>
    %137 = vector.extract_strided_slice %1 {offsets = [8, 0], sizes = [8, 32], strides = [1, 1]} : vector<16x32xf32> to vector<8x32xf32>
    %cst_49 = arith.constant 0.353553385 : f32
    %138 = vector.broadcast %cst_49 : f32 to vector<8x32xf32>
    %139 = arith.mulf %136, %138 : vector<8x32xf32>
    %140 = vector.shape_cast %139 : vector<8x32xf32> to vector<8x4x8xf32>
    %141 = tpu.transpose %140, [1, 0, 2] : vector<8x4x8xf32> -> vector<4x8x8xf32>
    %142 = vector.shape_cast %137 : vector<8x32xf32> to vector<8x4x8xf32>
    %143 = tpu.transpose %142, [1, 0, 2] : vector<8x4x8xf32> -> vector<4x8x8xf32>
    "tpu.trace_start"() <{level = 10 : i32, message = "hqd,hkd->hqk"}> : () -> ()
    %cst_50 = arith.constant dense<0.000000e+00> : vector<4x8x8xf32>
    %144 = tpu.matmul %141, %143, %cst_50 {dimension_numbers = #tpu.dot_dimension_numbers<[2], [2], [1], [1], [0, 0, 0, 1, 1, 1], [0], [0]>} : vector<4x8x8xf32>, vector<4x8x8xf32>, vector<4x8x8xf32> -> vector<4x8x8xf32>
    "tpu.trace_stop"() : () -> ()
    %cst_51 = arith.constant dense<0xFF800000> : vector<4x8xf32>
    %145 = vector.multi_reduction <maximumf>, %144, %cst_51 [2] : vector<4x8x8xf32> to vector<4x8xf32>
    %146 = vector.shape_cast %145 : vector<4x8xf32> to vector<4x8x1xf32>
    %147 = vector.broadcast %146 : vector<4x8x1xf32> to vector<4x8x8xf32>
    %148 = arith.subf %144, %147 : vector<4x8x8xf32>
    %149 = math.exp %148 : vector<4x8x8xf32>
    %cst_52 = arith.constant dense<0.000000e+00> : vector<4x8xf32>
    %150 = vector.multi_reduction <add>, %149, %cst_52 [2] : vector<4x8x8xf32> to vector<4x8xf32>
    %151 = vector.shape_cast %150 : vector<4x8xf32> to vector<4x8x1xf32>
    %152 = tpu.reciprocal %151 {approx = true} : vector<4x8x1xf32> -> vector<4x8x1xf32>
    %153 = vector.broadcast %152 : vector<4x8x1xf32> to vector<4x8x8xf32>
    %154 = arith.mulf %149, %153 : vector<4x8x8xf32>
    "tpu.trace_start"() <{level = 10 : i32, message = "hqk,hkd->hqd"}> : () -> ()
    %cst_53 = arith.constant dense<0.000000e+00> : vector<4x8x8xf32>
    %155 = tpu.matmul %154, %143, %cst_53 {dimension_numbers = #tpu.dot_dimension_numbers<[2], [1], [1], [2], [0, 0, 0, 1, 1, 2], [0], [0]>} : vector<4x8x8xf32>, vector<4x8x8xf32>, vector<4x8x8xf32> -> vector<4x8x8xf32>
    "tpu.trace_stop"() : () -> ()
    %156 = tpu.transpose %155, [1, 0, 2] : vector<4x8x8xf32> -> vector<8x4x8xf32>
    %157 = vector.shape_cast %156 : vector<8x4x8xf32> to vector<8x32xf32>
    %158 = tpu.concatenate %135, %157 in 0 : vector<8x32xf32>, vector<8x32xf32> -> vector<16x32xf32>
    %159 = arith.addf %85, %158 : vector<16x32xf32>
    %160 = vector.extract_strided_slice %6 {offsets = [0, 0], sizes = [1, 32], strides = [1, 1]} : vector<2x32xf32> to vector<1x32xf32>
    %161 = vector.shape_cast %160 : vector<1x32xf32> to vector<32xf32>
    %162 = vector.extract_strided_slice %7 {offsets = [0, 0], sizes = [1, 32], strides = [1, 1]} : vector<2x32xf32> to vector<1x32xf32>
    %163 = vector.shape_cast %162 : vector<1x32xf32> to vector<32xf32>
    %cst_54 = arith.constant dense<0.000000e+00> : vector<16xf32>
    %164 = vector.multi_reduction <add>, %159, %cst_54 [1] : vector<16x32xf32> to vector<16xf32>
    %165 = vector.shape_cast %164 : vector<16xf32> to vector<16x1xf32>
    %cst_55 = arith.constant 3.200000e+01 : f32
    %166 = vector.broadcast %cst_55 : f32 to vector<16x1xf32>
    %167 = arith.divf %165, %166 : vector<16x1xf32>
    %168 = vector.broadcast %167 : vector<16x1xf32> to vector<16x32xf32>
    %169 = arith.subf %159, %168 : vector<16x32xf32>
    %170 = arith.mulf %169, %169 : vector<16x32xf32>
    %cst_56 = arith.constant dense<0.000000e+00> : vector<16xf32>
    %171 = vector.multi_reduction <add>, %170, %cst_56 [1] : vector<16x32xf32> to vector<16xf32>
    %172 = vector.shape_cast %171 : vector<16xf32> to vector<16x1xf32>
    %cst_57 = arith.constant 3.200000e+01 : f32
    %173 = vector.broadcast %cst_57 : f32 to vector<16x1xf32>
    %174 = arith.divf %172, %173 : vector<16x1xf32>
    %175 = vector.broadcast %167 : vector<16x1xf32> to vector<16x32xf32>
    %176 = arith.subf %159, %175 : vector<16x32xf32>
    %cst_58 = arith.constant 9.99999974E-6 : f32
    %177 = vector.broadcast %cst_58 : f32 to vector<16x1xf32>
    %178 = arith.addf %174, %177 : vector<16x1xf32>
    %179 = math.rsqrt %178 : vector<16x1xf32>
    %180 = vector.broadcast %179 : vector<16x1xf32> to vector<16x32xf32>
    %181 = arith.mulf %176, %180 : vector<16x32xf32>
    %182 = vector.shape_cast %161 : vector<32xf32> to vector<1x32xf32>
    %183 = vector.broadcast %182 : vector<1x32xf32> to vector<16x32xf32>
    %184 = arith.mulf %181, %183 : vector<16x32xf32>
    %185 = vector.shape_cast %163 : vector<32xf32> to vector<1x32xf32>
    %186 = vector.broadcast %185 : vector<1x32xf32> to vector<16x32xf32>
    %187 = arith.addf %184, %186 : vector<16x32xf32>
    %188 = vector.extract_strided_slice %8 {offsets = [0, 0, 0], sizes = [1, 32, 64], strides = [1, 1, 1]} : vector<2x32x64xf32> to vector<1x32x64xf32>
    %189 = vector.shape_cast %188 : vector<1x32x64xf32> to vector<32x64xf32>
    %cst_59 = arith.constant dense<0.000000e+00> : vector<16x64xf32>
    %190 = tpu.matmul %187, %189, %cst_59 {dimension_numbers = #tpu.dot_dimension_numbers<[1], [0], [0], [1], [0, 0, 1, 1], [], []>} : vector<16x32xf32>, vector<32x64xf32>, vector<16x64xf32> -> vector<16x64xf32>
    %191 = vector.extract_strided_slice %9 {offsets = [0, 0], sizes = [1, 64], strides = [1, 1]} : vector<2x64xf32> to vector<1x64xf32>
    %192 = vector.shape_cast %191 : vector<1x64xf32> to vector<64xf32>
    %193 = vector.shape_cast %192 : vector<64xf32> to vector<1x64xf32>
    %194 = vector.broadcast %193 : vector<1x64xf32> to vector<16x64xf32>
    %195 = arith.addf %190, %194 : vector<16x64xf32>
    %cst_60 = arith.constant 0.000000e+00 : f32
    %196 = vector.broadcast %cst_60 : f32 to vector<16x64xf32>
    %197 = arith.maximumf %195, %196 : vector<16x64xf32>
    %198 = vector.extract_strided_slice %10 {offsets = [0, 0, 0], sizes = [1, 64, 32], strides = [1, 1, 1]} : vector<2x64x32xf32> to vector<1x64x32xf32>
    %199 = vector.shape_cast %198 : vector<1x64x32xf32> to vector<64x32xf32>
    %cst_61 = arith.constant dense<0.000000e+00> : vector<16x32xf32>
    %200 = tpu.matmul %197, %199, %cst_61 {dimension_numbers = #tpu.dot_dimension_numbers<[1], [0], [0], [1], [0, 0, 1, 1], [], []>} : vector<16x64xf32>, vector<64x32xf32>, vector<16x32xf32> -> vector<16x32xf32>
    %201 = arith.addf %159, %200 : vector<16x32xf32>
    %202 = vector.extract_strided_slice %11 {offsets = [0, 0], sizes = [1, 32], strides = [1, 1]} : vector<2x32xf32> to vector<1x32xf32>
    %203 = vector.shape_cast %202 : vector<1x32xf32> to vector<32xf32>
    %204 = vector.shape_cast %203 : vector<32xf32> to vector<1x32xf32>
    %205 = vector.broadcast %204 : vector<1x32xf32> to vector<16x32xf32>
    %206 = arith.addf %201, %205 : vector<16x32xf32>
    %207 = vector.extract_strided_slice %2 {offsets = [1, 0], sizes = [1, 32], strides = [1, 1]} : vector<2x32xf32> to vector<1x32xf32>
    %208 = vector.shape_cast %207 : vector<1x32xf32> to vector<32xf32>
    %209 = vector.extract_strided_slice %3 {offsets = [1, 0], sizes = [1, 32], strides = [1, 1]} : vector<2x32xf32> to vector<1x32xf32>
    %210 = vector.shape_cast %209 : vector<1x32xf32> to vector<32xf32>
    %cst_62 = arith.constant dense<0.000000e+00> : vector<16xf32>
    %211 = vector.multi_reduction <add>, %206, %cst_62 [1] : vector<16x32xf32> to vector<16xf32>
    %212 = vector.shape_cast %211 : vector<16xf32> to vector<16x1xf32>
    %cst_63 = arith.constant 3.200000e+01 : f32
    %213 = vector.broadcast %cst_63 : f32 to vector<16x1xf32>
    %214 = arith.divf %212, %213 : vector<16x1xf32>
    %215 = vector.broadcast %214 : vector<16x1xf32> to vector<16x32xf32>
    %216 = arith.subf %206, %215 : vector<16x32xf32>
    %217 = arith.mulf %216, %216 : vector<16x32xf32>
    %cst_64 = arith.constant dense<0.000000e+00> : vector<16xf32>
    %218 = vector.multi_reduction <add>, %217, %cst_64 [1] : vector<16x32xf32> to vector<16xf32>
    %219 = vector.shape_cast %218 : vector<16xf32> to vector<16x1xf32>
    %cst_65 = arith.constant 3.200000e+01 : f32
    %220 = vector.broadcast %cst_65 : f32 to vector<16x1xf32>
    %221 = arith.divf %219, %220 : vector<16x1xf32>
    %222 = vector.broadcast %214 : vector<16x1xf32> to vector<16x32xf32>
    %223 = arith.subf %206, %222 : vector<16x32xf32>
    %cst_66 = arith.constant 9.99999974E-6 : f32
    %224 = vector.broadcast %cst_66 : f32 to vector<16x1xf32>
    %225 = arith.addf %221, %224 : vector<16x1xf32>
    %226 = math.rsqrt %225 : vector<16x1xf32>
    %227 = vector.broadcast %226 : vector<16x1xf32> to vector<16x32xf32>
    %228 = arith.mulf %223, %227 : vector<16x32xf32>
    %229 = vector.shape_cast %208 : vector<32xf32> to vector<1x32xf32>
    %230 = vector.broadcast %229 : vector<1x32xf32> to vector<16x32xf32>
    %231 = arith.mulf %228, %230 : vector<16x32xf32>
    %232 = vector.shape_cast %210 : vector<32xf32> to vector<1x32xf32>
    %233 = vector.broadcast %232 : vector<1x32xf32> to vector<16x32xf32>
    %234 = arith.addf %231, %233 : vector<16x32xf32>
    %235 = vector.extract_strided_slice %234 {offsets = [0, 0], sizes = [8, 32], strides = [1, 1]} : vector<16x32xf32> to vector<8x32xf32>
    %236 = vector.extract_strided_slice %234 {offsets = [0, 0], sizes = [8, 32], strides = [1, 1]} : vector<16x32xf32> to vector<8x32xf32>
    %cst_67 = arith.constant 0.353553385 : f32
    %237 = vector.broadcast %cst_67 : f32 to vector<8x32xf32>
    %238 = arith.mulf %235, %237 : vector<8x32xf32>
    %239 = vector.shape_cast %238 : vector<8x32xf32> to vector<8x4x8xf32>
    %240 = tpu.transpose %239, [1, 0, 2] : vector<8x4x8xf32> -> vector<4x8x8xf32>
    %241 = vector.shape_cast %236 : vector<8x32xf32> to vector<8x4x8xf32>
    %242 = tpu.transpose %241, [1, 0, 2] : vector<8x4x8xf32> -> vector<4x8x8xf32>
    "tpu.trace_start"() <{level = 10 : i32, message = "hqd,hkd->hqk"}> : () -> ()
    %cst_68 = arith.constant dense<0.000000e+00> : vector<4x8x8xf32>
    %243 = tpu.matmul %240, %242, %cst_68 {dimension_numbers = #tpu.dot_dimension_numbers<[2], [2], [1], [1], [0, 0, 0, 1, 1, 1], [0], [0]>} : vector<4x8x8xf32>, vector<4x8x8xf32>, vector<4x8x8xf32> -> vector<4x8x8xf32>
    "tpu.trace_stop"() : () -> ()
    %cst_69 = arith.constant dense<0xFF800000> : vector<4x8xf32>
    %244 = vector.multi_reduction <maximumf>, %243, %cst_69 [2] : vector<4x8x8xf32> to vector<4x8xf32>
    %245 = vector.shape_cast %244 : vector<4x8xf32> to vector<4x8x1xf32>
    %246 = vector.broadcast %245 : vector<4x8x1xf32> to vector<4x8x8xf32>
    %247 = arith.subf %243, %246 : vector<4x8x8xf32>
    %248 = math.exp %247 : vector<4x8x8xf32>
    %cst_70 = arith.constant dense<0.000000e+00> : vector<4x8xf32>
    %249 = vector.multi_reduction <add>, %248, %cst_70 [2] : vector<4x8x8xf32> to vector<4x8xf32>
    %250 = vector.shape_cast %249 : vector<4x8xf32> to vector<4x8x1xf32>
    %251 = tpu.reciprocal %250 {approx = true} : vector<4x8x1xf32> -> vector<4x8x1xf32>
    %252 = vector.broadcast %251 : vector<4x8x1xf32> to vector<4x8x8xf32>
    %253 = arith.mulf %248, %252 : vector<4x8x8xf32>
    "tpu.trace_start"() <{level = 10 : i32, message = "hqk,hkd->hqd"}> : () -> ()
    %cst_71 = arith.constant dense<0.000000e+00> : vector<4x8x8xf32>
    %254 = tpu.matmul %253, %242, %cst_71 {dimension_numbers = #tpu.dot_dimension_numbers<[2], [1], [1], [2], [0, 0, 0, 1, 1, 2], [0], [0]>} : vector<4x8x8xf32>, vector<4x8x8xf32>, vector<4x8x8xf32> -> vector<4x8x8xf32>
    "tpu.trace_stop"() : () -> ()
    %255 = tpu.transpose %254, [1, 0, 2] : vector<4x8x8xf32> -> vector<8x4x8xf32>
    %256 = vector.shape_cast %255 : vector<8x4x8xf32> to vector<8x32xf32>
    %257 = vector.extract_strided_slice %234 {offsets = [8, 0], sizes = [8, 32], strides = [1, 1]} : vector<16x32xf32> to vector<8x32xf32>
    %258 = vector.extract_strided_slice %234 {offsets = [8, 0], sizes = [8, 32], strides = [1, 1]} : vector<16x32xf32> to vector<8x32xf32>
    %cst_72 = arith.constant 0.353553385 : f32
    %259 = vector.broadcast %cst_72 : f32 to vector<8x32xf32>
    %260 = arith.mulf %257, %259 : vector<8x32xf32>
    %261 = vector.shape_cast %260 : vector<8x32xf32> to vector<8x4x8xf32>
    %262 = tpu.transpose %261, [1, 0, 2] : vector<8x4x8xf32> -> vector<4x8x8xf32>
    %263 = vector.shape_cast %258 : vector<8x32xf32> to vector<8x4x8xf32>
    %264 = tpu.transpose %263, [1, 0, 2] : vector<8x4x8xf32> -> vector<4x8x8xf32>
    "tpu.trace_start"() <{level = 10 : i32, message = "hqd,hkd->hqk"}> : () -> ()
    %cst_73 = arith.constant dense<0.000000e+00> : vector<4x8x8xf32>
    %265 = tpu.matmul %262, %264, %cst_73 {dimension_numbers = #tpu.dot_dimension_numbers<[2], [2], [1], [1], [0, 0, 0, 1, 1, 1], [0], [0]>} : vector<4x8x8xf32>, vector<4x8x8xf32>, vector<4x8x8xf32> -> vector<4x8x8xf32>
    "tpu.trace_stop"() : () -> ()
    %cst_74 = arith.constant dense<0xFF800000> : vector<4x8xf32>
    %266 = vector.multi_reduction <maximumf>, %265, %cst_74 [2] : vector<4x8x8xf32> to vector<4x8xf32>
    %267 = vector.shape_cast %266 : vector<4x8xf32> to vector<4x8x1xf32>
    %268 = vector.broadcast %267 : vector<4x8x1xf32> to vector<4x8x8xf32>
    %269 = arith.subf %265, %268 : vector<4x8x8xf32>
    %270 = math.exp %269 : vector<4x8x8xf32>
    %cst_75 = arith.constant dense<0.000000e+00> : vector<4x8xf32>
    %271 = vector.multi_reduction <add>, %270, %cst_75 [2] : vector<4x8x8xf32> to vector<4x8xf32>
    %272 = vector.shape_cast %271 : vector<4x8xf32> to vector<4x8x1xf32>
    %273 = tpu.reciprocal %272 {approx = true} : vector<4x8x1xf32> -> vector<4x8x1xf32>
    %274 = vector.broadcast %273 : vector<4x8x1xf32> to vector<4x8x8xf32>
    %275 = arith.mulf %270, %274 : vector<4x8x8xf32>
    "tpu.trace_start"() <{level = 10 : i32, message = "hqk,hkd->hqd"}> : () -> ()
    %cst_76 = arith.constant dense<0.000000e+00> : vector<4x8x8xf32>
    %276 = tpu.matmul %275, %264, %cst_76 {dimension_numbers = #tpu.dot_dimension_numbers<[2], [1], [1], [2], [0, 0, 0, 1, 1, 2], [0], [0]>} : vector<4x8x8xf32>, vector<4x8x8xf32>, vector<4x8x8xf32> -> vector<4x8x8xf32>
    "tpu.trace_stop"() : () -> ()
    %277 = tpu.transpose %276, [1, 0, 2] : vector<4x8x8xf32> -> vector<8x4x8xf32>
    %278 = vector.shape_cast %277 : vector<8x4x8xf32> to vector<8x32xf32>
    %279 = tpu.concatenate %256, %278 in 0 : vector<8x32xf32>, vector<8x32xf32> -> vector<16x32xf32>
    %280 = arith.addf %206, %279 : vector<16x32xf32>
    %281 = vector.extract_strided_slice %4 {offsets = [1, 0], sizes = [1, 32], strides = [1, 1]} : vector<2x32xf32> to vector<1x32xf32>
    %282 = vector.shape_cast %281 : vector<1x32xf32> to vector<32xf32>
    %283 = vector.extract_strided_slice %5 {offsets = [1, 0], sizes = [1, 32], strides = [1, 1]} : vector<2x32xf32> to vector<1x32xf32>
    %284 = vector.shape_cast %283 : vector<1x32xf32> to vector<32xf32>
    %cst_77 = arith.constant dense<0.000000e+00> : vector<16xf32>
    %285 = vector.multi_reduction <add>, %280, %cst_77 [1] : vector<16x32xf32> to vector<16xf32>
    %286 = vector.shape_cast %285 : vector<16xf32> to vector<16x1xf32>
    %cst_78 = arith.constant 3.200000e+01 : f32
    %287 = vector.broadcast %cst_78 : f32 to vector<16x1xf32>
    %288 = arith.divf %286, %287 : vector<16x1xf32>
    %289 = vector.broadcast %288 : vector<16x1xf32> to vector<16x32xf32>
    %290 = arith.subf %280, %289 : vector<16x32xf32>
    %291 = arith.mulf %290, %290 : vector<16x32xf32>
    %cst_79 = arith.constant dense<0.000000e+00> : vector<16xf32>
    %292 = vector.multi_reduction <add>, %291, %cst_79 [1] : vector<16x32xf32> to vector<16xf32>
    %293 = vector.shape_cast %292 : vector<16xf32> to vector<16x1xf32>
    %cst_80 = arith.constant 3.200000e+01 : f32
    %294 = vector.broadcast %cst_80 : f32 to vector<16x1xf32>
    %295 = arith.divf %293, %294 : vector<16x1xf32>
    %296 = vector.broadcast %288 : vector<16x1xf32> to vector<16x32xf32>
    %297 = arith.subf %280, %296 : vector<16x32xf32>
    %cst_81 = arith.constant 9.99999974E-6 : f32
    %298 = vector.broadcast %cst_81 : f32 to vector<16x1xf32>
    %299 = arith.addf %295, %298 : vector<16x1xf32>
    %300 = math.rsqrt %299 : vector<16x1xf32>
    %301 = vector.broadcast %300 : vector<16x1xf32> to vector<16x32xf32>
    %302 = arith.mulf %297, %301 : vector<16x32xf32>
    %303 = vector.shape_cast %282 : vector<32xf32> to vector<1x32xf32>
    %304 = vector.broadcast %303 : vector<1x32xf32> to vector<16x32xf32>
    %305 = arith.mulf %302, %304 : vector<16x32xf32>
    %306 = vector.shape_cast %284 : vector<32xf32> to vector<1x32xf32>
    %307 = vector.broadcast %306 : vector<1x32xf32> to vector<16x32xf32>
    %308 = arith.addf %305, %307 : vector<16x32xf32>
    %309 = vector.extract_strided_slice %308 {offsets = [0, 0], sizes = [8, 32], strides = [1, 1]} : vector<16x32xf32> to vector<8x32xf32>
    %310 = vector.extract_strided_slice %1 {offsets = [0, 0], sizes = [8, 32], strides = [1, 1]} : vector<16x32xf32> to vector<8x32xf32>
    %cst_82 = arith.constant 0.353553385 : f32
    %311 = vector.broadcast %cst_82 : f32 to vector<8x32xf32>
    %312 = arith.mulf %309, %311 : vector<8x32xf32>
    %313 = vector.shape_cast %312 : vector<8x32xf32> to vector<8x4x8xf32>
    %314 = tpu.transpose %313, [1, 0, 2] : vector<8x4x8xf32> -> vector<4x8x8xf32>
    %315 = vector.shape_cast %310 : vector<8x32xf32> to vector<8x4x8xf32>
    %316 = tpu.transpose %315, [1, 0, 2] : vector<8x4x8xf32> -> vector<4x8x8xf32>
    "tpu.trace_start"() <{level = 10 : i32, message = "hqd,hkd->hqk"}> : () -> ()
    %cst_83 = arith.constant dense<0.000000e+00> : vector<4x8x8xf32>
    %317 = tpu.matmul %314, %316, %cst_83 {dimension_numbers = #tpu.dot_dimension_numbers<[2], [2], [1], [1], [0, 0, 0, 1, 1, 1], [0], [0]>} : vector<4x8x8xf32>, vector<4x8x8xf32>, vector<4x8x8xf32> -> vector<4x8x8xf32>
    "tpu.trace_stop"() : () -> ()
    %cst_84 = arith.constant dense<0xFF800000> : vector<4x8xf32>
    %318 = vector.multi_reduction <maximumf>, %317, %cst_84 [2] : vector<4x8x8xf32> to vector<4x8xf32>
    %319 = vector.shape_cast %318 : vector<4x8xf32> to vector<4x8x1xf32>
    %320 = vector.broadcast %319 : vector<4x8x1xf32> to vector<4x8x8xf32>
    %321 = arith.subf %317, %320 : vector<4x8x8xf32>
    %322 = math.exp %321 : vector<4x8x8xf32>
    %cst_85 = arith.constant dense<0.000000e+00> : vector<4x8xf32>
    %323 = vector.multi_reduction <add>, %322, %cst_85 [2] : vector<4x8x8xf32> to vector<4x8xf32>
    %324 = vector.shape_cast %323 : vector<4x8xf32> to vector<4x8x1xf32>
    %325 = tpu.reciprocal %324 {approx = true} : vector<4x8x1xf32> -> vector<4x8x1xf32>
    %326 = vector.broadcast %325 : vector<4x8x1xf32> to vector<4x8x8xf32>
    %327 = arith.mulf %322, %326 : vector<4x8x8xf32>
    "tpu.trace_start"() <{level = 10 : i32, message = "hqk,hkd->hqd"}> : () -> ()
    %cst_86 = arith.constant dense<0.000000e+00> : vector<4x8x8xf32>
    %328 = tpu.matmul %327, %316, %cst_86 {dimension_numbers = #tpu.dot_dimension_numbers<[2], [1], [1], [2], [0, 0, 0, 1, 1, 2], [0], [0]>} : vector<4x8x8xf32>, vector<4x8x8xf32>, vector<4x8x8xf32> -> vector<4x8x8xf32>
    "tpu.trace_stop"() : () -> ()
    %329 = tpu.transpose %328, [1, 0, 2] : vector<4x8x8xf32> -> vector<8x4x8xf32>
    %330 = vector.shape_cast %329 : vector<8x4x8xf32> to vector<8x32xf32>
    %331 = vector.extract_strided_slice %308 {offsets = [8, 0], sizes = [8, 32], strides = [1, 1]} : vector<16x32xf32> to vector<8x32xf32>
    %332 = vector.extract_strided_slice %1 {offsets = [8, 0], sizes = [8, 32], strides = [1, 1]} : vector<16x32xf32> to vector<8x32xf32>
    %cst_87 = arith.constant 0.353553385 : f32
    %333 = vector.broadcast %cst_87 : f32 to vector<8x32xf32>
    %334 = arith.mulf %331, %333 : vector<8x32xf32>
    %335 = vector.shape_cast %334 : vector<8x32xf32> to vector<8x4x8xf32>
    %336 = tpu.transpose %335, [1, 0, 2] : vector<8x4x8xf32> -> vector<4x8x8xf32>
    %337 = vector.shape_cast %332 : vector<8x32xf32> to vector<8x4x8xf32>
    %338 = tpu.transpose %337, [1, 0, 2] : vector<8x4x8xf32> -> vector<4x8x8xf32>
    "tpu.trace_start"() <{level = 10 : i32, message = "hqd,hkd->hqk"}> : () -> ()
    %cst_88 = arith.constant dense<0.000000e+00> : vector<4x8x8xf32>
    %339 = tpu.matmul %336, %338, %cst_88 {dimension_numbers = #tpu.dot_dimension_numbers<[2], [2], [1], [1], [0, 0, 0, 1, 1, 1], [0], [0]>} : vector<4x8x8xf32>, vector<4x8x8xf32>, vector<4x8x8xf32> -> vector<4x8x8xf32>
    "tpu.trace_stop"() : () -> ()
    %cst_89 = arith.constant dense<0xFF800000> : vector<4x8xf32>
    %340 = vector.multi_reduction <maximumf>, %339, %cst_89 [2] : vector<4x8x8xf32> to vector<4x8xf32>
    %341 = vector.shape_cast %340 : vector<4x8xf32> to vector<4x8x1xf32>
    %342 = vector.broadcast %341 : vector<4x8x1xf32> to vector<4x8x8xf32>
    %343 = arith.subf %339, %342 : vector<4x8x8xf32>
    %344 = math.exp %343 : vector<4x8x8xf32>
    %cst_90 = arith.constant dense<0.000000e+00> : vector<4x8xf32>
    %345 = vector.multi_reduction <add>, %344, %cst_90 [2] : vector<4x8x8xf32> to vector<4x8xf32>
    %346 = vector.shape_cast %345 : vector<4x8xf32> to vector<4x8x1xf32>
    %347 = tpu.reciprocal %346 {approx = true} : vector<4x8x1xf32> -> vector<4x8x1xf32>
    %348 = vector.broadcast %347 : vector<4x8x1xf32> to vector<4x8x8xf32>
    %349 = arith.mulf %344, %348 : vector<4x8x8xf32>
    "tpu.trace_start"() <{level = 10 : i32, message = "hqk,hkd->hqd"}> : () -> ()
    %cst_91 = arith.constant dense<0.000000e+00> : vector<4x8x8xf32>
    %350 = tpu.matmul %349, %338, %cst_91 {dimension_numbers = #tpu.dot_dimension_numbers<[2], [1], [1], [2], [0, 0, 0, 1, 1, 2], [0], [0]>} : vector<4x8x8xf32>, vector<4x8x8xf32>, vector<4x8x8xf32> -> vector<4x8x8xf32>
    "tpu.trace_stop"() : () -> ()
    %351 = tpu.transpose %350, [1, 0, 2] : vector<4x8x8xf32> -> vector<8x4x8xf32>
    %352 = vector.shape_cast %351 : vector<8x4x8xf32> to vector<8x32xf32>
    %353 = tpu.concatenate %330, %352 in 0 : vector<8x32xf32>, vector<8x32xf32> -> vector<16x32xf32>
    %354 = arith.addf %280, %353 : vector<16x32xf32>
    %355 = vector.extract_strided_slice %6 {offsets = [1, 0], sizes = [1, 32], strides = [1, 1]} : vector<2x32xf32> to vector<1x32xf32>
    %356 = vector.shape_cast %355 : vector<1x32xf32> to vector<32xf32>
    %357 = vector.extract_strided_slice %7 {offsets = [1, 0], sizes = [1, 32], strides = [1, 1]} : vector<2x32xf32> to vector<1x32xf32>
    %358 = vector.shape_cast %357 : vector<1x32xf32> to vector<32xf32>
    %cst_92 = arith.constant dense<0.000000e+00> : vector<16xf32>
    %359 = vector.multi_reduction <add>, %354, %cst_92 [1] : vector<16x32xf32> to vector<16xf32>
    %360 = vector.shape_cast %359 : vector<16xf32> to vector<16x1xf32>
    %cst_93 = arith.constant 3.200000e+01 : f32
    %361 = vector.broadcast %cst_93 : f32 to vector<16x1xf32>
    %362 = arith.divf %360, %361 : vector<16x1xf32>
    %363 = vector.broadcast %362 : vector<16x1xf32> to vector<16x32xf32>
    %364 = arith.subf %354, %363 : vector<16x32xf32>
    %365 = arith.mulf %364, %364 : vector<16x32xf32>
    %cst_94 = arith.constant dense<0.000000e+00> : vector<16xf32>
    %366 = vector.multi_reduction <add>, %365, %cst_94 [1] : vector<16x32xf32> to vector<16xf32>
    %367 = vector.shape_cast %366 : vector<16xf32> to vector<16x1xf32>
    %cst_95 = arith.constant 3.200000e+01 : f32
    %368 = vector.broadcast %cst_95 : f32 to vector<16x1xf32>
    %369 = arith.divf %367, %368 : vector<16x1xf32>
    %370 = vector.broadcast %362 : vector<16x1xf32> to vector<16x32xf32>
    %371 = arith.subf %354, %370 : vector<16x32xf32>
    %cst_96 = arith.constant 9.99999974E-6 : f32
    %372 = vector.broadcast %cst_96 : f32 to vector<16x1xf32>
    %373 = arith.addf %369, %372 : vector<16x1xf32>
    %374 = math.rsqrt %373 : vector<16x1xf32>
    %375 = vector.broadcast %374 : vector<16x1xf32> to vector<16x32xf32>
    %376 = arith.mulf %371, %375 : vector<16x32xf32>
    %377 = vector.shape_cast %356 : vector<32xf32> to vector<1x32xf32>
    %378 = vector.broadcast %377 : vector<1x32xf32> to vector<16x32xf32>
    %379 = arith.mulf %376, %378 : vector<16x32xf32>
    %380 = vector.shape_cast %358 : vector<32xf32> to vector<1x32xf32>
    %381 = vector.broadcast %380 : vector<1x32xf32> to vector<16x32xf32>
    %382 = arith.addf %379, %381 : vector<16x32xf32>
    %383 = vector.extract_strided_slice %8 {offsets = [1, 0, 0], sizes = [1, 32, 64], strides = [1, 1, 1]} : vector<2x32x64xf32> to vector<1x32x64xf32>
    %384 = vector.shape_cast %383 : vector<1x32x64xf32> to vector<32x64xf32>
    %cst_97 = arith.constant dense<0.000000e+00> : vector<16x64xf32>
    %385 = tpu.matmul %382, %384, %cst_97 {dimension_numbers = #tpu.dot_dimension_numbers<[1], [0], [0], [1], [0, 0, 1, 1], [], []>} : vector<16x32xf32>, vector<32x64xf32>, vector<16x64xf32> -> vector<16x64xf32>
    %386 = vector.extract_strided_slice %9 {offsets = [1, 0], sizes = [1, 64], strides = [1, 1]} : vector<2x64xf32> to vector<1x64xf32>
    %387 = vector.shape_cast %386 : vector<1x64xf32> to vector<64xf32>
    %388 = vector.shape_cast %387 : vector<64xf32> to vector<1x64xf32>
    %389 = vector.broadcast %388 : vector<1x64xf32> to vector<16x64xf32>
    %390 = arith.addf %385, %389 : vector<16x64xf32>
    %cst_98 = arith.constant 0.000000e+00 : f32
    %391 = vector.broadcast %cst_98 : f32 to vector<16x64xf32>
    %392 = arith.maximumf %390, %391 : vector<16x64xf32>
    %393 = vector.extract_strided_slice %10 {offsets = [1, 0, 0], sizes = [1, 64, 32], strides = [1, 1, 1]} : vector<2x64x32xf32> to vector<1x64x32xf32>
    %394 = vector.shape_cast %393 : vector<1x64x32xf32> to vector<64x32xf32>
    %cst_99 = arith.constant dense<0.000000e+00> : vector<16x32xf32>
    %395 = tpu.matmul %392, %394, %cst_99 {dimension_numbers = #tpu.dot_dimension_numbers<[1], [0], [0], [1], [0, 0, 1, 1], [], []>} : vector<16x64xf32>, vector<64x32xf32>, vector<16x32xf32> -> vector<16x32xf32>
    %396 = arith.addf %354, %395 : vector<16x32xf32>
    %397 = vector.extract_strided_slice %11 {offsets = [1, 0], sizes = [1, 32], strides = [1, 1]} : vector<2x32xf32> to vector<1x32xf32>
    %398 = vector.shape_cast %397 : vector<1x32xf32> to vector<32xf32>
    %399 = vector.shape_cast %398 : vector<32xf32> to vector<1x32xf32>
    %400 = vector.broadcast %399 : vector<1x32xf32> to vector<16x32xf32>
    %401 = arith.addf %396, %400 : vector<16x32xf32>
    %c0_100 = arith.constant 0 : index
    %c0_101 = arith.constant 0 : index
    %402 = vector.load %arg13[%c0_100, %c0_101] : memref<1x32xf32, #tpu.memory_space<vmem>>, vector<1x32xf32>
    %403 = vector.shape_cast %402 : vector<1x32xf32> to vector<32xf32>
    %c0_102 = arith.constant 0 : index
    %c0_103 = arith.constant 0 : index
    %404 = vector.load %arg14[%c0_102, %c0_103] : memref<1x32xf32, #tpu.memory_space<vmem>>, vector<1x32xf32>
    %405 = vector.shape_cast %404 : vector<1x32xf32> to vector<32xf32>
    %cst_104 = arith.constant dense<0.000000e+00> : vector<16xf32>
    %406 = vector.multi_reduction <add>, %401, %cst_104 [1] : vector<16x32xf32> to vector<16xf32>
    %407 = vector.shape_cast %406 : vector<16xf32> to vector<16x1xf32>
    %cst_105 = arith.constant 3.200000e+01 : f32
    %408 = vector.broadcast %cst_105 : f32 to vector<16x1xf32>
    %409 = arith.divf %407, %408 : vector<16x1xf32>
    %410 = vector.broadcast %409 : vector<16x1xf32> to vector<16x32xf32>
    %411 = arith.subf %401, %410 : vector<16x32xf32>
    %412 = arith.mulf %411, %411 : vector<16x32xf32>
    %cst_106 = arith.constant dense<0.000000e+00> : vector<16xf32>
    %413 = vector.multi_reduction <add>, %412, %cst_106 [1] : vector<16x32xf32> to vector<16xf32>
    %414 = vector.shape_cast %413 : vector<16xf32> to vector<16x1xf32>
    %cst_107 = arith.constant 3.200000e+01 : f32
    %415 = vector.broadcast %cst_107 : f32 to vector<16x1xf32>
    %416 = arith.divf %414, %415 : vector<16x1xf32>
    %417 = vector.broadcast %409 : vector<16x1xf32> to vector<16x32xf32>
    %418 = arith.subf %401, %417 : vector<16x32xf32>
    %cst_108 = arith.constant 9.99999974E-6 : f32
    %419 = vector.broadcast %cst_108 : f32 to vector<16x1xf32>
    %420 = arith.addf %416, %419 : vector<16x1xf32>
    %421 = math.rsqrt %420 : vector<16x1xf32>
    %422 = vector.broadcast %421 : vector<16x1xf32> to vector<16x32xf32>
    %423 = arith.mulf %418, %422 : vector<16x32xf32>
    %424 = vector.shape_cast %403 : vector<32xf32> to vector<1x32xf32>
    %425 = vector.broadcast %424 : vector<1x32xf32> to vector<16x32xf32>
    %426 = arith.mulf %423, %425 : vector<16x32xf32>
    %427 = vector.shape_cast %405 : vector<32xf32> to vector<1x32xf32>
    %428 = vector.broadcast %427 : vector<1x32xf32> to vector<16x32xf32>
    %429 = arith.addf %426, %428 : vector<16x32xf32>
    %c0_109 = arith.constant 0 : index
    %c0_110 = arith.constant 0 : index
    %430 = vector.load %arg15[%c0_109, %c0_110] : memref<16x32xf32, #tpu.memory_space<vmem>>, vector<16x32xf32>
    tpu.vector_store %arg15[%c0_109, %c0_110], %429 {strides = array<i32>} : memref<16x32xf32, #tpu.memory_space<vmem>>, vector<16x32xf32>,
    return
  }
  func.func @transform_0(%arg0: i32) -> (i32, i32) {
    %c0_i32 = arith.constant 0 : i32
    %c0_i32_0 = arith.constant 0 : i32
    %c0_i32_1 = arith.constant 0 : i32
    return %c0_i32, %c0_i32_0 : i32, i32
  }
  func.func @transform_1(%arg0: i32) -> (i32, i32) {
    %c0_i32 = arith.constant 0 : i32
    %c0_i32_0 = arith.constant 0 : i32
    %c0_i32_1 = arith.constant 0 : i32
    return %c0_i32, %c0_i32_0 : i32, i32
  }
  func.func @transform_2(%arg0: i32) -> (i32, i32) {
    %c0_i32 = arith.constant 0 : i32
    %c0_i32_0 = arith.constant 0 : i32
    %c0_i32_1 = arith.constant 0 : i32
    return %c0_i32, %c0_i32_0 : i32, i32
  }
  func.func @transform_3(%arg0: i32) -> (i32, i32) {
    %c0_i32 = arith.constant 0 : i32
    %c0_i32_0 = arith.constant 0 : i32
    %c0_i32_1 = arith.constant 0 : i32
    return %c0_i32, %c0_i32_0 : i32, i32
  }
  func.func @transform_4(%arg0: i32) -> (i32, i32) {
    %c0_i32 = arith.constant 0 : i32
    %c0_i32_0 = arith.constant 0 : i32
    %c0_i32_1 = arith.constant 0 : i32
    return %c0_i32, %c0_i32_0 : i32, i32
  }
  func.func @transform_5(%arg0: i32) -> (i32, i32) {
    %c0_i32 = arith.constant 0 : i32
    %c0_i32_0 = arith.constant 0 : i32
    %c0_i32_1 = arith.constant 0 : i32
    return %c0_i32, %c0_i32_0 : i32, i32
  }
  func.func @transform_6(%arg0: i32) -> (i32, i32) {
    %c0_i32 = arith.constant 0 : i32
    %c0_i32_0 = arith.constant 0 : i32
    %c0_i32_1 = arith.constant 0 : i32
    return %c0_i32, %c0_i32_0 : i32, i32
  }
  func.func @transform_7(%arg0: i32) -> (i32, i32) {
    %c0_i32 = arith.constant 0 : i32
    %c0_i32_0 = arith.constant 0 : i32
    %c0_i32_1 = arith.constant 0 : i32
    return %c0_i32, %c0_i32_0 : i32, i32
  }
  func.func @transform_8(%arg0: i32) -> (i32, i32, i32) {
    %c0_i32 = arith.constant 0 : i32
    %c0_i32_0 = arith.constant 0 : i32
    %c0_i32_1 = arith.constant 0 : i32
    %c0_i32_2 = arith.constant 0 : i32
    return %c0_i32, %c0_i32_0, %c0_i32_1 : i32, i32, i32
  }
  func.func @transform_9(%arg0: i32) -> (i32, i32) {
    %c0_i32 = arith.constant 0 : i32
    %c0_i32_0 = arith.constant 0 : i32
    %c0_i32_1 = arith.constant 0 : i32
    return %c0_i32, %c0_i32_0 : i32, i32
  }
  func.func @transform_10(%arg0: i32) -> (i32, i32, i32) {
    %c0_i32 = arith.constant 0 : i32
    %c0_i32_0 = arith.constant 0 : i32
    %c0_i32_1 = arith.constant 0 : i32
    %c0_i32_2 = arith.constant 0 : i32
    return %c0_i32, %c0_i32_0, %c0_i32_1 : i32, i32, i32
  }
  func.func @transform_11(%arg0: i32) -> (i32, i32) {
    %c0_i32 = arith.constant 0 : i32
    %c0_i32_0 = arith.constant 0 : i32
    %c0_i32_1 = arith.constant 0 : i32
    return %c0_i32, %c0_i32_0 : i32, i32
  }
  func.func @transform_12(%arg0: i32) -> (i32, i32) {
    %c0_i32 = arith.constant 0 : i32
    %c0_i32_0 = arith.constant 0 : i32
    %c0_i32_1 = arith.constant 0 : i32
    return %c0_i32, %c0_i32_0 : i32, i32
  }
  func.func @transform_13(%arg0: i32) -> (i32, i32) {
    %c0_i32 = arith.constant 0 : i32
    %c0_i32_0 = arith.constant 0 : i32
    %c0_i32_1 = arith.constant 0 : i32
    return %c0_i32, %c0_i32_0 : i32, i32
  }
  func.func @transform_14(%arg0: i32) -> (i32, i32) {
    %c0_i32 = arith.constant 0 : i32
    %c0_i32_0 = arith.constant 0 : i32
    %c0_i32_1 = arith.constant 0 : i32
    return %c0_i32, %c0_i32_0 : i32, i32
  }
}

</mosaic_0001>

<bundles_post_ra>
// kernel: tpu_custom_call.1
= control target key start
LH: loop header
LB: loop body
LE: loop exit
PB: predicated region body
PF: predicated region fallthrough
CT: control target
= control target key end

     0   :  { %vm84_vm0 = vcmask 261120   ;;  %s7312_s0 = inlined_call_operand.vmem [shape: f32[16,32], index: 0, kind: input, shape index: {}]   ;;  %s7313_s1 = inlined_call_operand.vmem [shape: f32[16,32], index: 1, kind: input, shape index: {}]   ;;  %s7314_s2 = inlined_call_operand.vmem [shape: f32[2,32], index: 2, kind: input, shape index: {}]   ;;  %s7315_s3 = inlined_call_operand.vmem [shape: f32[2,32], index: 3, kind: input, shape index: {}]   ;;  %s7316_s4 = inlined_call_operand.vmem [shape: f32[2,32], index: 4, kind: input, shape index: {}]   ;;  %s7317_s5 = inlined_call_operand.vmem [shape: f32[2,32], index: 5, kind: input, shape index: {}]   ;;  %s7318_s6 = inlined_call_operand.vmem [shape: f32[2,32], index: 6, kind: input, shape index: {}]   ;;  %s7319_s7 = inlined_call_operand.vmem [shape: f32[2,32], index: 7, kind: input, shape index: {}]   ;;  %s7320_s8 = inlined_call_operand.vmem [shape: f32[2,32,64], index: 8, kind: input, shape index: {}]   ;;  %s7321_s9 = inlined_call_operand.vmem [shape: f32[2,64], index: 9, kind: input, shape index: {}]   ;;  %s7322_s10 = inlined_call_operand.vmem [shape: f32[2,64,32], index: 10, kind: input, shape index: {}]   ;;  %s7323_s11 = inlined_call_operand.vmem [shape: f32[2,32], index: 11, kind: input, shape index: {}]   ;;  %s7324_s12 = inlined_call_operand.vmem [shape: f32[1,32], index: 12, kind: input, shape index: {}]   ;;  %s7325_s13 = inlined_call_operand.vmem [shape: f32[1,32], index: 13, kind: input, shape index: {}]   ;;  %s7326_s14 = inlined_call_operand.hbm [shape: f32[16,32], index: 14, kind: output, shape index: {}]  }
   0x1   :  { %v48_v0 = vld [vmem:[%s7312_s0] sm:$0xff] }
   0x2   :  { %v85_v1 = vsel %vm84_vm0, %v48_v0, 0.0 }
   0x3   :  { %19 = vsyncpa [#allocation3], 0  ;;  %86 = vadd.xlane.f32.xlu0 %v85_v1  ;;  %v5508_v2 = vmov 32.0   ;;  %v5606_v21 = vld [vmem:[%s7314_s2] sm:$0x3]  ;;  %s5509_s19 = smov 104  }
   0x4   :  { %5314 = vrcp.f32 %v5508_v2  ;;  %v5611_v23 = vld [vmem:[%s7315_s3] sm:$0x3]  ;;  %v136_v25 = vperm.slane %v5606_v21, 0  ;;  %s5510_s20 = smov 120   ;;  %s5511_s21 = smov 112   ;;  %v5628_v32 = vld [vmem:[%s7312_s0 + $0x8] sm:$0xff] }
   0x5   :  { %v139_v27 = vperm.slane %v5611_v23, 0  ;;  %v88_v33 = vsel %vm84_vm0, %v5628_v32, 0.0  ;;  %v5512_v35 = vmov 1983009808   ;;  %vm154_vm5 = vcmask 1047556   ;;  %s5514_s24 = smov 24  }
   0x6   :  { %v159_v36 = vunpack.c.l.s4 %v5512_v35  ;;  %v5513_v44 = vmov 1934713408   ;;  %vm384_vm6 = vcmask 64512   ;;  %s5515_s25 = smov 16   ;;  %s5516_s26 = smov 8   ;;  %vm748_vm10 = vcmask 130048  }
   0x7   :  { %v183_v45 = vunpack.c.l.s4 %v5513_v44  ;;  %vm750_vm11 = vcmask 195584   ;;  %s5185_s16 = sshll.u32 %s7326_s14, 4  ;;  %s5518_s17 = smov 128   ;;  %s5186_s16 = int_to_ptr.hbm [resolvable:$true] %s5185_s16 }
   0x8   :  { %v5633_v41 = vunpack.c.0.s8 %v159_v36 }
   0x9   :  { %v5638_v52 = vunpack.c.0.s8 %v183_v45 }
   0xa   :  { %v5315_v3 = vpop.eup %5314 }
   0xb   :  { %v92_v4 = vmul.f32 32.0, %v5315_v3  ;;  %vm96_vm1 = vweird.f32 %v5315_v3 }
   0xd   :  { %v93_v5 = vsub.f32 1.0, %v92_v4 }
   0xf   :  { %v94_v6 = vmul.f32 %v5315_v3, %v93_v5 }
  0x11   :  { %v95_v7 = vadd.f32 %v5315_v3, %v94_v6 }
  0x13   :  { %v5598_v8 = vsel %vm96_vm1, %v5315_v3, %v95_v7 }
  0x76   :  { %v87_v9 = vpop.xlane.xlu0 %86 }
  0x77   :  { %v98_v10 = vmul.f32 %v5598_v8, %v87_v9 }
  0x79   :  { %v100_v11 = vsub.f32 %v48_v0, %v98_v10 }
  0x7b   :  { %v102_v12 = vmul.f32 %v100_v11, %v100_v11 }
  0x7d   :  { %v104_v13 = vsel %vm84_vm0, %v102_v12, 0.0 }
  0x7e   :  { %105 = vadd.xlane.f32.xlu0 %v104_v13 }
  0xf1   :  { %v106_v14 = vpop.xlane.xlu0 %105 }
  0xf2   :  { %v110_v15 = vmul.f32 %v106_v14, %v5598_v8 }
  0xf4   :  { %v112_v16 = vadd.f32 1e-05, %v110_v15 }
  0xf6   :  { %5316 = vrsqrt.f32 %v112_v16  ;;  %vm120_vm3 = vweird.f32 %v112_v16 }
  0xfc   :  { %v5317_v17 = vpop.eup %5316 }
  0xfd   :  { %v115_v18 = vmul.f32 %v5317_v17, %v112_v16  ;;  %vm121_vm2 = vweird.f32 %v5317_v17 }
  0xfe   :  { %vm122_vm4 = vmor %vm120_vm3, %vm121_vm2 }
  0xff   :  { %v116_v19 = vmul.f32 %v5317_v17, %v115_v18 }
 0x101   :  { %v117_v20 = vmul.f32 0.5, %v116_v19 }
 0x103   :  { %v118_v22 = vsub.f32 1.5, %v117_v20 }
 0x105   :  { %v119_v24 = vmul.f32 %v5317_v17, %v118_v22 }
 0x107   :  { %v123_v26 = vsel %vm122_vm4, %v5317_v17, %v119_v24 }
 0x108   :  { %v134_v28 = vmul.f32 %v123_v26, %v100_v11 }
 0x10a   :  { %v137_v29 = vmul.f32 %v136_v25, %v134_v28 }
 0x10c   :  { %v140_v30 = vadd.f32 %v139_v27, %v137_v29 }
 0x10e   :  { %271 = vrot.lane.b32.xlu2 %v140_v30, %s5509_s19  ;;  %265 = vrot.lane.b32.xlu1 %v140_v30, %s5510_s20  ;;  %v142_v31 = vmul.f32 0.35355338, %v140_v30  ;;  %v276_v48 = vrot.slane %v140_v30, 4 }
 0x110   :  { %147 = vrot.lane.b32.xlu0 %v142_v31, %s5511_s21  ;;  %v156_v50 = vrot.slane %v142_v31, 4 }
 0x116   :  { %268 = vrot.lane.b32.xlu1 %v140_v30, %s5511_s21  ;;  %144 = vrot.lane.b32.xlu2 %v142_v31, %s5510_s20 }
 0x11e   :  { %150 = vrot.lane.b32.xlu1 %v142_v31, %s5509_s19 }
 0x13f   :  { %89 = vadd.xlane.f32.xlu2 %v88_v33 }
 0x168   :  { %v272_v34 = vpop.permute.xlu2 %271 }
 0x169   :  { %v286_v39 = vrot.slane %v272_v34, 4 }
 0x170   :  { %v145_v0 = vpop.permute.xlu2 %144 }
 0x171   :  { %v168_v11 = vrot.slane %v145_v0, 4 }
 0x180   :  { %v266_v37 = vpop.permute.xlu1 %265 }
 0x181   :  { %v288_v38 = vrot.slane %v266_v37, 4  ;;  %v287_v43 = vsel %vm154_vm5, %v286_v39, %v266_v37 }
 0x182   :  { %v148_v42 = vpop.permute.xlu0 %147  ;;  %v293_v49 = vperm.slane %v287_v43, %v5633_v41 }
 0x183   :  { %v289_v40 = vsel %vm154_vm5, %v272_v34, %v288_v38  ;;  %v153_v47 = vrot.slane %v148_v42, 4  ;;  %v157_v56 = vsel %vm154_vm5, %v148_v42, %v156_v50 }
 0x184   :  { %v297_v46 = vperm.slane %v289_v40, %v5633_v41  ;;  %v298_v60 = vrot.slane %v293_v49, 4  ;;  %v165_v1 = vperm.slane %v157_v56, %v5633_v41 }
 0x185   :  { %v155_v58 = vsel %vm154_vm5, %v153_v47, %v142_v31 }
 0x186   :  { %v310_v55 = vrot.slane %v297_v46, 4  ;;  %v161_v3 = vperm.slane %v155_v58, %v5633_v41  ;;  %v192_v14 = vrot.slane %v165_v1, 4 }
 0x188   :  { %v269_v51 = vpop.permute.xlu1 %268  ;;  %v180_v18 = vrot.slane %v161_v3, 4 }
 0x189   :  { %v274_v53 = vrot.slane %v269_v51, 4  ;;  %v277_v54 = vsel %vm154_vm5, %v269_v51, %v276_v48 }
 0x18a   :  { %v285_v57 = vperm.slane %v277_v54, %v5633_v41 }
 0x18b   :  { %v275_v59 = vsel %vm154_vm5, %v274_v53, %v140_v30 }
 0x18c   :  { %v281_v61 = vperm.slane %v275_v59, %v5633_v41  ;;  %v311_v62 = vsel %vm154_vm5, %v310_v55, %v285_v57  ;;  %v312_v63 = vrot.slane %v285_v57, 4 }
 0x18d   :  { %v317_v2 = vperm.slane %v311_v62, %v5638_v52 }
 0x18e   :  { %v299_v4 = vsel %vm154_vm5, %v298_v60, %v281_v61  ;;  %v300_v5 = vrot.slane %v281_v61, 4  ;;  %v313_v6 = vsel %vm154_vm5, %v297_v46, %v312_v63 }
 0x18f   :  { %v305_v7 = vperm.slane %v299_v4, %v5638_v52  ;;  %v321_v9 = vperm.slane %v313_v6, %v5638_v52  ;;  %v326_v10 = vrot.slane %v317_v2, 4 }
 0x190   :  { %v301_v12 = vsel %vm154_vm5, %v293_v49, %v300_v5  ;;  %v151_v13 = vpop.permute.xlu1 %150 }
 0x191   :  { %v309_v15 = vperm.slane %v301_v12, %v5638_v52  ;;  %v322_v16 = vrot.slane %v305_v7, 4  ;;  %v328_v17 = vrot.slane %v321_v9, 4  ;;  %v327_v19 = vsel %vm154_vm5, 0.0, %v326_v10 }
 0x192   :  { %v166_v20 = vrot.slane %v151_v13, 4  ;;  %v169_v22 = vsel %vm154_vm5, %v151_v13, %v168_v11 }
 0x193   :  { %v324_v24 = vrot.slane %v309_v15, 4  ;;  %v329_v26 = vsel %vm154_vm5, 0.0, %v328_v17  ;;  %v341_v28 = vsel %vm154_vm5, %v328_v17, %v317_v2  ;;  %v177_v29 = vperm.slane %v169_v22, %v5633_v41 }
 0x194   :  { %v345_v30 = vperm.slane %v341_v28, %v5633_v41  ;;  %v346_v31 = vrot.slane %v329_v26, 4  ;;  %v167_v33 = vsel %vm154_vm5, %v166_v20, %v145_v0  ;;  %v323_v34 = vsel %vm154_vm5, 0.0, %v322_v16 }
 0x195   :  { %v173_v35 = vperm.slane %v167_v33, %v5633_v41  ;;  %v190_v36 = vrot.slane %v177_v29, 4  ;;  %v193_v37 = vsel %vm154_vm5, %v177_v29, %v192_v14  ;;  %v325_v38 = vsel %vm154_vm5, 0.0, %v324_v24 }
 0x196   :  { %v201_v39 = vperm.slane %v193_v37, %v5638_v52  ;;  %v330_v40 = vsel %vm154_vm5, %v324_v24, %v305_v7  ;;  %v335_v42 = vrot.slane %v325_v38, 4  ;;  %v347_v43 = vsel %vm154_vm5, %v346_v31, %v327_v19 }
 0x197   :  { %v178_v44 = vrot.slane %v173_v35, 4  ;;  %v181_v45 = vsel %vm154_vm5, %v173_v35, %v180_v18  ;;  %v191_v46 = vsel %vm154_vm5, %v190_v36, %v165_v1  ;;  %v334_v47 = vperm.slane %v330_v40, %v5633_v41 }
 0x198   :  { %v189_v48 = vperm.slane %v181_v45, %v5638_v52  ;;  %v197_v49 = vperm.slane %v191_v46, %v5638_v52  ;;  %v208_v50 = vrot.slane %v201_v39, 4  ;;  %v336_v51 = vsel %vm154_vm5, %v335_v42, %v323_v34 }
 0x199   :  { %v179_v53 = vsel %vm154_vm5, %v178_v44, %v161_v3  ;;  %v340_v54 = vperm.slane %v336_v51, %v5633_v41  ;;  %v351_v55 = vperm.slane %v347_v43, %v5633_v41  ;;  %v354_v56 = vrot.slane %v334_v47, 4 }
 0x19a   :  { %v185_v57 = vperm.slane %v179_v53, %v5638_v52  ;;  %v204_v58 = vrot.slane %v189_v48, 4  ;;  %v206_v59 = vrot.slane %v197_v49, 4  ;;  %v209_v60 = vsel %vm154_vm5, 0.0, %v208_v50 }
 0x19b   :  { %v221_v61 = vsel %vm154_vm5, %v208_v50, %v197_v49  ;;  %v226_v62 = vrot.slane %v209_v60, 4  ;;  %v355_v63 = vsel %vm154_vm5, %v340_v54, %v354_v56  ;;  %v366_v0 = vrot.slane %v345_v30, 4 }
 0x19c   :  { %v202_v1 = vrot.slane %v185_v57, 4  ;;  %v205_v2 = vsel %vm154_vm5, 0.0, %v204_v58  ;;  %v207_v3 = vsel %vm154_vm5, 0.0, %v206_v59  ;;  %v225_v4 = vperm.slane %v221_v61, %v5633_v41 }
 0x19d   :  { %v215_v5 = vrot.slane %v205_v2, 4  ;;  %v363_v6 = vperm.slane %v355_v63, %v5638_v52  ;;  %v367_v7 = vsel %vm154_vm5, %v351_v55, %v366_v0  ;;  %v352_v9 = vrot.slane %v340_v54, 4 }
 0x19e   :  { %v375_v10 = vperm.slane %v367_v7, %v5638_v52  ;;  %v364_v11 = vrot.slane %v351_v55, 4  ;;  %v203_v12 = vsel %vm154_vm5, 0.0, %v202_v1  ;;  %v210_v13 = vsel %vm154_vm5, %v204_v58, %v185_v57 }
 0x19f   :  { %v353_v14 = vsel %vm154_vm5, %v352_v9, %v334_v47  ;;  %v382_v15 = vrot.slane %v363_v6, 4  ;;  %v214_v16 = vperm.slane %v210_v13, %v5633_v41  ;;  %v216_v17 = vsel %vm154_vm5, %v215_v5, %v203_v12 }
 0x1a0   :  { %v380_v18 = vrot.slane %v375_v10, 4  ;;  %v359_v19 = vperm.slane %v353_v14, %v5638_v52  ;;  %v365_v20 = vsel %vm154_vm5, %v364_v11, %v345_v30  ;;  %v220_v22 = vperm.slane %v216_v17, %v5633_v41 }
 0x1a1   :  { %v371_v24 = vperm.slane %v365_v20, %v5638_v52  ;;  %v383_v26 = vsel %vm154_vm5, %v375_v10, %v382_v15  ;;  %v227_v28 = vsel %vm154_vm5, %v226_v62, %v207_v3  ;;  %v234_v29 = vrot.slane %v214_v16, 4 }
 0x1a2   :  { %v381_v31 = vsel %vm154_vm5, %v380_v18, %v363_v6  ;;  %v378_v33 = vrot.slane %v359_v19, 4  ;;  %v231_v34 = vperm.slane %v227_v28, %v5633_v41  ;;  %v246_v35 = vrot.slane %v225_v4, 4 }
 0x1a3   :  { %5201 = vmatpush.xpose.msk.msra.mxu3 %vm384_vm6, %v381_v31  ;;  %597 = vmatpush.msra.mxu2 %v381_v31  ;;  %v376_v36 = vrot.slane %v371_v24, 4  ;;  %v235_v30 = vsel %vm154_vm5, %v220_v22, %v234_v29  ;;  %v232_v37 = vrot.slane %v220_v22, 4 }
 0x1a4   :  { %v379_v38 = vsel %vm154_vm5, %v371_v24, %v378_v33  ;;  %v247_v39 = vsel %vm154_vm5, %v231_v34, %v246_v35  ;;  %v244_v40 = vrot.slane %v231_v34, 4  ;;  %v243_v43 = vperm.slane %v235_v30, %v5638_v52 }
 0x1a5   :  { %v377_v42 = vsel %vm154_vm5, %v376_v36, %v359_v19  ;;  %5199 = vmatpush.xpose.msk.msra.mxu1 %vm384_vm6, %v379_v38  ;;  %v255_v44 = vperm.slane %v247_v39, %v5638_v52  ;;  %v233_v45 = vsel %vm154_vm5, %v232_v37, %v214_v16 }
 0x1a6   :  { %5197 = vmatpush.xpose.msk.msra.mxu0 %vm384_vm6, %v377_v42  ;;  %v239_v46 = vperm.slane %v233_v45, %v5638_v52  ;;  %v245_v47 = vsel %vm154_vm5, %v244_v40, %v225_v4  ;;  %v262_v56 = vrot.slane %v243_v43, 4 }
 0x1a7   :  { %5203 = vmatpush.xpose.msk.msrb.mxu3 %vm384_vm6, %v383_v26  ;;  %v260_v48 = vrot.slane %v255_v44, 4  ;;  %v251_v49 = vperm.slane %v245_v47, %v5638_v52 }
 0x1a8   :  { %v258_v50 = vrot.slane %v239_v46, 4  ;;  %v263_v57 = vsel %vm154_vm5, %v255_v44, %v262_v56 }
 0x1a9   :  { %574 = vmatpush.msrb.mxu1 %v379_v38  ;;  %v261_v51 = vsel %vm154_vm5, %v260_v48, %v243_v43  ;;  %v256_v53 = vrot.slane %v251_v49, 4 }
 0x1aa   :  { %551 = vmatpush.msrb.mxu0 %v377_v42  ;;  %5202 = vmatmul.msk.f32.vlgmr.msra.gmra.mxu3 %vm384_vm6, %v261_v51  ;;  %v259_v54 = vsel %vm154_vm5, %v251_v49, %v258_v50 }
 0x1ab   :  { %620 = vmatpush.msra.mxu3 %v383_v26  ;;  %v257_v55 = vsel %vm154_vm5, %v256_v53, %v239_v46  ;;  %5200 = vmatmul.msk.f32.vlgmr.msra.gmra.mxu1 %vm384_vm6, %v259_v54 }
 0x1ac   :  { %5198 = vmatmul.msk.f32.vlgmr.msra.gmra.mxu0 %vm384_vm6, %v257_v55 }
 0x1b2   :  { %5204 = vmatmul.msk.f32.vlgmr.msrb.gmra.mxu3 %vm384_vm6, %v263_v57  ;;  %v90_v58 = vpop.xlane.xlu2 %89 }
 0x1b3   :  { %v99_v59 = vmul.f32 %v5598_v8, %v90_v58 }
 0x1b5   :  { %v101_v60 = vsub.f32 %v5628_v32, %v99_v59 }
 0x1b7   :  { %v103_v61 = vmul.f32 %v101_v60, %v101_v60 }
 0x1b9   :  { %v107_v62 = vsel %vm84_vm0, %v103_v61, 0.0 }
 0x1ba   :  { %108 = vadd.xlane.f32.xlu1 %v107_v62 }
 0x228   :  { %v5739_v14 = vpop.f32.mrf.mxu1 }
 0x229   :  { %v5737_v13 = vpop.f32.mrf.mxu0  ;;  %v492_v21 = vsel %vm384_vm6, %v5739_v14, -inf }
 0x22a   :  { %v489_v15 = vsel %vm384_vm6, %v5737_v13, -inf }
 0x22d   :  { %v109_v63 = vpop.xlane.xlu1 %108  ;;  %v5735_v12 = vpop.f32.mrf.mxu3 }
 0x22e   :  { %v111_v0 = vmul.f32 %v109_v63, %v5598_v8  ;;  %v495_v23 = vsel %vm384_vm6, %v5735_v12, -inf }
 0x230   :  { %v113_v1 = vadd.f32 1e-05, %v111_v0 }
 0x232   :  { %5318 = vrsqrt.f32 %v113_v1  ;;  %vm130_vm8 = vweird.f32 %v113_v1 }
 0x238   :  { %v5319_v2 = vpop.eup %5318 }
 0x239   :  { %v125_v3 = vmul.f32 %v5319_v2, %v113_v1  ;;  %vm131_vm7 = vweird.f32 %v5319_v2 }
 0x23a   :  { %vm132_vm9 = vmor %vm130_vm8, %vm131_vm7  ;;  %vm2706_vm8 = vcmask 523264  }
 0x23b   :  { %v126_v4 = vmul.f32 %v5319_v2, %v125_v3 }
 0x23d   :  { %v127_v5 = vmul.f32 0.5, %v126_v4 }
 0x23f   :  { %v128_v6 = vsub.f32 1.5, %v127_v5 }
 0x241   :  { %v129_v7 = vmul.f32 %v5319_v2, %v128_v6 }
 0x243   :  { %v133_v9 = vsel %vm132_vm9, %v5319_v2, %v129_v7 }
 0x244   :  { %v135_v32 = vmul.f32 %v133_v9, %v101_v60 }
 0x246   :  { %v138_v10 = vmul.f32 %v136_v25, %v135_v32  ;;  %v5747_v25 = vpop.f32.mrf.mxu3 }
 0x248   :  { %v141_v11 = vadd.f32 %v139_v27, %v138_v10  ;;  %v498_v27 = vsel %vm384_vm6, %v5747_v25, -inf }
 0x24a   :  { %880 = vrot.lane.b32.xlu1 %v141_v11, %s5509_s19  ;;  %877 = vrot.lane.b32.xlu2 %v141_v11, %s5511_s21  ;;  %v5751_v16 = vmul.f32 0.35355338, %v141_v11  ;;  %v885_v19 = vrot.slane %v141_v11, 4 }
 0x24b   :  { %874 = vrot.lane.b32.xlu0 %v141_v11, %s5510_s20 }
 0x273   :  { %490 = vmax.xlane.f32.xlu2 %v489_v15 }
 0x274   :  { %493 = vmax.xlane.f32.xlu1 %v492_v21 }
 0x275   :  { %496 = vmax.xlane.f32.xlu0 %v495_v23 }
 0x27b   :  { %499 = vmax.xlane.f32.xlu2 %v498_v27 }
 0x289   :  { %754 = vrot.lane.b32.xlu0 %v5751_v16, %s5510_s20 }
 0x2a4   :  { %v878_v17 = vpop.permute.xlu2 %877 }
 0x2a5   :  { %v883_v18 = vrot.slane %v878_v17, 4  ;;  %v886_v22 = vsel %vm154_vm5, %v878_v17, %v885_v19 }
 0x2a6   :  { %v894_v28 = vperm.slane %v886_v22, %v5633_v41 }
 0x2a7   :  { %v884_v20 = vsel %vm154_vm5, %v883_v18, %v141_v11 }
 0x2a8   :  { %v890_v24 = vperm.slane %v884_v20, %v5633_v41  ;;  %v921_v37 = vrot.slane %v894_v28, 4 }
 0x2aa   :  { %v909_v35 = vrot.slane %v890_v24, 4 }
 0x2bc   :  { %v881_v26 = vpop.permute.xlu1 %880 }
 0x2bd   :  { %v895_v29 = vrot.slane %v881_v26, 4  ;;  %v875_v31 = vpop.permute.xlu0 %874 }
 0x2be   :  { %v897_v33 = vrot.slane %v875_v31, 4 }
 0x2bf   :  { %v896_v34 = vsel %vm154_vm5, %v895_v29, %v875_v31 }
 0x2c0   :  { %v898_v36 = vsel %vm154_vm5, %v881_v26, %v897_v33  ;;  %v902_v30 = vperm.slane %v896_v34, %v5633_v41 }
 0x2c1   :  { %v906_v38 = vperm.slane %v898_v36, %v5633_v41 }
 0x2c2   :  { %v907_v39 = vrot.slane %v902_v30, 4  ;;  %v910_v40 = vsel %vm154_vm5, %v902_v30, %v909_v35 }
 0x2c3   :  { %v918_v42 = vperm.slane %v910_v40, %v5638_v52  ;;  %v919_v43 = vrot.slane %v906_v38, 4  ;;  %v922_v44 = vsel %vm154_vm5, %v906_v38, %v921_v37 }
 0x2c4   :  { %v908_v45 = vsel %vm154_vm5, %v907_v39, %v890_v24  ;;  %v930_v46 = vperm.slane %v922_v44, %v5638_v52 }
 0x2c5   :  { %v914_v47 = vperm.slane %v908_v45, %v5638_v52  ;;  %v920_v48 = vsel %vm154_vm5, %v919_v43, %v894_v28  ;;  %v933_v49 = vrot.slane %v918_v42, 4 }
 0x2c6   :  { %v926_v50 = vperm.slane %v920_v48, %v5638_v52  ;;  %v937_v51 = vrot.slane %v930_v46, 4 }
 0x2c7   :  { %v931_v53 = vrot.slane %v914_v47, 4  ;;  %v934_v54 = vsel %vm154_vm5, 0.0, %v933_v49  ;;  %v939_v55 = vsel %vm154_vm5, %v933_v49, %v914_v47 }
 0x2c8   :  { %v935_v56 = vrot.slane %v926_v50, 4  ;;  %v938_v57 = vsel %vm154_vm5, 0.0, %v937_v51  ;;  %v944_v58 = vrot.slane %v934_v54, 4  ;;  %v943_v59 = vperm.slane %v939_v55, %v5633_v41 }
 0x2c9   :  { %v955_v60 = vrot.slane %v938_v57, 4  ;;  %v932_v61 = vsel %vm154_vm5, 0.0, %v931_v53  ;;  %v950_v62 = vsel %vm154_vm5, %v937_v51, %v926_v50 }
 0x2ca   :  { %v936_v63 = vsel %vm154_vm5, 0.0, %v935_v56  ;;  %v945_v0 = vsel %vm154_vm5, %v944_v58, %v932_v61  ;;  %v954_v1 = vperm.slane %v950_v62, %v5633_v41  ;;  %v963_v2 = vrot.slane %v943_v59, 4 }
 0x2cb   :  { %v949_v3 = vperm.slane %v945_v0, %v5633_v41  ;;  %v956_v4 = vsel %vm154_vm5, %v955_v60, %v936_v63  ;;  %v765_v60 = vrot.slane %v5751_v16, 4 }
 0x2cc   :  { %v960_v5 = vperm.slane %v956_v4, %v5633_v41  ;;  %v975_v6 = vrot.slane %v954_v1, 4 }
 0x2cd   :  { %v961_v7 = vrot.slane %v949_v3, 4  ;;  %v964_v9 = vsel %vm154_vm5, %v949_v3, %v963_v2 }
 0x2ce   :  { %v972_v32 = vperm.slane %v964_v9, %v5638_v52  ;;  %v973_v10 = vrot.slane %v960_v5, 4  ;;  %v976_v11 = vsel %vm154_vm5, %v960_v5, %v975_v6 }
 0x2cf   :  { %v984_v15 = vperm.slane %v976_v11, %v5638_v52  ;;  %v962_v21 = vsel %vm154_vm5, %v961_v7, %v943_v59 }
 0x2d0   :  { %v991_v23 = vrot.slane %v972_v32, 4  ;;  %v968_v27 = vperm.slane %v962_v21, %v5638_v52  ;;  %v974_v17 = vsel %vm154_vm5, %v973_v10, %v954_v1 }
 0x2d1   :  { %v989_v18 = vrot.slane %v984_v15, 4  ;;  %v980_v19 = vperm.slane %v974_v17, %v5638_v52 }
 0x2d2   :  { %v992_v20 = vsel %vm154_vm5, %v984_v15, %v991_v23  ;;  %v987_v22 = vrot.slane %v968_v27, 4 }
 0x2d3   :  { %v990_v24 = vsel %vm154_vm5, %v989_v18, %v972_v32  ;;  %5215 = vmatpush.xpose.msk.msrb.mxu3 %vm384_vm6, %v992_v20  ;;  %v985_v26 = vrot.slane %v980_v19, 4 }
 0x2d4   :  { %5213 = vmatpush.xpose.msk.msrb.mxu2 %vm384_vm6, %v990_v24  ;;  %v5796_v28 = vsel %vm154_vm5, %v980_v19, %v987_v22 }
 0x2d5   :  { %v986_v29 = vsel %vm154_vm5, %v985_v26, %v968_v27  ;;  %5211 = vmatpush.xpose.msk.msra.mxu1 %vm384_vm6, %v5796_v28 }
 0x2d6   :  { %5209 = vmatpush.xpose.msk.msra.mxu0 %vm384_vm6, %v986_v29 }
 0x2e6   :  { %v491_v31 = vpop.xlane.xlu2 %490 }
 0x2e7   :  { %v501_v33 = vsub.f32 %v5737_v13, %v491_v31 }
 0x2e8   :  { %v497_v34 = vpop.xlane.xlu0 %496 }
 0x2e9   :  { %v505_v35 = vmul.f32 1.442695, %v501_v33  ;;  %v503_v36 = vsub.f32 %v5735_v12, %v497_v34  ;;  %v494_v12 = vpop.xlane.xlu1 %493 }
 0x2eb   :  { %5320 = vpow2.f32 %v505_v35  ;;  %v509_v30 = vmul.f32 1.442695, %v503_v36 }
 0x2ed   :  { %5322 = vpow2.f32 %v509_v30 }
 0x2ee   :  { %v500_v37 = vpop.xlane.xlu2 %499 }
 0x2ef   :  { %v504_v38 = vsub.f32 %v5747_v25, %v500_v37  ;;  %v502_v25 = vsub.f32 %v5739_v14, %v494_v12 }
 0x2f1   :  { %v5321_v39 = vpop.eup %5320  ;;  %v511_v40 = vmul.f32 1.442695, %v504_v38  ;;  %v507_v46 = vmul.f32 1.442695, %v502_v25 }
 0x2f2   :  { %v513_v42 = vsel %vm384_vm6, %v5321_v39, 0.0 }
 0x2f3   :  { %v5323_v43 = vpop.eup %5322  ;;  %5324 = vpow2.f32 %v511_v40  ;;  %514 = vadd.xlane.f32.xlu0 %v513_v42 }
 0x2f4   :  { %v519_v44 = vsel %vm384_vm6, %v5323_v43, 0.0  ;;  %5326 = vpow2.f32 %v507_v46 }
 0x2f5   :  { %520 = vadd.xlane.f32.xlu2 %v519_v44 }
 0x2f9   :  { %v5325_v13 = vpop.eup %5324 }
 0x2fa   :  { %v522_v45 = vsel %vm384_vm6, %v5325_v13, 0.0  ;;  %v5813_v47 = vpop.eup %5326 }
 0x2fb   :  { %523 = vadd.xlane.f32.xlu1 %v522_v45  ;;  %v516_v48 = vsel %vm384_vm6, %v5813_v47, 0.0  ;;  %v755_v49 = vpop.permute.xlu0 %754 }
 0x2fc   :  { %v777_v1 = vrot.slane %v755_v49, 4 }
 0x30d   :  { %757 = vrot.lane.b32.xlu2 %v5751_v16, %s5511_s21 }
 0x314   :  { %760 = vrot.lane.b32.xlu1 %v5751_v16, %s5509_s19 }
 0x336   :  { %517 = vadd.xlane.f32.xlu2 %v516_v48 }
 0x366   :  { %v515_v50 = vpop.xlane.xlu0 %514 }
 0x367   :  { %5328 = vrcp.f32 %v515_v50 }
 0x368   :  { %v521_v51 = vpop.xlane.xlu2 %520 }
 0x369   :  { %5330 = vrcp.f32 %v521_v51 }
 0x36d   :  { %v5329_v53 = vpop.eup %5328 }
 0x36e   :  { %v524_v54 = vpop.xlane.xlu1 %523  ;;  %v529_v55 = vmul.f32 %v5329_v53, %v5321_v39 }
 0x36f   :  { %v5331_v56 = vpop.eup %5330  ;;  %5332 = vrcp.f32 %v524_v54 }
 0x370   :  { %5205 = vmatmul.msk.f32.vlgmr.msrb.gmra.mxu0 %vm384_vm6, %v529_v55  ;;  %v531_v14 = vmul.f32 %v5331_v56, %v5323_v43  ;;  %v758_v59 = vpop.permute.xlu2 %757 }
 0x371   :  { %1159 = vmatpush.msrb.mxu0 %v986_v29  ;;  %v763_v61 = vrot.slane %v758_v59, 4  ;;  %v766_v62 = vsel %vm154_vm5, %v758_v59, %v765_v60 }
 0x372   :  { %5207 = vmatmul.msk.f32.vlgmr.msra.gmra.mxu2 %vm384_vm6, %v531_v14  ;;  %v774_v0 = vperm.slane %v766_v62, %v5633_v41 }
 0x373   :  { %1205 = vmatpush.msra.mxu2 %v990_v24  ;;  %v764_v63 = vsel %vm154_vm5, %v763_v61, %v5751_v16 }
 0x374   :  { %v770_v2 = vperm.slane %v764_v63, %v5633_v41  ;;  %v801_v6 = vrot.slane %v774_v0, 4 }
 0x375   :  { %v5333_v57 = vpop.eup %5332 }
 0x376   :  { %v532_v58 = vmul.f32 %v5333_v57, %v5325_v13  ;;  %v789_v32 = vrot.slane %v770_v2, 4 }
 0x378   :  { %5208 = vmatmul.msk.f32.vlgmr.msra.gmra.mxu3 %vm384_vm6, %v532_v58 }
 0x379   :  { %1228 = vmatpush.msra.mxu3 %v992_v20 }
 0x386   :  { %v761_v3 = vpop.permute.xlu1 %760 }
 0x387   :  { %v775_v4 = vrot.slane %v761_v3, 4  ;;  %v778_v5 = vsel %vm154_vm5, %v761_v3, %v777_v1 }
 0x388   :  { %v786_v7 = vperm.slane %v778_v5, %v5633_v41 }
 0x389   :  { %v776_v9 = vsel %vm154_vm5, %v775_v4, %v755_v49 }
 0x38a   :  { %v782_v10 = vperm.slane %v776_v9, %v5633_v41  ;;  %v799_v11 = vrot.slane %v786_v7, 4  ;;  %v802_v16 = vsel %vm154_vm5, %v786_v7, %v801_v6 }
 0x38b   :  { %v810_v15 = vperm.slane %v802_v16, %v5638_v52 }
 0x38c   :  { %v787_v21 = vrot.slane %v782_v10, 4  ;;  %v790_v23 = vsel %vm154_vm5, %v782_v10, %v789_v32  ;;  %v800_v27 = vsel %vm154_vm5, %v799_v11, %v774_v0 }
 0x38d   :  { %v798_v17 = vperm.slane %v790_v23, %v5638_v52  ;;  %v806_v18 = vperm.slane %v800_v27, %v5638_v52  ;;  %v817_v19 = vrot.slane %v810_v15, 4 }
 0x38e   :  { %v788_v20 = vsel %vm154_vm5, %v787_v21, %v770_v2 }
 0x38f   :  { %v794_v22 = vperm.slane %v788_v20, %v5638_v52  ;;  %v813_v24 = vrot.slane %v798_v17, 4  ;;  %v815_v26 = vrot.slane %v806_v18, 4  ;;  %v818_v29 = vsel %vm154_vm5, 0.0, %v817_v19 }
 0x390   :  { %v830_v31 = vsel %vm154_vm5, %v817_v19, %v806_v18  ;;  %v835_v33 = vrot.slane %v818_v29, 4 }
 0x391   :  { %v811_v34 = vrot.slane %v794_v22, 4  ;;  %v814_v35 = vsel %vm154_vm5, 0.0, %v813_v24  ;;  %v816_v36 = vsel %vm154_vm5, 0.0, %v815_v26  ;;  %v834_v30 = vperm.slane %v830_v31, %v5633_v41 }
 0x392   :  { %v824_v37 = vrot.slane %v814_v35, 4  ;;  %v836_v38 = vsel %vm154_vm5, %v835_v33, %v816_v36  ;;  %v819_v39 = vsel %vm154_vm5, %v813_v24, %v794_v22 }
 0x393   :  { %v812_v40 = vsel %vm154_vm5, 0.0, %v811_v34  ;;  %v823_v42 = vperm.slane %v819_v39, %v5633_v41  ;;  %v840_v43 = vperm.slane %v836_v38, %v5633_v41  ;;  %v855_v44 = vrot.slane %v834_v30, 4 }
 0x394   :  { %v825_v13 = vsel %vm154_vm5, %v824_v37, %v812_v40 }
 0x395   :  { %v829_v45 = vperm.slane %v825_v13, %v5633_v41  ;;  %v843_v12 = vrot.slane %v823_v42, 4  ;;  %v853_v25 = vrot.slane %v840_v43, 4  ;;  %v856_v46 = vsel %vm154_vm5, %v840_v43, %v855_v44 }
 0x396   :  { %v864_v48 = vperm.slane %v856_v46, %v5638_v52 }
 0x397   :  { %v841_v49 = vrot.slane %v829_v45, 4  ;;  %v844_v50 = vsel %vm154_vm5, %v829_v45, %v843_v12  ;;  %v854_v51 = vsel %vm154_vm5, %v853_v25, %v834_v30 }
 0x398   :  { %v852_v53 = vperm.slane %v844_v50, %v5638_v52  ;;  %v869_v54 = vrot.slane %v864_v48, 4  ;;  %v860_v55 = vperm.slane %v854_v51, %v5638_v52 }
 0x399   :  { %v842_v56 = vsel %vm154_vm5, %v841_v49, %v823_v42 }
 0x39a   :  { %v870_v14 = vsel %vm154_vm5, %v869_v54, %v852_v53  ;;  %v871_v57 = vrot.slane %v852_v53, 4  ;;  %v848_v58 = vperm.slane %v842_v56, %v5638_v52  ;;  %v865_v59 = vrot.slane %v860_v55, 4 }
 0x39b   :  { %5214 = vmatmul.msk.f32.vlgmr.msrb.gmra.mxu2 %vm384_vm6, %v870_v14 }
 0x39c   :  { %v866_v60 = vsel %vm154_vm5, %v865_v59, %v848_v58  ;;  %v872_v61 = vsel %vm154_vm5, %v864_v48, %v871_v57  ;;  %v867_v1 = vrot.slane %v848_v58, 4 }
 0x39d   :  { %5210 = vmatmul.msk.f32.vlgmr.msra.gmra.mxu0 %vm384_vm6, %v866_v60  ;;  %5216 = vmatmul.msk.f32.vlgmr.msrb.gmra.mxu3 %vm384_vm6, %v872_v61 }
 0x39e   :  { %v868_v2 = vsel %vm154_vm5, %v860_v55, %v867_v1 }
 0x3a9   :  { %v518_v62 = vpop.xlane.xlu2 %517 }
 0x3aa   :  { %5334 = vrcp.f32 %v518_v62 }
 0x3b0   :  { %v5335_v63 = vpop.eup %5334 }
 0x3b1   :  { %v530_v0 = vmul.f32 %v5335_v63, %v5813_v47 }
 0x3b3   :  { %5206 = vmatmul.msk.f32.vlgmr.msrb.gmra.mxu1 %vm384_vm6, %v530_v0 }
 0x3b4   :  { %1182 = vmatpush.msrb.mxu1 %v5796_v28 }
 0x3bb   :  { %5212 = vmatmul.msk.f32.vlgmr.msra.gmra.mxu1 %vm384_vm6, %v868_v2 }
 0x3ed   :  { %v553_v5 = vpop.f32.mrf.mxu0 }
 0x3ee   :  { %v627_v11 = vrot.slane %v553_v5, 4 }
 0x3f5   :  { %v599_v3 = vpop.f32.mrf.mxu2 }
 0x3f6   :  { %v625_v32 = vrot.slane %v599_v3, 4  ;;  %v628_v15 = vsel %vm154_vm5, %v599_v3, %v627_v11 }
 0x3f7   :  { %v636_v27 = vperm.slane %v628_v15, %v5633_v41 }
 0x3f8   :  { %v626_v16 = vsel %vm154_vm5, %v625_v32, %v553_v5 }
 0x3f9   :  { %v632_v21 = vperm.slane %v626_v16, %v5633_v41  ;;  %v663_v26 = vrot.slane %v636_v27, 4 }
 0x3fb   :  { %v622_v4 = vpop.f32.mrf.mxu3  ;;  %v651_v20 = vrot.slane %v632_v21, 4 }
 0x3fc   :  { %v637_v23 = vrot.slane %v622_v4, 4 }
 0x41a   :  { %v5877_v28 = vpop.f32.mrf.mxu0 }
 0x41b   :  { %v1097_v10 = vsel %vm384_vm6, %v5877_v28, -inf }
 0x41e   :  { %v5869_v6 = vpop.f32.mrf.mxu2 }
 0x41f   :  { %v1103_v7 = vsel %vm384_vm6, %v5869_v6, -inf }
 0x420   :  { %v5873_v9 = vpop.f32.mrf.mxu3  ;;  %1104 = vmax.xlane.f32.xlu1 %v1103_v7 }
 0x421   :  { %v1106_v47 = vsel %vm384_vm6, %v5873_v9, -inf }
 0x422   :  { %1107 = vmax.xlane.f32.xlu0 %v1106_v47 }
 0x428   :  { %1098 = vmax.xlane.f32.xlu1 %v1097_v10 }
 0x430   :  { %v576_v17 = vpop.f32.mrf.mxu1 }
 0x431   :  { %v638_v18 = vsel %vm154_vm5, %v637_v23, %v576_v17  ;;  %v639_v19 = vrot.slane %v576_v17, 4 }
 0x432   :  { %v644_v22 = vperm.slane %v638_v18, %v5633_v41 }
 0x433   :  { %v640_v24 = vsel %vm154_vm5, %v622_v4, %v639_v19 }
 0x434   :  { %v648_v29 = vperm.slane %v640_v24, %v5633_v41  ;;  %v649_v31 = vrot.slane %v644_v22, 4  ;;  %v652_v33 = vsel %vm154_vm5, %v644_v22, %v651_v20 }
 0x435   :  { %v660_v34 = vperm.slane %v652_v33, %v5638_v52 }
 0x436   :  { %v650_v35 = vsel %vm154_vm5, %v649_v31, %v632_v21  ;;  %v661_v36 = vrot.slane %v648_v29, 4  ;;  %v664_v30 = vsel %vm154_vm5, %v648_v29, %v663_v26 }
 0x437   :  { %v656_v37 = vperm.slane %v650_v35, %v5638_v52  ;;  %v672_v38 = vperm.slane %v664_v30, %v5638_v52  ;;  %v675_v39 = vrot.slane %v660_v34, 4 }
 0x438   :  { %v662_v40 = vsel %vm154_vm5, %v661_v36, %v636_v27  ;;  %v1042_v23 = vpop.f32.mrf.mxu1 }
 0x439   :  { %v668_v42 = vperm.slane %v662_v40, %v5638_v52  ;;  %v673_v43 = vrot.slane %v656_v37, 4  ;;  %v676_v44 = vsel %vm154_vm5, 0.0, %v675_v39  ;;  %v679_v13 = vrot.slane %v672_v38, 4 }
 0x43a   :  { %v681_v45 = vsel %vm154_vm5, %v675_v39, %v656_v37  ;;  %v686_v12 = vrot.slane %v676_v44, 4  ;;  %v1100_v27 = vsel %vm384_vm6, %v1042_v23, -inf }
 0x43b   :  { %v674_v25 = vsel %vm154_vm5, 0.0, %v673_v43  ;;  %v677_v46 = vrot.slane %v668_v42, 4  ;;  %v680_v48 = vsel %vm154_vm5, 0.0, %v679_v13  ;;  %v685_v49 = vperm.slane %v681_v45, %v5633_v41 }
 0x43c   :  { %v697_v50 = vrot.slane %v680_v48, 4  ;;  %v687_v51 = vsel %vm154_vm5, %v686_v12, %v674_v25  ;;  %v692_v53 = vsel %vm154_vm5, %v679_v13, %v668_v42  ;;  %v5472_v42 = vld [vmem:[%s7312_s0] sm:$0xff] }
 0x43d   :  { %v678_v54 = vsel %vm154_vm5, 0.0, %v677_v46  ;;  %v691_v55 = vperm.slane %v687_v51, %v5633_v41  ;;  %v696_v56 = vperm.slane %v692_v53, %v5633_v41  ;;  %v705_v14 = vrot.slane %v685_v49, 4 }
 0x43e   :  { %v698_v57 = vsel %vm154_vm5, %v697_v50, %v678_v54 }
 0x43f   :  { %v702_v58 = vperm.slane %v698_v57, %v5633_v41  ;;  %v706_v59 = vsel %vm154_vm5, %v691_v55, %v705_v14  ;;  %v717_v60 = vrot.slane %v696_v56, 4  ;;  %v703_v61 = vrot.slane %v691_v55, 4 }
 0x440   :  { %v714_v62 = vperm.slane %v706_v59, %v5638_v52 }
 0x441   :  { %v718_v63 = vsel %vm154_vm5, %v702_v58, %v717_v60  ;;  %v704_v0 = vsel %vm154_vm5, %v703_v61, %v685_v49  ;;  %v715_v1 = vrot.slane %v702_v58, 4 }
 0x442   :  { %v726_v2 = vperm.slane %v718_v63, %v5638_v52  ;;  %v733_v3 = vrot.slane %v714_v62, 4  ;;  %v710_v4 = vperm.slane %v704_v0, %v5638_v52 }
 0x443   :  { %v716_v5 = vsel %vm154_vm5, %v715_v1, %v696_v56  ;;  %v5952_v1 = vld [vmem:[%s7313_s1] sm:$0xff] }
 0x444   :  { %v734_v7 = vsel %vm154_vm5, %v726_v2, %v733_v3  ;;  %v731_v47 = vrot.slane %v726_v2, 4  ;;  %v722_v32 = vperm.slane %v716_v5, %v5638_v52  ;;  %v729_v10 = vrot.slane %v710_v4, 4 }
 0x445   :  { %744 = vrot.lane.b32.xlu1 %v734_v7, %s5514_s24 }
 0x446   :  { %v732_v11 = vsel %vm154_vm5, %v731_v47, %v714_v62  ;;  %v727_v16 = vrot.slane %v722_v32, 4  ;;  %v730_v15 = vsel %vm154_vm5, %v722_v32, %v729_v10  ;;  %v5964_v10 = vld [vmem:[%s7316_s4] sm:$0x3] }
 0x447   :  { %740 = vrot.lane.b32.xlu0 %v732_v11, %s5515_s25  ;;  %736 = vrot.lane.b32.xlu2 %v730_v15, %s5516_s26  ;;  %v5969_v15 = vld [vmem:[%s7317_s5] sm:$0x3] }
 0x448   :  { %v728_v21 = vsel %vm154_vm5, %v727_v16, %v710_v4 }
 0x471   :  { %1101 = vmax.xlane.f32.xlu0 %v1100_v27 }
 0x493   :  { %v1105_v17 = vpop.xlane.xlu1 %1104 }
 0x494   :  { %v1111_v18 = vsub.f32 %v5869_v6, %v1105_v17  ;;  %v1407_v17 = vperm.slane %v5969_v15, 0 }
 0x495   :  { %v1108_v19 = vpop.xlane.xlu0 %1107 }
 0x496   :  { %v1117_v20 = vmul.f32 1.442695, %v1111_v18  ;;  %v1112_v22 = vsub.f32 %v5873_v9, %v1108_v19 }
 0x498   :  { %5336 = vpow2.f32 %v1117_v20  ;;  %v1119_v24 = vmul.f32 1.442695, %v1112_v22 }
 0x49a   :  { %5338 = vpow2.f32 %v1119_v24 }
 0x49b   :  { %v1099_v26 = vpop.xlane.xlu1 %1098 }
 0x49c   :  { %v1109_v29 = vsub.f32 %v5877_v28, %v1099_v26 }
 0x49e   :  { %v5337_v31 = vpop.eup %5336  ;;  %v1113_v33 = vmul.f32 1.442695, %v1109_v29 }
 0x49f   :  { %v1127_v34 = vsel %vm384_vm6, %v5337_v31, 0.0 }
 0x4a0   :  { %v5339_v35 = vpop.eup %5338  ;;  %5340 = vpow2.f32 %v1113_v33  ;;  %1128 = vadd.xlane.f32.xlu2 %v1127_v34 }
 0x4a1   :  { %v1130_v36 = vsel %vm384_vm6, %v5339_v35, 0.0  ;;  %v737_v9 = vpop.permute.xlu2 %736 }
 0x4a2   :  { %1131 = vadd.xlane.f32.xlu0 %v1130_v36  ;;  %v747_v37 = vsel %vm384_vm6, %v728_v21, %v737_v9  ;;  %v1404_v21 = vperm.slane %v5964_v10, 0 }
 0x4a6   :  { %v5341_v6 = vpop.eup %5340 }
 0x4a7   :  { %v1121_v30 = vsel %vm384_vm6, %v5341_v6, 0.0 }
 0x4a8   :  { %1122 = vadd.xlane.f32.xlu2 %v1121_v30 }
 0x4b7   :  { %v745_v38 = vpop.permute.xlu1 %744 }
 0x4b9   :  { %v741_v28 = vpop.permute.xlu0 %740 }
 0x4ba   :  { %v749_v39 = vsel %vm748_vm10, %v747_v37, %v741_v28 }
 0x4bb   :  { %v751_v40 = vsel %vm750_vm11, %v749_v39, %v745_v38 }
 0x4bc   :  { %v5937_v43 = vadd.f32 %v5472_v42, %v751_v40 }
 0x4be   :  { %v1360_v44 = vsel %vm84_vm0, %v5937_v43, 0.0 }
 0x4bf   :  { %1361 = vadd.xlane.f32.xlu1 %v1360_v44 }
 0x4d8   :  { %1532 = vrot.lane.b32.xlu1 %v5952_v1, %s5510_s20 }
 0x4e4   :  { %v1102_v13 = vpop.xlane.xlu0 %1101 }
 0x4e5   :  { %v1110_v45 = vsub.f32 %v1042_v23, %v1102_v13 }
 0x4e7   :  { %v1115_v12 = vmul.f32 1.442695, %v1110_v45 }
 0x4e9   :  { %5342 = vpow2.f32 %v1115_v12 }
 0x4ef   :  { %v5343_v25 = vpop.eup %5342 }
 0x4f0   :  { %v1124_v46 = vsel %vm384_vm6, %v5343_v25, 0.0 }
 0x4f1   :  { %1125 = vadd.xlane.f32.xlu0 %v1124_v46 }
 0x505   :  { %1535 = vrot.lane.b32.xlu0 %v5952_v1, %s5511_s21 }
 0x513   :  { %v1129_v48 = vpop.xlane.xlu2 %1128 }
 0x514   :  { %5344 = vrcp.f32 %v1129_v48 }
 0x515   :  { %v1132_v49 = vpop.xlane.xlu0 %1131 }
 0x516   :  { %5346 = vrcp.f32 %v1132_v49 }
 0x51a   :  { %v5345_v50 = vpop.eup %5344 }
 0x51b   :  { %v1139_v51 = vmul.f32 %v5345_v50, %v5337_v31  ;;  %v1123_v53 = vpop.xlane.xlu2 %1122 }
 0x51c   :  { %v5347_v54 = vpop.eup %5346  ;;  %5348 = vrcp.f32 %v1123_v53 }
 0x51d   :  { %v1140_v55 = vmul.f32 %v5347_v54, %v5339_v35  ;;  %5219 = vmatmul.msk.f32.vlgmr.msra.gmra.mxu2 %vm384_vm6, %v1139_v51 }
 0x51f   :  { %5220 = vmatmul.msk.f32.vlgmr.msra.gmra.mxu3 %vm384_vm6, %v1140_v55 }
 0x522   :  { %v5349_v56 = vpop.eup %5348 }
 0x523   :  { %v1137_v14 = vmul.f32 %v5349_v56, %v5341_v6 }
 0x525   :  { %5217 = vmatmul.msk.f32.vlgmr.msrb.gmra.mxu0 %vm384_vm6, %v1137_v14 }
 0x532   :  { %v1362_v57 = vpop.xlane.xlu1 %1361 }
 0x533   :  { %v1366_v58 = vmul.f32 %v1362_v57, %v5598_v8 }
 0x535   :  { %v1368_v59 = vsub.f32 %v5937_v43, %v1366_v58 }
 0x537   :  { %v1370_v60 = vmul.f32 %v1368_v59, %v1368_v59 }
 0x539   :  { %v1372_v61 = vsel %vm84_vm0, %v1370_v60, 0.0 }
 0x53a   :  { %1373 = vadd.xlane.f32.xlu2 %v1372_v61 }
 0x552   :  { %1538 = vrot.lane.b32.xlu2 %v5952_v1, %s5509_s19 }
 0x564   :  { %v1126_v62 = vpop.xlane.xlu0 %1125 }
 0x565   :  { %5350 = vrcp.f32 %v1126_v62 }
 0x56b   :  { %v5351_v63 = vpop.eup %5350 }
 0x56c   :  { %v1138_v0 = vmul.f32 %v5351_v63, %v5343_v25 }
 0x56e   :  { %5218 = vmatmul.msk.f32.vlgmr.msrb.gmra.mxu1 %vm384_vm6, %v1138_v0 }
 0x5a0   :  { %v1207_v22 = vpop.f32.mrf.mxu2 }
 0x5a1   :  { %v1233_v26 = vrot.slane %v1207_v22, 4 }
 0x5a2   :  { %v1161_v24 = vpop.f32.mrf.mxu0  ;;  %v1230_v33 = vpop.f32.mrf.mxu3 }
 0x5a3   :  { %v1235_v29 = vrot.slane %v1161_v24, 4  ;;  %v1234_v31 = vsel %vm154_vm5, %v1233_v26, %v1161_v24  ;;  %v1245_v36 = vrot.slane %v1230_v33, 4 }
 0x5a4   :  { %v1240_v35 = vperm.slane %v1234_v31, %v5633_v41 }
 0x5a5   :  { %v1236_v34 = vsel %vm154_vm5, %v1207_v22, %v1235_v29 }
 0x5a6   :  { %v1244_v6 = vperm.slane %v1236_v34, %v5633_v41  ;;  %v1259_v28 = vrot.slane %v1240_v35, 4 }
 0x5a8   :  { %v1271_v40 = vrot.slane %v1244_v6, 4 }
 0x5ad   :  { %v1374_v2 = vpop.xlane.xlu2 %1373 }
 0x5ae   :  { %v1378_v3 = vmul.f32 %v1374_v2, %v5598_v8 }
 0x5b0   :  { %v1380_v4 = vadd.f32 1e-05, %v1378_v3 }
 0x5b2   :  { %5352 = vrsqrt.f32 %v1380_v4  ;;  %vm1388_vm13 = vweird.f32 %v1380_v4 }
 0x5b8   :  { %v5353_v5 = vpop.eup %5352 }
 0x5b9   :  { %v1383_v7 = vmul.f32 %v5353_v5, %v1380_v4  ;;  %vm1389_vm12 = vweird.f32 %v5353_v5 }
 0x5ba   :  { %vm1390_vm14 = vmor %vm1388_vm13, %vm1389_vm12 }
 0x5bb   :  { %v1384_v47 = vmul.f32 %v5353_v5, %v1383_v7 }
 0x5bd   :  { %v1385_v32 = vmul.f32 0.5, %v1384_v47 }
 0x5bf   :  { %v1386_v11 = vsub.f32 1.5, %v1385_v32 }
 0x5c1   :  { %v1387_v16 = vmul.f32 %v5353_v5, %v1386_v11 }
 0x5c3   :  { %v1391_v23 = vsel %vm1390_vm14, %v5353_v5, %v1387_v16 }
 0x5c4   :  { %v1402_v27 = vmul.f32 %v1391_v23, %v1368_v59 }
 0x5c6   :  { %v1405_v18 = vmul.f32 %v1404_v21, %v1402_v27 }
 0x5c8   :  { %v1408_v19 = vadd.f32 %v1407_v17, %v1405_v18 }
 0x5ca   :  { %v5977_v20 = vmul.f32 0.35355338, %v1408_v19 }
 0x5cc   :  { %1418 = vrot.lane.b32.xlu2 %v5977_v20, %s5509_s19  ;;  %1415 = vrot.lane.b32.xlu1 %v5977_v20, %s5511_s21 }
 0x5cd   :  { %1412 = vrot.lane.b32.xlu0 %v5977_v20, %s5510_s20 }
 0x5eb   :  { %v1184_v30 = vpop.f32.mrf.mxu1 }
 0x5ec   :  { %v1246_v9 = vsel %vm154_vm5, %v1245_v36, %v1184_v30  ;;  %v1247_v37 = vrot.slane %v1184_v30, 4 }
 0x5ed   :  { %v1252_v38 = vperm.slane %v1246_v9, %v5633_v41 }
 0x5ee   :  { %v1248_v39 = vsel %vm154_vm5, %v1230_v33, %v1247_v37  ;;  %v1539_v37 = vpop.permute.xlu2 %1538 }
 0x5ef   :  { %v1256_v42 = vperm.slane %v1248_v39, %v5633_v41  ;;  %v1257_v44 = vrot.slane %v1252_v38, 4  ;;  %v1260_v13 = vsel %vm154_vm5, %v1252_v38, %v1259_v28  ;;  %v1553_v28 = vrot.slane %v1539_v37, 4  ;;  %v1536_v39 = vpop.permute.xlu0 %1535 }
 0x5f0   :  { %v1268_v45 = vperm.slane %v1260_v13, %v5638_v52  ;;  %v1543_v38 = vrot.slane %v5952_v1, 4 }
 0x5f1   :  { %v1258_v12 = vsel %vm154_vm5, %v1257_v44, %v1240_v35  ;;  %v1269_v25 = vrot.slane %v1256_v42, 4  ;;  %v1272_v46 = vsel %vm154_vm5, %v1256_v42, %v1271_v40  ;;  %v1533_v40 = vpop.permute.xlu1 %1532  ;;  %v1541_v42 = vrot.slane %v1536_v39, 4 }
 0x5f2   :  { %v1264_v48 = vperm.slane %v1258_v12, %v5638_v52  ;;  %v1280_v49 = vperm.slane %v1272_v46, %v5638_v52  ;;  %v1283_v50 = vrot.slane %v1268_v45, 4  ;;  %v1544_v44 = vsel %vm154_vm5, %v1536_v39, %v1543_v38 }
 0x5f3   :  { %v1270_v51 = vsel %vm154_vm5, %v1269_v25, %v1244_v6  ;;  %v1554_v13 = vsel %vm154_vm5, %v1553_v28, %v1533_v40  ;;  %v1555_v45 = vrot.slane %v1533_v40, 4  ;;  %v1552_v12 = vperm.slane %v1544_v44, %v5633_v41 }
 0x5f4   :  { %v1276_v53 = vperm.slane %v1270_v51, %v5638_v52  ;;  %v1281_v54 = vrot.slane %v1264_v48, 4  ;;  %v1284_v55 = vsel %vm154_vm5, 0.0, %v1283_v50  ;;  %v1287_v56 = vrot.slane %v1280_v49, 4 }
 0x5f5   :  { %v1289_v14 = vsel %vm154_vm5, %v1283_v50, %v1264_v48  ;;  %v1294_v57 = vrot.slane %v1284_v55, 4  ;;  %v1560_v25 = vperm.slane %v1554_v13, %v5633_v41  ;;  %v1542_v46 = vsel %vm154_vm5, %v1541_v42, %v5952_v1 }
 0x5f6   :  { %v1282_v58 = vsel %vm154_vm5, 0.0, %v1281_v54  ;;  %v1285_v59 = vrot.slane %v1276_v53, 4  ;;  %v1288_v60 = vsel %vm154_vm5, 0.0, %v1287_v56  ;;  %v1293_v61 = vperm.slane %v1289_v14, %v5633_v41 }
 0x5f7   :  { %v1305_v62 = vrot.slane %v1288_v60, 4  ;;  %v1295_v63 = vsel %vm154_vm5, %v1294_v57, %v1282_v58  ;;  %v1300_v0 = vsel %vm154_vm5, %v1287_v56, %v1276_v53  ;;  %v1556_v48 = vsel %vm154_vm5, %v1539_v37, %v1555_v45 }
 0x5f8   :  { %v1286_v2 = vsel %vm154_vm5, 0.0, %v1285_v59  ;;  %v1299_v3 = vperm.slane %v1295_v63, %v5633_v41  ;;  %v1304_v4 = vperm.slane %v1300_v0, %v5633_v41  ;;  %v1313_v5 = vrot.slane %v1293_v61, 4 }
 0x5f9   :  { %v1306_v7 = vsel %vm154_vm5, %v1305_v62, %v1286_v2  ;;  %v1548_v49 = vperm.slane %v1542_v46, %v5633_v41  ;;  %v1579_v50 = vrot.slane %v1552_v12, 4  ;;  %v1564_v51 = vperm.slane %v1556_v48, %v5633_v41 }
 0x5fa   :  { %v1310_v47 = vperm.slane %v1306_v7, %v5633_v41  ;;  %v1314_v32 = vsel %vm154_vm5, %v1299_v3, %v1313_v5  ;;  %v1325_v11 = vrot.slane %v1304_v4, 4  ;;  %v1311_v16 = vrot.slane %v1299_v3, 4 }
 0x5fb   :  { %v1322_v23 = vperm.slane %v1314_v32, %v5638_v52  ;;  %v1565_v53 = vrot.slane %v1560_v25, 4  ;;  %v1567_v54 = vrot.slane %v1548_v49, 4  ;;  %v1577_v56 = vrot.slane %v1564_v51, 4 }
 0x5fc   :  { %v1326_v27 = vsel %vm154_vm5, %v1310_v47, %v1325_v11  ;;  %v1312_v18 = vsel %vm154_vm5, %v1311_v16, %v1293_v61  ;;  %v1323_v19 = vrot.slane %v1310_v47, 4  ;;  %v1580_v14 = vsel %vm154_vm5, %v1564_v51, %v1579_v50 }
 0x5fd   :  { %v1334_v22 = vperm.slane %v1326_v27, %v5638_v52  ;;  %v1341_v24 = vrot.slane %v1322_v23, 4  ;;  %v1318_v26 = vperm.slane %v1312_v18, %v5638_v52  ;;  %v1566_v55 = vsel %vm154_vm5, %v1565_v53, %v1548_v49 }
 0x5fe   :  { %v1324_v29 = vsel %vm154_vm5, %v1323_v19, %v1304_v4  ;;  %v1588_v57 = vperm.slane %v1580_v14, %v5638_v52  ;;  %v1568_v58 = vsel %vm154_vm5, %v1560_v25, %v1567_v54  ;;  %v1578_v1 = vsel %vm154_vm5, %v1577_v56, %v1552_v12 }
 0x5ff   :  { %v1342_v31 = vsel %vm154_vm5, %v1334_v22, %v1341_v24  ;;  %v1339_v33 = vrot.slane %v1334_v22, 4  ;;  %v1330_v34 = vperm.slane %v1324_v29, %v5638_v52  ;;  %v1337_v35 = vrot.slane %v1318_v26, 4 }
 0x600   :  { %1352 = vrot.lane.b32.xlu2 %v1342_v31, %s5514_s24  ;;  %v1572_v59 = vperm.slane %v1566_v55, %v5638_v52  ;;  %v1576_v60 = vperm.slane %v1568_v58, %v5638_v52  ;;  %v1584_v61 = vperm.slane %v1578_v1, %v5638_v52  ;;  %v1595_v62 = vrot.slane %v1588_v57, 4 }
 0x601   :  { %v1340_v36 = vsel %vm154_vm5, %v1339_v33, %v1322_v23  ;;  %v1335_v6 = vrot.slane %v1330_v34, 4  ;;  %v1338_v30 = vsel %vm154_vm5, %v1330_v34, %v1337_v35  ;;  %v1423_v48 = vrot.slane %v5977_v20, 4 }
 0x602   :  { %1348 = vrot.lane.b32.xlu1 %v1340_v36, %s5515_s25  ;;  %1344 = vrot.lane.b32.xlu0 %v1338_v30, %s5516_s26  ;;  %v1591_v63 = vrot.slane %v1576_v60, 4  ;;  %v1589_v0 = vrot.slane %v1572_v59, 4  ;;  %v1593_v3 = vrot.slane %v1584_v61, 4  ;;  %v1596_v4 = vsel %vm154_vm5, 0.0, %v1595_v62 }
 0x603   :  { %v6028_v9 = vsel %vm154_vm5, %v1335_v6, %v1318_v26  ;;  %v1608_v5 = vsel %vm154_vm5, %v1595_v62, %v1584_v61  ;;  %v1613_v11 = vrot.slane %v1596_v4, 4 }
 0x604   :  { %v1592_v2 = vsel %vm154_vm5, 0.0, %v1591_v63  ;;  %v1597_v7 = vsel %vm154_vm5, %v1591_v63, %v1572_v59  ;;  %v1590_v32 = vsel %vm154_vm5, 0.0, %v1589_v0  ;;  %v1594_v16 = vsel %vm154_vm5, 0.0, %v1593_v3 }
 0x605   :  { %v1602_v47 = vrot.slane %v1592_v2, 4  ;;  %v1612_v23 = vperm.slane %v1608_v5, %v5633_v41  ;;  %v1601_v27 = vperm.slane %v1597_v7, %v5633_v41  ;;  %v1614_v19 = vsel %vm154_vm5, %v1613_v11, %v1594_v16 }
 0x606   :  { %v1618_v22 = vperm.slane %v1614_v19, %v5633_v41 }
 0x607   :  { %v1603_v18 = vsel %vm154_vm5, %v1602_v47, %v1590_v32  ;;  %v1633_v24 = vrot.slane %v1612_v23, 4  ;;  %v1621_v29 = vrot.slane %v1601_v27, 4 }
 0x608   :  { %v1607_v26 = vperm.slane %v1603_v18, %v5633_v41  ;;  %v1631_v33 = vrot.slane %v1618_v22, 4 }
 0x609   :  { %v1634_v31 = vsel %vm154_vm5, %v1618_v22, %v1633_v24 }
 0x60a   :  { %v1622_v34 = vsel %vm154_vm5, %v1607_v26, %v1621_v29  ;;  %v1642_v35 = vperm.slane %v1634_v31, %v5638_v52  ;;  %v1619_v36 = vrot.slane %v1607_v26, 4  ;;  %v1632_v30 = vsel %vm154_vm5, %v1631_v33, %v1612_v23 }
 0x60b   :  { %v1630_v6 = vperm.slane %v1622_v34, %v5638_v52  ;;  %v1638_v38 = vperm.slane %v1632_v30, %v5638_v52 }
 0x60c   :  { %v1647_v37 = vrot.slane %v1642_v35, 4  ;;  %v1620_v28 = vsel %vm154_vm5, %v1619_v36, %v1601_v27 }
 0x60d   :  { %v1626_v39 = vperm.slane %v1620_v28, %v5638_v52  ;;  %v1649_v40 = vrot.slane %v1630_v6, 4  ;;  %v1643_v44 = vrot.slane %v1638_v38, 4 }
 0x60e   :  { %v6069_v42 = vsel %vm154_vm5, %v1647_v37, %v1630_v6 }
 0x60f   :  { %5225 = vmatpush.xpose.msk.msrb.mxu2 %vm384_vm6, %v6069_v42  ;;  %v6074_v13 = vsel %vm154_vm5, %v1642_v35, %v1649_v40  ;;  %v1645_v45 = vrot.slane %v1626_v39, 4  ;;  %v6077_v12 = vsel %vm154_vm5, %v1643_v44, %v1626_v39 }
 0x610   :  { %5227 = vmatpush.xpose.msk.msrb.mxu3 %vm384_vm6, %v6074_v13  ;;  %5221 = vmatpush.xpose.msk.msra.mxu0 %vm384_vm6, %v6077_v12 }
 0x611   :  { %v6085_v25 = vsel %vm154_vm5, %v1638_v38, %v1645_v45 }
 0x612   :  { %5223 = vmatpush.xpose.msk.msra.mxu1 %vm384_vm6, %v6085_v25 }
 0x613   :  { %1863 = vmatpush.msra.mxu2 %v6069_v42 }
 0x614   :  { %1886 = vmatpush.msra.mxu3 %v6074_v13  ;;  %1817 = vmatpush.msrb.mxu0 %v6077_v12 }
 0x616   :  { %1840 = vmatpush.msrb.mxu1 %v6085_v25 }
 0x626   :  { %v1419_v46 = vpop.permute.xlu2 %1418 }
 0x627   :  { %v1433_v49 = vrot.slane %v1419_v46, 4 }
 0x63e   :  { %v1416_v50 = vpop.permute.xlu1 %1415 }
 0x63f   :  { %v1413_v51 = vpop.permute.xlu0 %1412  ;;  %v1421_v53 = vrot.slane %v1416_v50, 4  ;;  %v1424_v54 = vsel %vm154_vm5, %v1416_v50, %v1423_v48 }
 0x640   :  { %v1434_v55 = vsel %vm154_vm5, %v1433_v49, %v1413_v51  ;;  %v1435_v56 = vrot.slane %v1413_v51, 4  ;;  %v1432_v14 = vperm.slane %v1424_v54, %v5633_v41 }
 0x641   :  { %v1440_v57 = vperm.slane %v1434_v55, %v5633_v41  ;;  %v1422_v58 = vsel %vm154_vm5, %v1421_v53, %v5977_v20 }
 0x642   :  { %v1436_v1 = vsel %vm154_vm5, %v1419_v46, %v1435_v56  ;;  %v1428_v59 = vperm.slane %v1422_v58, %v5633_v41  ;;  %v1459_v60 = vrot.slane %v1432_v14, 4 }
 0x643   :  { %v1444_v61 = vperm.slane %v1436_v1, %v5633_v41  ;;  %v1445_v62 = vrot.slane %v1440_v57, 4 }
 0x644   :  { %v1447_v63 = vrot.slane %v1428_v59, 4 }
 0x645   :  { %v1457_v0 = vrot.slane %v1444_v61, 4  ;;  %v1446_v2 = vsel %vm154_vm5, %v1445_v62, %v1428_v59  ;;  %v1460_v3 = vsel %vm154_vm5, %v1444_v61, %v1459_v60  ;;  %v51_v60 = vld [vmem:[%s7313_s1 + $0x8] sm:$0xff] }
 0x646   :  { %v1448_v4 = vsel %vm154_vm5, %v1440_v57, %v1447_v63  ;;  %v1452_v5 = vperm.slane %v1446_v2, %v5638_v52  ;;  %v1468_v20 = vperm.slane %v1460_v3, %v5638_v52  ;;  %2138 = vrot.lane.b32.xlu2 %v51_v60, %s5510_s20 }
 0x647   :  { %v1456_v7 = vperm.slane %v1448_v4, %v5638_v52  ;;  %v1458_v47 = vsel %vm154_vm5, %v1457_v0, %v1432_v14  ;;  %v5473_v4 = vld [vmem:[%s7312_s0 + $0x8] sm:$0xff] }
 0x648   :  { %v1464_v32 = vperm.slane %v1458_v47, %v5638_v52  ;;  %v1475_v11 = vrot.slane %v1468_v20, 4  ;;  %v1469_v16 = vrot.slane %v1452_v5, 4 }
 0x649   :  { %v1471_v23 = vrot.slane %v1456_v7, 4 }
 0x64a   :  { %v1473_v27 = vrot.slane %v1464_v32, 4  ;;  %v1476_v18 = vsel %vm154_vm5, 0.0, %v1475_v11  ;;  %v1488_v19 = vsel %vm154_vm5, %v1475_v11, %v1464_v32  ;;  %v1470_v35 = vsel %vm154_vm5, 0.0, %v1469_v16 }
 0x64b   :  { %v1472_v22 = vsel %vm154_vm5, 0.0, %v1471_v23  ;;  %v1477_v24 = vsel %vm154_vm5, %v1471_v23, %v1452_v5  ;;  %v1492_v26 = vperm.slane %v1488_v19, %v5633_v41  ;;  %v1493_v29 = vrot.slane %v1476_v18, 4 }
 0x64c   :  { %v1474_v31 = vsel %vm154_vm5, 0.0, %v1473_v27  ;;  %v1482_v33 = vrot.slane %v1472_v22, 4  ;;  %v1481_v34 = vperm.slane %v1477_v24, %v5633_v41 }
 0x64d   :  { %v1494_v36 = vsel %vm154_vm5, %v1493_v29, %v1474_v31  ;;  %v1513_v6 = vrot.slane %v1492_v26, 4 }
 0x64e   :  { %v1498_v30 = vperm.slane %v1494_v36, %v5633_v41  ;;  %v1483_v37 = vsel %vm154_vm5, %v1482_v33, %v1470_v35  ;;  %v1501_v28 = vrot.slane %v1481_v34, 4 }
 0x64f   :  { %v1487_v38 = vperm.slane %v1483_v37, %v5633_v41 }
 0x650   :  { %v1511_v39 = vrot.slane %v1498_v30, 4  ;;  %v1514_v40 = vsel %vm154_vm5, %v1498_v30, %v1513_v6 }
 0x651   :  { %v1502_v44 = vsel %vm154_vm5, %v1487_v38, %v1501_v28  ;;  %v1522_v45 = vperm.slane %v1514_v40, %v5638_v52  ;;  %v1499_v46 = vrot.slane %v1487_v38, 4 }
 0x652   :  { %v1510_v48 = vperm.slane %v1502_v44, %v5638_v52  ;;  %v1512_v49 = vsel %vm154_vm5, %v1511_v39, %v1492_v26 }
 0x653   :  { %v1527_v50 = vrot.slane %v1522_v45, 4  ;;  %v1500_v51 = vsel %vm154_vm5, %v1499_v46, %v1481_v34  ;;  %v1518_v53 = vperm.slane %v1512_v49, %v5638_v52 }
 0x654   :  { %v1506_v54 = vperm.slane %v1500_v51, %v5638_v52  ;;  %v1529_v55 = vrot.slane %v1510_v48, 4 }
 0x655   :  { %v1528_v56 = vsel %vm154_vm5, %v1527_v50, %v1510_v48  ;;  %v1523_v14 = vrot.slane %v1518_v53, 4  ;;  %v2149_v48 = vrot.slane %v51_v60, 4 }
 0x656   :  { %5226 = vmatmul.msk.f32.vlgmr.msrb.gmra.mxu2 %vm384_vm6, %v1528_v56  ;;  %v1530_v57 = vsel %vm154_vm5, %v1522_v45, %v1529_v55  ;;  %v1525_v58 = vrot.slane %v1506_v54, 4 }
 0x657   :  { %v1524_v1 = vsel %vm154_vm5, %v1523_v14, %v1506_v54  ;;  %5228 = vmatmul.msk.f32.vlgmr.msrb.gmra.mxu3 %vm384_vm6, %v1530_v57 }
 0x658   :  { %5222 = vmatmul.msk.f32.vlgmr.msra.gmra.mxu0 %vm384_vm6, %v1524_v1  ;;  %v1526_v59 = vsel %vm154_vm5, %v1518_v53, %v1525_v58 }
 0x659   :  { %5224 = vmatmul.msk.f32.vlgmr.msra.gmra.mxu1 %vm384_vm6, %v1526_v59 }
 0x65a   :  { %v1353_v0 = vpop.permute.xlu2 %1352 }
 0x674   :  { %v1345_v61 = vpop.permute.xlu0 %1344  ;;  %v1349_v62 = vpop.permute.xlu1 %1348 }
 0x675   :  { %v1355_v63 = vsel %vm384_vm6, %v6028_v9, %v1345_v61 }
 0x676   :  { %v1356_v2 = vsel %vm748_vm10, %v1355_v63, %v1349_v62 }
 0x677   :  { %v1357_v3 = vsel %vm750_vm11, %v1356_v2, %v1353_v0 }
 0x678   :  { %v6149_v5 = vadd.f32 %v5473_v4, %v1357_v3 }
 0x67a   :  { %v1363_v20 = vsel %vm84_vm0, %v6149_v5, 0.0 }
 0x67b   :  { %1364 = vadd.xlane.f32.xlu0 %v1363_v20 }
 0x68f   :  { %2141 = vrot.lane.b32.xlu0 %v51_v60, %s5511_s21 }
 0x6a0   :  { %v2139_v57 = vpop.permute.xlu2 %2138 }
 0x6a1   :  { %v2161_v1 = vrot.slane %v2139_v57, 4 }
 0x6d5   :  { %v6166_v24 = vpop.f32.mrf.mxu0 }
 0x6d6   :  { %v6154_v7 = vpop.f32.mrf.mxu1  ;;  %v1755_v26 = vsel %vm384_vm6, %v6166_v24, -inf }
 0x6d7   :  { %v1758_v9 = vsel %vm384_vm6, %v6154_v7, -inf }
 0x6d8   :  { %1759 = vmax.xlane.f32.xlu2 %v1758_v9 }
 0x6d9   :  { %v6159_v11 = vpop.f32.mrf.mxu2 }
 0x6da   :  { %v1752_v47 = vpop.f32.mrf.mxu3  ;;  %v1761_v16 = vsel %vm384_vm6, %v6159_v11, -inf }
 0x6db   :  { %v1764_v32 = vsel %vm384_vm6, %v1752_v47, -inf }
 0x6dc   :  { %1765 = vmax.xlane.f32.xlu0 %v1764_v32 }
 0x6e0   :  { %1762 = vmax.xlane.f32.xlu2 %v1761_v16 }
 0x6ee   :  { %v1365_v23 = vpop.xlane.xlu0 %1364 }
 0x6ef   :  { %v1367_v27 = vmul.f32 %v1365_v23, %v5598_v8 }
 0x6f1   :  { %v1369_v18 = vsub.f32 %v6149_v5, %v1367_v27 }
 0x6f3   :  { %v1371_v19 = vmul.f32 %v1369_v18, %v1369_v18 }
 0x6f5   :  { %v1375_v22 = vsel %vm84_vm0, %v1371_v19, 0.0 }
 0x6f6   :  { %1376 = vadd.xlane.f32.xlu1 %v1375_v22 }
 0x6fe   :  { %1756 = vmax.xlane.f32.xlu1 %v1755_v26 }
 0x701   :  { %v2142_v29 = vpop.permute.xlu0 %2141 }
 0x702   :  { %v2147_v51 = vrot.slane %v2142_v29, 4  ;;  %v2150_v54 = vsel %vm154_vm5, %v2142_v29, %v2149_v48 }
 0x703   :  { %v2158_v58 = vperm.slane %v2150_v54, %v5633_v41 }
 0x704   :  { %v2148_v56 = vsel %vm154_vm5, %v2147_v51, %v51_v60 }
 0x705   :  { %v2154_v10 = vperm.slane %v2148_v56, %v5633_v41  ;;  %v2185_v59 = vrot.slane %v2158_v58, 4 }
 0x707   :  { %v2173_v62 = vrot.slane %v2154_v10, 4 }
 0x717   :  { %2144 = vrot.lane.b32.xlu1 %v51_v60, %s5509_s19 }
 0x74b   :  { %v1760_v26 = vpop.xlane.xlu2 %1759 }
 0x74f   :  { %v1766_v31 = vpop.xlane.xlu0 %1765 }
 0x750   :  { %v1770_v33 = vsub.f32 %v1752_v47, %v1766_v31 }
 0x752   :  { %v1777_v34 = vmul.f32 1.442695, %v1770_v33 }
 0x754   :  { %5354 = vpow2.f32 %v1777_v34 }
 0x75a   :  { %v6171_v35 = vpop.eup %5354 }
 0x75b   :  { %v1788_v36 = vsel %vm384_vm6, %v6171_v35, 0.0 }
 0x75c   :  { %1789 = vadd.xlane.f32.xlu1 %v1788_v36 }
 0x769   :  { %v1377_v6 = vpop.xlane.xlu1 %1376 }
 0x76a   :  { %v1379_v30 = vmul.f32 %v1377_v6, %v5598_v8 }
 0x76c   :  { %v1381_v37 = vadd.f32 1e-05, %v1379_v30 }
 0x76e   :  { %5356 = vrsqrt.f32 %v1381_v37  ;;  %vm1398_vm1 = vweird.f32 %v1381_v37 }
 0x771   :  { %v6176_v50 = vpop.xlane.xlu1 %1756 }
 0x774   :  { %v5357_v28 = vpop.eup %5356 }
 0x775   :  { %v1393_v38 = vmul.f32 %v5357_v28, %v1381_v37  ;;  %vm1399_vm15 = vweird.f32 %v5357_v28 }
 0x776   :  { %vm1400_vm2 = vmor %vm1398_vm1, %vm1399_vm15 }
 0x777   :  { %v1394_v39 = vmul.f32 %v5357_v28, %v1393_v38 }
 0x779   :  { %v1395_v40 = vmul.f32 0.5, %v1394_v39 }
 0x77b   :  { %v1396_v44 = vsub.f32 1.5, %v1395_v40 }
 0x77d   :  { %v1397_v45 = vmul.f32 %v5357_v28, %v1396_v44 }
 0x77f   :  { %v1401_v46 = vsel %vm1400_vm2, %v5357_v28, %v1397_v45 }
 0x780   :  { %v1403_v49 = vmul.f32 %v1401_v46, %v1369_v18 }
 0x782   :  { %v1406_v53 = vmul.f32 %v1404_v21, %v1403_v49 }
 0x784   :  { %v1409_v55 = vadd.f32 %v1407_v17, %v1406_v53 }
 0x786   :  { %v6184_v14 = vmul.f32 0.35355338, %v1409_v55 }
 0x788   :  { %2021 = vrot.lane.b32.xlu2 %v6184_v14, %s5511_s21  ;;  %2018 = vrot.lane.b32.xlu0 %v6184_v14, %s5510_s20 }
 0x789   :  { %2024 = vrot.lane.b32.xlu1 %v6184_v14, %s5509_s19  ;;  %v2145_v15 = vpop.permute.xlu1 %2144 }
 0x78a   :  { %v2159_v21 = vrot.slane %v2145_v15, 4  ;;  %v2162_v17 = vsel %vm154_vm5, %v2145_v15, %v2161_v1  ;;  %v1763_v15 = vpop.xlane.xlu2 %1762 }
 0x78b   :  { %v2170_v60 = vperm.slane %v2162_v17, %v5633_v41 }
 0x78c   :  { %v2160_v61 = vsel %vm154_vm5, %v2159_v21, %v2139_v57 }
 0x78d   :  { %v2166_v63 = vperm.slane %v2160_v61, %v5633_v41  ;;  %v2183_v0 = vrot.slane %v2170_v60, 4  ;;  %v2186_v2 = vsel %vm154_vm5, %v2170_v60, %v2185_v59  ;;  %v1768_v61 = vsub.f32 %v6154_v7, %v1760_v26 }
 0x78e   :  { %v2194_v3 = vperm.slane %v2186_v2, %v5638_v52  ;;  %v1769_v2 = vsub.f32 %v6159_v11, %v1763_v15  ;;  %v2029_v26 = vrot.slane %v6184_v14, 4 }
 0x78f   :  { %v2171_v4 = vrot.slane %v2166_v63, 4  ;;  %v2174_v20 = vsel %vm154_vm5, %v2166_v63, %v2173_v62  ;;  %v2184_v9 = vsel %vm154_vm5, %v2183_v0, %v2158_v58 }
 0x790   :  { %v2182_v47 = vperm.slane %v2174_v20, %v5638_v52  ;;  %v2190_v32 = vperm.slane %v2184_v9, %v5638_v52  ;;  %v2201_v16 = vrot.slane %v2194_v3, 4  ;;  %v1773_v3 = vmul.f32 1.442695, %v1768_v61 }
 0x791   :  { %v2172_v23 = vsel %vm154_vm5, %v2171_v4, %v2154_v10  ;;  %v1775_v4 = vmul.f32 1.442695, %v1769_v2  ;;  %v1767_v20 = vsub.f32 %v6166_v24, %v6176_v50 }
 0x792   :  { %v2178_v27 = vperm.slane %v2172_v23, %v5638_v52  ;;  %v2197_v18 = vrot.slane %v2182_v47, 4  ;;  %v2199_v19 = vrot.slane %v2190_v32, 4  ;;  %v2202_v22 = vsel %vm154_vm5, 0.0, %v2201_v16 }
 0x793   :  { %v2214_v29 = vsel %vm154_vm5, %v2201_v16, %v2190_v32  ;;  %v2219_v31 = vrot.slane %v2202_v22, 4  ;;  %5358 = vpow2.f32 %v1773_v3  ;;  %v1771_v11 = vmul.f32 1.442695, %v1767_v20 }
 0x794   :  { %v2195_v33 = vrot.slane %v2178_v27, 4  ;;  %v2198_v34 = vsel %vm154_vm5, 0.0, %v2197_v18  ;;  %v2200_v36 = vsel %vm154_vm5, 0.0, %v2199_v19  ;;  %v2203_v6 = vsel %vm154_vm5, %v2197_v18, %v2178_v27 }
 0x795   :  { %v2208_v30 = vrot.slane %v2198_v34, 4  ;;  %v2218_v37 = vperm.slane %v2214_v29, %v5633_v41  ;;  %v2220_v28 = vsel %vm154_vm5, %v2219_v31, %v2200_v36  ;;  %v2207_v38 = vperm.slane %v2203_v6, %v5633_v41 }
 0x796   :  { %v2196_v39 = vsel %vm154_vm5, 0.0, %v2195_v33  ;;  %v2224_v40 = vperm.slane %v2220_v28, %v5633_v41  ;;  %5360 = vpow2.f32 %v1775_v4 }
 0x797   :  { %v2239_v44 = vrot.slane %v2218_v37, 4  ;;  %v2209_v45 = vsel %vm154_vm5, %v2208_v30, %v2196_v39  ;;  %v2227_v46 = vrot.slane %v2207_v38, 4  ;;  %5362 = vpow2.f32 %v1771_v11 }
 0x798   :  { %v2213_v48 = vperm.slane %v2209_v45, %v5633_v41  ;;  %v2237_v49 = vrot.slane %v2224_v40, 4 }
 0x799   :  { %v2240_v51 = vsel %vm154_vm5, %v2224_v40, %v2239_v44  ;;  %v6250_v9 = vpop.eup %5358 }
 0x79a   :  { %v2228_v53 = vsel %vm154_vm5, %v2213_v48, %v2227_v46  ;;  %v2248_v54 = vperm.slane %v2240_v51, %v5638_v52  ;;  %v2225_v55 = vrot.slane %v2213_v48, 4  ;;  %v2238_v56 = vsel %vm154_vm5, %v2237_v49, %v2218_v37 }
 0x79b   :  { %v2236_v57 = vperm.slane %v2228_v53, %v5638_v52  ;;  %v2244_v58 = vperm.slane %v2238_v56, %v5638_v52  ;;  %v1782_v32 = vsel %vm384_vm6, %v6250_v9, 0.0 }
 0x79c   :  { %v2253_v1 = vrot.slane %v2248_v54, 4  ;;  %v2226_v10 = vsel %vm154_vm5, %v2225_v55, %v2207_v38  ;;  %v6252_v47 = vpop.eup %5360 }
 0x79d   :  { %v2232_v21 = vperm.slane %v2226_v10, %v5638_v52  ;;  %v2249_v17 = vrot.slane %v2244_v58, 4  ;;  %v2255_v59 = vrot.slane %v2236_v57, 4  ;;  %v1785_v16 = vsel %vm384_vm6, %v6252_v47, 0.0  ;;  %v6258_v23 = vpop.eup %5362 }
 0x79e   :  { %v6227_v60 = vsel %vm154_vm5, %v2253_v1, %v2236_v57  ;;  %v1779_v27 = vsel %vm384_vm6, %v6258_v23, 0.0 }
 0x79f   :  { %5237 = vmatpush.xpose.msk.msrb.mxu2 %vm384_vm6, %v6227_v60  ;;  %v6233_v62 = vsel %vm154_vm5, %v2249_v17, %v2232_v21  ;;  %v6236_v63 = vsel %vm154_vm5, %v2248_v54, %v2255_v59  ;;  %v2251_v0 = vrot.slane %v2232_v21, 4 }
 0x7a0   :  { %5233 = vmatpush.xpose.msk.msra.mxu0 %vm384_vm6, %v6233_v62  ;;  %5239 = vmatpush.xpose.msk.msrb.mxu3 %vm384_vm6, %v6236_v63 }
 0x7a1   :  { %v6244_v7 = vsel %vm154_vm5, %v2244_v58, %v2251_v0 }
 0x7a2   :  { %5235 = vmatpush.xpose.msk.msra.mxu1 %vm384_vm6, %v6244_v7 }
 0x7b1   :  { %1783 = vadd.xlane.f32.xlu2 %v1782_v32 }
 0x7b2   :  { %1786 = vadd.xlane.f32.xlu0 %v1785_v16 }
 0x7ba   :  { %1780 = vadd.xlane.f32.xlu0 %v1779_v27 }
 0x7cf   :  { %v1790_v24 = vpop.xlane.xlu1 %1789 }
 0x7d0   :  { %5364 = vrcp.f32 %v1790_v24 }
 0x7d6   :  { %v5365_v50 = vpop.eup %5364 }
 0x7d7   :  { %v1798_v18 = vmul.f32 %v5365_v50, %v6171_v35 }
 0x7d9   :  { %5232 = vmatmul.msk.f32.vlgmr.msra.gmra.mxu3 %vm384_vm6, %v1798_v18 }
 0x7da   :  { %2492 = vmatpush.msra.mxu3 %v6236_v63 }
 0x7e2   :  { %v2022_v19 = vpop.permute.xlu2 %2021 }
 0x7e3   :  { %v2027_v22 = vrot.slane %v2022_v19, 4  ;;  %v2030_v29 = vsel %vm154_vm5, %v2022_v19, %v2029_v26 }
 0x7e4   :  { %v2038_v33 = vperm.slane %v2030_v29, %v5633_v41 }
 0x7e5   :  { %v2028_v31 = vsel %vm154_vm5, %v2027_v22, %v6184_v14 }
 0x7e6   :  { %v2034_v36 = vperm.slane %v2028_v31, %v5633_v41  ;;  %v2065_v28 = vrot.slane %v2038_v33, 4 }
 0x7e8   :  { %v2053_v40 = vrot.slane %v2034_v36, 4 }
 0x7fa   :  { %v2019_v34 = vpop.permute.xlu0 %2018 }
 0x7fb   :  { %v2025_v6 = vpop.permute.xlu1 %2024  ;;  %v2041_v35 = vrot.slane %v2019_v34, 4 }
 0x7fc   :  { %v2039_v30 = vrot.slane %v2025_v6, 4 }
 0x7fd   :  { %v2042_v37 = vsel %vm154_vm5, %v2025_v6, %v2041_v35 }
 0x7fe   :  { %v2040_v38 = vsel %vm154_vm5, %v2039_v30, %v2019_v34  ;;  %v2050_v39 = vperm.slane %v2042_v37, %v5633_v41 }
 0x7ff   :  { %v2046_v44 = vperm.slane %v2040_v38, %v5633_v41 }
 0x800   :  { %v2063_v45 = vrot.slane %v2050_v39, 4  ;;  %v2066_v14 = vsel %vm154_vm5, %v2050_v39, %v2065_v28 }
 0x801   :  { %v2051_v46 = vrot.slane %v2046_v44, 4  ;;  %v2054_v48 = vsel %vm154_vm5, %v2046_v44, %v2053_v40  ;;  %v2074_v49 = vperm.slane %v2066_v14, %v5638_v52 }
 0x802   :  { %v2062_v51 = vperm.slane %v2054_v48, %v5638_v52  ;;  %v2064_v53 = vsel %vm154_vm5, %v2063_v45, %v2038_v33 }
 0x803   :  { %v2052_v54 = vsel %vm154_vm5, %v2051_v46, %v2034_v36  ;;  %v2070_v55 = vperm.slane %v2064_v53, %v5638_v52  ;;  %v2081_v56 = vrot.slane %v2074_v49, 4 }
 0x804   :  { %v2058_v57 = vperm.slane %v2052_v54, %v5638_v52  ;;  %v2077_v58 = vrot.slane %v2062_v51, 4 }
 0x805   :  { %v2079_v1 = vrot.slane %v2070_v55, 4  ;;  %v2082_v10 = vsel %vm154_vm5, 0.0, %v2081_v56  ;;  %v2094_v15 = vsel %vm154_vm5, %v2081_v56, %v2070_v55 }
 0x806   :  { %v2075_v21 = vrot.slane %v2058_v57, 4  ;;  %v2078_v17 = vsel %vm154_vm5, 0.0, %v2077_v58  ;;  %v2083_v59 = vsel %vm154_vm5, %v2077_v58, %v2058_v57  ;;  %v2099_v61 = vrot.slane %v2082_v10, 4 }
 0x807   :  { %v2080_v0 = vsel %vm154_vm5, 0.0, %v2079_v1  ;;  %v2087_v2 = vperm.slane %v2083_v59, %v5633_v41  ;;  %v2088_v3 = vrot.slane %v2078_v17, 4  ;;  %v2098_v4 = vperm.slane %v2094_v15, %v5633_v41 }
 0x808   :  { %v2076_v20 = vsel %vm154_vm5, 0.0, %v2075_v21  ;;  %v2100_v11 = vsel %vm154_vm5, %v2099_v61, %v2080_v0 }
 0x809   :  { %v2089_v32 = vsel %vm154_vm5, %v2088_v3, %v2076_v20  ;;  %v2107_v16 = vrot.slane %v2087_v2, 4  ;;  %v2104_v27 = vperm.slane %v2100_v11, %v5633_v41  ;;  %v2119_v24 = vrot.slane %v2098_v4, 4 }
 0x80a   :  { %v2093_v50 = vperm.slane %v2089_v32, %v5633_v41 }
 0x80b   :  { %v2120_v19 = vsel %vm154_vm5, %v2104_v27, %v2119_v24  ;;  %v2117_v28 = vrot.slane %v2104_v27, 4 }
 0x80c   :  { %v2108_v18 = vsel %vm154_vm5, %v2093_v50, %v2107_v16  ;;  %v2128_v26 = vperm.slane %v2120_v19, %v5638_v52  ;;  %v2105_v36 = vrot.slane %v2093_v50, 4 }
 0x80d   :  { %v2116_v22 = vperm.slane %v2108_v18, %v5638_v52  ;;  %v2118_v44 = vsel %vm154_vm5, %v2117_v28, %v2098_v4 }
 0x80e   :  { %v2106_v6 = vsel %vm154_vm5, %v2105_v36, %v2087_v2  ;;  %v2133_v14 = vrot.slane %v2128_v26, 4 }
 0x80f   :  { %v2135_v29 = vrot.slane %v2116_v22, 4  ;;  %v2112_v40 = vperm.slane %v2106_v6, %v5638_v52 }
 0x810   :  { %v2134_v49 = vsel %vm154_vm5, %v2133_v14, %v2116_v22 }
 0x811   :  { %v2136_v31 = vsel %vm154_vm5, %v2128_v26, %v2135_v29  ;;  %v2131_v45 = vrot.slane %v2112_v40, 4 }
 0x812   :  { %5240 = vmatmul.msk.f32.vlgmr.msrb.gmra.mxu3 %vm384_vm6, %v2136_v31 }
 0x824   :  { %v1784_v33 = vpop.xlane.xlu2 %1783 }
 0x825   :  { %5366 = vrcp.f32 %v1784_v33  ;;  %v1787_v34 = vpop.xlane.xlu0 %1786 }
 0x826   :  { %5368 = vrcp.f32 %v1787_v34 }
 0x82b   :  { %v5367_v35 = vpop.eup %5366 }
 0x82c   :  { %v5369_v30 = vpop.eup %5368  ;;  %v1796_v37 = vmul.f32 %v5367_v35, %v6250_v9  ;;  %v2124_v9 = vperm.slane %v2118_v44, %v5638_v52 }
 0x82d   :  { %v1797_v38 = vmul.f32 %v5369_v30, %v6252_v47  ;;  %v1781_v39 = vpop.xlane.xlu0 %1780 }
 0x82e   :  { %5370 = vrcp.f32 %v1781_v39  ;;  %5230 = vmatmul.msk.f32.vlgmr.msrb.gmra.mxu1 %vm384_vm6, %v1796_v37  ;;  %v2132_v48 = vsel %vm154_vm5, %v2124_v9, %v2131_v45  ;;  %v2129_v51 = vrot.slane %v2124_v9, 4 }
 0x82f   :  { %2446 = vmatpush.msrb.mxu1 %v6244_v7  ;;  %5231 = vmatmul.msk.f32.vlgmr.msra.gmra.mxu2 %vm384_vm6, %v1797_v38 }
 0x830   :  { %2469 = vmatpush.msra.mxu2 %v6227_v60  ;;  %v2130_v53 = vsel %vm154_vm5, %v2129_v51, %v2112_v40 }
 0x834   :  { %v5371_v46 = vpop.eup %5370 }
 0x835   :  { %v1795_v47 = vmul.f32 %v5371_v46, %v6258_v23 }
 0x836   :  { %5236 = vmatmul.msk.f32.vlgmr.msra.gmra.mxu1 %vm384_vm6, %v2132_v48 }
 0x837   :  { %5229 = vmatmul.msk.f32.vlgmr.msrb.gmra.mxu0 %vm384_vm6, %v1795_v47  ;;  %5238 = vmatmul.msk.f32.vlgmr.msrb.gmra.mxu2 %vm384_vm6, %v2134_v49 }
 0x838   :  { %2423 = vmatpush.msrb.mxu0 %v6233_v62 }
 0x83f   :  { %5234 = vmatmul.msk.f32.vlgmr.msra.gmra.mxu0 %vm384_vm6, %v2130_v53 }
 0x85c   :  { %v1888_v54 = vpop.f32.mrf.mxu3 }
 0x85d   :  { %v1903_v57 = vrot.slane %v1888_v54, 4 }
 0x895   :  { %v6320_v55 = vpop.f32.mrf.mxu3 }
 0x896   :  { %v2370_v23 = vsel %vm384_vm6, %v6320_v55, -inf }
 0x897   :  { %2371 = vmax.xlane.f32.xlu2 %v2370_v23 }
 0x8ab   :  { %v1842_v56 = vpop.f32.mrf.mxu1 }
 0x8ac   :  { %v1905_v58 = vrot.slane %v1842_v56, 4  ;;  %v1904_v1 = vsel %vm154_vm5, %v1903_v57, %v1842_v56 }
 0x8ad   :  { %v1910_v15 = vperm.slane %v1904_v1, %v5633_v41 }
 0x8ae   :  { %v1906_v10 = vsel %vm154_vm5, %v1888_v54, %v1905_v58 }
 0x8af   :  { %v1914_v59 = vperm.slane %v1906_v10, %v5633_v41  ;;  %v1915_v3 = vrot.slane %v1910_v15, 4 }
 0x8b1   :  { %v1927_v11 = vrot.slane %v1914_v59, 4 }
 0x8b2   :  { %v1865_v21 = vpop.f32.mrf.mxu2 }
 0x8b3   :  { %v1891_v17 = vrot.slane %v1865_v21, 4 }
 0x8b4   :  { %v1819_v61 = vpop.f32.mrf.mxu0 }
 0x8b5   :  { %v1892_v0 = vsel %vm154_vm5, %v1891_v17, %v1819_v61  ;;  %v1893_v2 = vrot.slane %v1819_v61, 4 }
 0x8b6   :  { %v1898_v4 = vperm.slane %v1892_v0, %v5633_v41 }
 0x8b7   :  { %v1894_v20 = vsel %vm154_vm5, %v1865_v21, %v1893_v2 }
 0x8b8   :  { %v1902_v32 = vperm.slane %v1894_v20, %v5633_v41  ;;  %v1916_v16 = vsel %vm154_vm5, %v1915_v3, %v1898_v4  ;;  %v1917_v27 = vrot.slane %v1898_v4, 4 }
 0x8b9   :  { %v1922_v24 = vperm.slane %v1916_v16, %v5638_v52 }
 0x8ba   :  { %v1918_v50 = vsel %vm154_vm5, %v1910_v15, %v1917_v27  ;;  %v1928_v18 = vsel %vm154_vm5, %v1927_v11, %v1902_v32  ;;  %v1929_v19 = vrot.slane %v1902_v32, 4  ;;  %v6336_v22 = vpop.f32.mrf.mxu2 }
 0x8bb   :  { %v1926_v26 = vperm.slane %v1918_v50, %v5638_v52  ;;  %v1934_v29 = vperm.slane %v1928_v18, %v5638_v52  ;;  %v2367_v31 = vsel %vm384_vm6, %v6336_v22, -inf  ;;  %v1939_v36 = vrot.slane %v1922_v24, 4 }
 0x8bc   :  { %v1930_v33 = vsel %vm154_vm5, %v1914_v59, %v1929_v19  ;;  %2368 = vmax.xlane.f32.xlu1 %v2367_v31  ;;  %v2280_v39 = vpop.f32.mrf.mxu0 }
 0x8bd   :  { %v1938_v34 = vperm.slane %v1930_v33, %v5638_v52  ;;  %v1941_v6 = vrot.slane %v1926_v26, 4  ;;  %v1943_v30 = vrot.slane %v1934_v29, 4  ;;  %v1940_v44 = vsel %vm154_vm5, 0.0, %v1939_v36 }
 0x8be   :  { %v2361_v49 = vsel %vm384_vm6, %v2280_v39, -inf }
 0x8bf   :  { %v1942_v35 = vsel %vm154_vm5, 0.0, %v1941_v6  ;;  %v1945_v37 = vrot.slane %v1938_v34, 4  ;;  %v1947_v28 = vsel %vm154_vm5, %v1941_v6, %v1922_v24  ;;  %v1944_v48 = vsel %vm154_vm5, 0.0, %v1943_v30  ;;  %v2306_v24 = vpop.f32.mrf.mxu1 }
 0x8c0   :  { %v1952_v38 = vrot.slane %v1942_v35, 4  ;;  %v1951_v40 = vperm.slane %v1947_v28, %v5633_v41  ;;  %v2364_v50 = vsel %vm384_vm6, %v2306_v24, -inf }
 0x8c1   :  { %v1946_v45 = vsel %vm154_vm5, 0.0, %v1945_v37  ;;  %v1958_v14 = vsel %vm154_vm5, %v1945_v37, %v1934_v29 }
 0x8c2   :  { %v1963_v9 = vrot.slane %v1946_v45, 4  ;;  %v1953_v46 = vsel %vm154_vm5, %v1952_v38, %v1940_v44  ;;  %v1962_v47 = vperm.slane %v1958_v14, %v5633_v41  ;;  %v1971_v53 = vrot.slane %v1951_v40, 4 }
 0x8c3   :  { %v1957_v51 = vperm.slane %v1953_v46, %v5633_v41 }
 0x8c4   :  { %2362 = vmax.xlane.f32.xlu1 %v2361_v49  ;;  %v1964_v54 = vsel %vm154_vm5, %v1963_v9, %v1944_v48  ;;  %v1983_v23 = vrot.slane %v1962_v47, 4 }
 0x8c5   :  { %v1968_v56 = vperm.slane %v1964_v54, %v5633_v41  ;;  %v1969_v57 = vrot.slane %v1957_v51, 4  ;;  %v1972_v58 = vsel %vm154_vm5, %v1957_v51, %v1971_v53 }
 0x8c6   :  { %v1980_v61 = vperm.slane %v1972_v58, %v5638_v52 }
 0x8c7   :  { %v1984_v1 = vsel %vm154_vm5, %v1968_v56, %v1983_v23  ;;  %v1970_v10 = vsel %vm154_vm5, %v1969_v57, %v1951_v40  ;;  %v1981_v15 = vrot.slane %v1968_v56, 4 }
 0x8c8   :  { %v1992_v21 = vperm.slane %v1984_v1, %v5638_v52  ;;  %v1976_v17 = vperm.slane %v1970_v10, %v5638_v52  ;;  %v1999_v16 = vrot.slane %v1980_v61, 4 }
 0x8c9   :  { %v1982_v59 = vsel %vm154_vm5, %v1981_v15, %v1962_v47 }
 0x8ca   :  { %v1997_v0 = vrot.slane %v1992_v21, 4  ;;  %v1988_v2 = vperm.slane %v1982_v59, %v5638_v52  ;;  %v1995_v3 = vrot.slane %v1976_v17, 4  ;;  %v2000_v27 = vsel %vm154_vm5, %v1992_v21, %v1999_v16  ;;  %v58_v16 = vld [vmem:[%s7320_s8] sm:$0xff] }
 0x8cc   :  { %v1998_v4 = vsel %vm154_vm5, %v1997_v0, %v1980_v61  ;;  %v1993_v20 = vrot.slane %v1988_v2, 4  ;;  %v1996_v11 = vsel %vm154_vm5, %v1988_v2, %v1995_v3 }
 0x8cd   :  { %2006 = vrot.lane.b32.xlu2 %v1998_v4, %s5515_s25  ;;  %2002 = vrot.lane.b32.xlu0 %v1996_v11, %s5516_s26  ;;  %v60_v11 = vld [vmem:[%s7320_s8 + $0x10] sm:$0xff] }
 0x8ce   :  { %v1994_v32 = vsel %vm154_vm5, %v1993_v20, %v1976_v17  ;;  %v61_v20 = vld [vmem:[%s7320_s8 + $0x18] sm:$0xff] }
 0x8cf   :  { %2693 = vmatpush.msra.mxu0 %v61_v20 }
 0x8d1   :  { %2694 = vmatpush.msra.mxu0 %v60_v11 }
 0x8dd   :  { %2010 = vrot.lane.b32.xlu1 %v2000_v27, %s5514_s24 }
 0x8f7   :  { %2365 = vmax.xlane.f32.xlu0 %v2364_v50 }
 0x90a   :  { %v2372_v18 = vpop.xlane.xlu2 %2371 }
 0x90b   :  { %v2376_v19 = vsub.f32 %v6320_v55, %v2372_v18 }
 0x90d   :  { %v2383_v26 = vmul.f32 1.442695, %v2376_v19 }
 0x90f   :  { %5372 = vpow2.f32 %v2383_v26 }
 0x915   :  { %v5373_v29 = vpop.eup %5372 }
 0x916   :  { %v2394_v31 = vsel %vm384_vm6, %v5373_v29, 0.0 }
 0x917   :  { %2395 = vadd.xlane.f32.xlu0 %v2394_v31  ;;  %v6410_v31 = vld [vmem:[%s7318_s6] sm:$0x3] }
 0x927   :  { %v2007_v45 = vpop.permute.xlu2 %2006 }
 0x92f   :  { %v2369_v33 = vpop.xlane.xlu1 %2368 }
 0x930   :  { %v2375_v34 = vsub.f32 %v6336_v22, %v2369_v33 }
 0x932   :  { %v2381_v36 = vmul.f32 1.442695, %v2375_v34 }
 0x934   :  { %5374 = vpow2.f32 %v2381_v36  ;;  %v6415_v36 = vld [vmem:[%s7319_s7] sm:$0x3] }
 0x937   :  { %v2363_v6 = vpop.xlane.xlu1 %2362 }
 0x938   :  { %v2373_v35 = vsub.f32 %v2280_v39, %v2363_v6  ;;  %v2668_v6 = vperm.slane %v6410_v31, 0  ;;  %v6537_v31 = vld [vmem:[%s7314_s2] sm:$0x3] }
 0x93a   :  { %v5375_v30 = vpop.eup %5374  ;;  %v2377_v37 = vmul.f32 1.442695, %v2373_v35 }
 0x93b   :  { %v2391_v28 = vsel %vm384_vm6, %v5375_v30, 0.0 }
 0x93c   :  { %5376 = vpow2.f32 %v2377_v37  ;;  %2392 = vadd.xlane.f32.xlu2 %v2391_v28  ;;  %v2671_v37 = vperm.slane %v6415_v36, 0  ;;  %v2785_v36 = vperm.slane %v6537_v31, 1 }
 0x93f   :  { %v2003_v40 = vpop.permute.xlu0 %2002 }
 0x940   :  { %v2013_v44 = vsel %vm384_vm6, %v1994_v32, %v2003_v40  ;;  %v59_v32 = vld [vmem:[%s7320_s8 + $0x8] sm:$0xff] }
 0x941   :  { %v2014_v22 = vsel %vm748_vm10, %v2013_v44, %v2007_v45  ;;  %2695 = vmatpush.msra.mxu0 %v59_v32  ;;  %v74_v45 = vld [vmem:[%s7322_s10 + $0x38] sm:$0xff] }
 0x942   :  { %v5377_v55 = vpop.eup %5376  ;;  %2721 = vmatpush.msra.mxu1 %v74_v45 }
 0x943   :  { %v2385_v38 = vsel %vm384_vm6, %v5377_v55, 0.0  ;;  %2696 = vmatpush.msra.mxu0 %v58_v16 }
 0x944   :  { %2386 = vadd.xlane.f32.xlu0 %v2385_v38 }
 0x94f   :  { %v2011_v14 = vpop.permute.xlu1 %2010 }
 0x950   :  { %v2015_v9 = vsel %vm750_vm11, %v2014_v22, %v2011_v14  ;;  %v73_v14 = vld [vmem:[%s7322_s10 + $0x30] sm:$0xff] }
 0x951   :  { %v6382_v39 = vadd.f32 %v2015_v9, %v5937_v43  ;;  %v72_v9 = vld [vmem:[%s7322_s10 + $0x28] sm:$0xff]  ;;  %2722 = vmatpush.msra.mxu1 %v73_v14 }
 0x953   :  { %v2624_v46 = vsel %vm84_vm0, %v6382_v39, 0.0  ;;  %2723 = vmatpush.msra.mxu1 %v72_v9 }
 0x954   :  { %2625 = vadd.xlane.f32.xlu1 %v2624_v46 }
 0x96a   :  { %v2366_v47 = vpop.xlane.xlu0 %2365 }
 0x96b   :  { %v2374_v48 = vsub.f32 %v2306_v24, %v2366_v47  ;;  %v71_v47 = vld [vmem:[%s7322_s10 + $0x20] sm:$0xff] }
 0x96c   :  { %2724 = vmatpush.msra.mxu1 %v71_v47 }
 0x96d   :  { %v2379_v49 = vmul.f32 1.442695, %v2374_v48 }
 0x96f   :  { %5378 = vpow2.f32 %v2379_v49 }
 0x975   :  { %v5379_v51 = vpop.eup %5378 }
 0x976   :  { %v2388_v53 = vsel %vm384_vm6, %v5379_v51, 0.0 }
 0x977   :  { %2389 = vadd.xlane.f32.xlu2 %v2388_v53 }
 0x98a   :  { %v2396_v54 = vpop.xlane.xlu0 %2395 }
 0x98b   :  { %5380 = vrcp.f32 %v2396_v54 }
 0x991   :  { %v5381_v23 = vpop.eup %5380 }
 0x992   :  { %v2404_v56 = vmul.f32 %v5381_v23, %v5373_v29 }
 0x994   :  { %5244 = vmatmul.msk.f32.vlgmr.msra.gmra.mxu3 %vm384_vm6, %v2404_v56 }
 0x9af   :  { %v2393_v43 = vpop.xlane.xlu2 %2392 }
 0x9b0   :  { %5382 = vrcp.f32 %v2393_v43 }
 0x9b6   :  { %v5383_v57 = vpop.eup %5382 }
 0x9b7   :  { %v2403_v58 = vmul.f32 %v5383_v57, %v5375_v30  ;;  %v2387_v1 = vpop.xlane.xlu0 %2386 }
 0x9b8   :  { %5384 = vrcp.f32 %v2387_v1 }
 0x9b9   :  { %5243 = vmatmul.msk.f32.vlgmr.msra.gmra.mxu2 %vm384_vm6, %v2403_v58 }
 0x9be   :  { %v5385_v10 = vpop.eup %5384 }
 0x9bf   :  { %v2401_v15 = vmul.f32 %v5385_v10, %v5377_v55 }
 0x9c1   :  { %5241 = vmatmul.msk.f32.vlgmr.msrb.gmra.mxu0 %vm384_vm6, %v2401_v15 }
 0x9c7   :  { %v2626_v21 = vpop.xlane.xlu1 %2625 }
 0x9c8   :  { %v2630_v17 = vmul.f32 %v2626_v21, %v5598_v8 }
 0x9ca   :  { %v2632_v59 = vsub.f32 %v6382_v39, %v2630_v17 }
 0x9cc   :  { %v2634_v61 = vmul.f32 %v2632_v59, %v2632_v59 }
 0x9ce   :  { %v2636_v0 = vsel %vm84_vm0, %v2634_v61, 0.0 }
 0x9cf   :  { %2637 = vadd.xlane.f32.xlu0 %v2636_v0 }
 0x9ea   :  { %v2390_v2 = vpop.xlane.xlu2 %2389 }
 0x9eb   :  { %5386 = vrcp.f32 %v2390_v2 }
 0x9f1   :  { %v5387_v3 = vpop.eup %5386 }
 0x9f2   :  { %v2402_v4 = vmul.f32 %v5387_v3, %v5379_v51  ;;  %v70_v51 = vld [vmem:[%s7322_s10 + $0x18] sm:$0xff] }
 0x9f3   :  { %2725 = vmatpush.msra.mxu1 %v70_v51 }
 0x9f4   :  { %5242 = vmatmul.msk.f32.vlgmr.msrb.gmra.mxu1 %vm384_vm6, %v2402_v4 }
 0xa17   :  { %v2494_v48 = vpop.f32.mrf.mxu3 }
 0xa18   :  { %v2509_v54 = vrot.slane %v2494_v48, 4 }
 0xa3c   :  { %v2471_v38 = vpop.f32.mrf.mxu2 }
 0xa3d   :  { %v2497_v44 = vrot.slane %v2471_v38, 4 }
 0xa3e   :  { %v2425_v40 = vpop.f32.mrf.mxu0 }
 0xa3f   :  { %v2499_v22 = vrot.slane %v2425_v40, 4  ;;  %v2498_v46 = vsel %vm154_vm5, %v2497_v44, %v2425_v40 }
 0xa40   :  { %v2504_v53 = vperm.slane %v2498_v46, %v5633_v41 }
 0xa41   :  { %v2500_v49 = vsel %vm154_vm5, %v2471_v38, %v2499_v22 }
 0xa42   :  { %v2638_v27 = vpop.xlane.xlu0 %2637  ;;  %v2508_v23 = vperm.slane %v2500_v49, %v5633_v41  ;;  %v2523_v58 = vrot.slane %v2504_v53, 4 }
 0xa43   :  { %v2642_v24 = vmul.f32 %v2638_v27, %v5598_v8 }
 0xa44   :  { %v2535_v15 = vrot.slane %v2508_v23, 4 }
 0xa45   :  { %v2644_v50 = vadd.f32 1e-05, %v2642_v24 }
 0xa47   :  { %5388 = vrsqrt.f32 %v2644_v50  ;;  %vm2652_vm4 = vweird.f32 %v2644_v50 }
 0xa4d   :  { %v5389_v18 = vpop.eup %5388 }
 0xa4e   :  { %v2647_v19 = vmul.f32 %v5389_v18, %v2644_v50  ;;  %vm2653_vm3 = vweird.f32 %v5389_v18 }
 0xa4f   :  { %vm2654_vm7 = vmor %vm2652_vm4, %vm2653_vm3 }
 0xa50   :  { %v2648_v26 = vmul.f32 %v5389_v18, %v2647_v19 }
 0xa52   :  { %v2649_v29 = vmul.f32 0.5, %v2648_v26 }
 0xa54   :  { %v2650_v33 = vsub.f32 1.5, %v2649_v29 }
 0xa56   :  { %v2651_v34 = vmul.f32 %v5389_v18, %v2650_v33 }
 0xa58   :  { %v2655_v35 = vsel %vm2654_vm7, %v5389_v18, %v2651_v34 }
 0xa59   :  { %v2666_v30 = vmul.f32 %v2655_v35, %v2632_v59 }
 0xa5b   :  { %v2669_v28 = vmul.f32 %v2668_v6, %v2666_v30 }
 0xa5d   :  { %v2672_v55 = vadd.f32 %v2671_v37, %v2669_v28 }
 0xa5f   :  { %5245 = vmatmul.msk.f32.vlgmr.msra.gmra.mxu0 %vm84_vm0, %v2672_v55 }
 0xa71   :  { %v2448_v56 = vpop.f32.mrf.mxu1 }
 0xa72   :  { %v2510_v43 = vsel %vm154_vm5, %v2509_v54, %v2448_v56  ;;  %v2511_v57 = vrot.slane %v2448_v56, 4 }
 0xa73   :  { %v2516_v1 = vperm.slane %v2510_v43, %v5633_v41 }
 0xa74   :  { %v2512_v10 = vsel %vm154_vm5, %v2494_v48, %v2511_v57 }
 0xa75   :  { %v2520_v21 = vperm.slane %v2512_v10, %v5633_v41  ;;  %v2521_v17 = vrot.slane %v2516_v1, 4  ;;  %v2524_v59 = vsel %vm154_vm5, %v2516_v1, %v2523_v58 }
 0xa76   :  { %v2532_v61 = vperm.slane %v2524_v59, %v5638_v52  ;;  %v69_v59 = vld [vmem:[%s7322_s10 + $0x10] sm:$0xff] }
 0xa77   :  { %v2522_v0 = vsel %vm154_vm5, %v2521_v17, %v2504_v53  ;;  %v2533_v2 = vrot.slane %v2520_v21, 4  ;;  %v2536_v3 = vsel %vm154_vm5, %v2520_v21, %v2535_v15  ;;  %2726 = vmatpush.msra.mxu1 %v69_v59 }
 0xa78   :  { %v2528_v4 = vperm.slane %v2522_v0, %v5638_v52  ;;  %v2544_v20 = vperm.slane %v2536_v3, %v5638_v52  ;;  %v2547_v11 = vrot.slane %v2532_v61, 4  ;;  %v68_v61 = vld [vmem:[%s7322_s10 + $0x8] sm:$0xff]  ;;  %v67_v0 = vld [vmem:[%s7322_s10] sm:$0xff] }
 0xa79   :  { %v2534_v32 = vsel %vm154_vm5, %v2533_v2, %v2508_v23  ;;  %2727 = vmatpush.msra.mxu1 %v68_v61  ;;  %v6494_v2 = vld [vmem:[%s7321_s9] sm:$0x3] }
 0xa7a   :  { %v2540_v16 = vperm.slane %v2534_v32, %v5638_v52  ;;  %v2545_v27 = vrot.slane %v2528_v4, 4  ;;  %v2548_v24 = vsel %vm154_vm5, 0.0, %v2547_v11  ;;  %v2551_v50 = vrot.slane %v2544_v20, 4 }
 0xa7b   :  { %v2553_v18 = vsel %vm154_vm5, %v2547_v11, %v2528_v4  ;;  %v2558_v19 = vrot.slane %v2548_v24, 4  ;;  %2728 = vmatpush.msra.mxu1 %v67_v0  ;;  %v2674_v3 = vperm.slane %v6494_v2, 0 }
 0xa7c   :  { %v2546_v26 = vsel %vm154_vm5, 0.0, %v2545_v27  ;;  %v2549_v29 = vrot.slane %v2540_v16, 4  ;;  %v2552_v33 = vsel %vm154_vm5, 0.0, %v2551_v50  ;;  %v2557_v34 = vperm.slane %v2553_v18, %v5633_v41 }
 0xa7d   :  { %v2569_v35 = vrot.slane %v2552_v33, 4  ;;  %v2559_v30 = vsel %vm154_vm5, %v2558_v19, %v2546_v26  ;;  %v2564_v28 = vsel %vm154_vm5, %v2551_v50, %v2540_v16 }
 0xa7e   :  { %v2550_v55 = vsel %vm154_vm5, 0.0, %v2549_v29  ;;  %v2563_v38 = vperm.slane %v2559_v30, %v5633_v41  ;;  %v2568_v40 = vperm.slane %v2564_v28, %v5633_v41  ;;  %v2577_v44 = vrot.slane %v2557_v34, 4  ;;  %v6511_v29 = vld [vmem:[%s7323_s11] sm:$0x3] }
 0xa7f   :  { %v2570_v45 = vsel %vm154_vm5, %v2569_v35, %v2550_v55  ;;  %v2738_v33 = vperm.slane %v6511_v29, 0 }
 0xa80   :  { %v2574_v14 = vperm.slane %v2570_v45, %v5633_v41  ;;  %v2578_v22 = vsel %vm154_vm5, %v2563_v38, %v2577_v44  ;;  %v2589_v9 = vrot.slane %v2568_v40, 4  ;;  %v2575_v46 = vrot.slane %v2563_v38, 4 }
 0xa81   :  { %v2586_v47 = vperm.slane %v2578_v22, %v5638_v52 }
 0xa82   :  { %v2590_v48 = vsel %vm154_vm5, %v2574_v14, %v2589_v9  ;;  %v2576_v49 = vsel %vm154_vm5, %v2575_v46, %v2557_v34  ;;  %v2587_v51 = vrot.slane %v2574_v14, 4 }
 0xa83   :  { %v2598_v53 = vperm.slane %v2590_v48, %v5638_v52  ;;  %v2605_v54 = vrot.slane %v2586_v47, 4  ;;  %v2582_v23 = vperm.slane %v2576_v49, %v5638_v52 }
 0xa84   :  { %v2588_v56 = vsel %vm154_vm5, %v2587_v51, %v2568_v40 }
 0xa85   :  { %v2606_v43 = vsel %vm154_vm5, %v2598_v53, %v2605_v54  ;;  %v2594_v57 = vperm.slane %v2588_v56, %v5638_v52  ;;  %v2601_v58 = vrot.slane %v2582_v23, 4  ;;  %v2603_v1 = vrot.slane %v2598_v53, 4 }
 0xa86   :  { %2616 = vrot.lane.b32.xlu0 %v2606_v43, %s5514_s24 }
 0xa87   :  { %v2599_v10 = vrot.slane %v2594_v57, 4  ;;  %v2602_v15 = vsel %vm154_vm5, %v2594_v57, %v2601_v58  ;;  %v2604_v21 = vsel %vm154_vm5, %v2603_v1, %v2586_v47 }
 0xa88   :  { %2608 = vrot.lane.b32.xlu2 %v2602_v15, %s5516_s26  ;;  %2612 = vrot.lane.b32.xlu1 %v2604_v21, %s5515_s25 }
 0xa89   :  { %v2600_v17 = vsel %vm154_vm5, %v2599_v10, %v2582_v23 }
 0xadc   :  { %v2698_v4 = vpop.f32.mrf.mxu0 }
 0xadd   :  { %v2699_v20 = vadd.f32 %v2698_v4, %v2674_v3 }
 0xadf   :  { %v2704_v11 = vmax.f32 %v2699_v20, 0.0 }
 0xae1   :  { %5247 = vmatmul.msk.f32.vlgmr.msra.gmra.mxu1 %vm2706_vm8, %v2704_v11 }
 0xae2   :  { %v2609_v32 = vpop.permute.xlu2 %2608 }
 0xae3   :  { %v2619_v16 = vsel %vm384_vm6, %v2600_v17, %v2609_v32 }
 0xaf8   :  { %v2617_v24 = vpop.permute.xlu0 %2616 }
 0xafa   :  { %v2613_v27 = vpop.permute.xlu1 %2612 }
 0xafb   :  { %v2620_v50 = vsel %vm748_vm10, %v2619_v16, %v2613_v27 }
 0xafc   :  { %v2621_v18 = vsel %vm750_vm11, %v2620_v50, %v2617_v24 }
 0xafd   :  { %v6504_v19 = vadd.f32 %v2621_v18, %v6149_v5 }
 0xaff   :  { %v2627_v26 = vsel %vm84_vm0, %v6504_v19, 0.0 }
 0xb00   :  { %2628 = vadd.xlane.f32.xlu2 %v2627_v26 }
 0xb5e   :  { %v2730_v34 = vpop.f32.mrf.mxu1 }
 0xb5f   :  { %v2736_v35 = vadd.f32 %v2730_v34, %v6382_v39 }
 0xb61   :  { %v6517_v30 = vadd.f32 %v2738_v33, %v2736_v35 }
 0xb63   :  { %v2741_v5 = vsel %vm84_vm0, %v6517_v30, 0.0 }
 0xb64   :  { %2742 = vadd.xlane.f32.xlu1 %v2741_v5 }
 0xb73   :  { %v2629_v28 = vpop.xlane.xlu2 %2628 }
 0xb74   :  { %v2631_v55 = vmul.f32 %v2629_v28, %v5598_v8 }
 0xb76   :  { %v2633_v38 = vsub.f32 %v6504_v19, %v2631_v55 }
 0xb78   :  { %v2635_v40 = vmul.f32 %v2633_v38, %v2633_v38 }
 0xb7a   :  { %v2639_v44 = vsel %vm84_vm0, %v2635_v40, 0.0 }
 0xb7b   :  { %2640 = vadd.xlane.f32.xlu0 %v2639_v44 }
 0xbd7   :  { %v2743_v45 = vpop.xlane.xlu1 %2742 }
 0xbd8   :  { %v2747_v39 = vmul.f32 %v2743_v45, %v5598_v8 }
 0xbda   :  { %v2749_v14 = vsub.f32 %v6517_v30, %v2747_v39 }
 0xbdc   :  { %v2751_v22 = vmul.f32 %v2749_v14, %v2749_v14 }
 0xbde   :  { %v2753_v9 = vsel %vm84_vm0, %v2751_v22, 0.0 }
 0xbdf   :  { %2754 = vadd.xlane.f32.xlu2 %v2753_v9 }
 0xbee   :  { %v2641_v46 = vpop.xlane.xlu0 %2640 }
 0xbef   :  { %v2643_v47 = vmul.f32 %v2641_v46, %v5598_v8 }
 0xbf1   :  { %v2645_v48 = vadd.f32 1e-05, %v2643_v47 }
 0xbf3   :  { %5390 = vrsqrt.f32 %v2645_v48  ;;  %vm2662_vm12 = vweird.f32 %v2645_v48 }
 0xbf9   :  { %v5391_v49 = vpop.eup %5390 }
 0xbfa   :  { %v2657_v51 = vmul.f32 %v5391_v49, %v2645_v48  ;;  %vm2663_vm9 = vweird.f32 %v5391_v49 }
 0xbfb   :  { %vm2664_vm13 = vmor %vm2662_vm12, %vm2663_vm9 }
 0xbfc   :  { %v2658_v53 = vmul.f32 %v5391_v49, %v2657_v51 }
 0xbfe   :  { %v2659_v54 = vmul.f32 0.5, %v2658_v53 }
 0xc00   :  { %v2660_v23 = vsub.f32 1.5, %v2659_v54 }
 0xc02   :  { %v2661_v56 = vmul.f32 %v5391_v49, %v2660_v23 }
 0xc04   :  { %v2665_v43 = vsel %vm2664_vm13, %v5391_v49, %v2661_v56 }
 0xc05   :  { %v2667_v57 = vmul.f32 %v2665_v43, %v2633_v38 }
 0xc07   :  { %v2670_v58 = vmul.f32 %v2668_v6, %v2667_v57 }
 0xc09   :  { %v2673_v1 = vadd.f32 %v2671_v37, %v2670_v58  ;;  %v6543_v37 = vld [vmem:[%s7315_s3] sm:$0x3] }
 0xc0a   :  { %v2788_v11 = vperm.slane %v6543_v37, 1 }
 0xc0b   :  { %5246 = vmatmul.msk.f32.gmra.mxu0 %vm84_vm0, %v2673_v1 }
 0xc52   :  { %v2755_v10 = vpop.xlane.xlu2 %2754 }
 0xc53   :  { %v2759_v15 = vmul.f32 %v2755_v10, %v5598_v8 }
 0xc55   :  { %v2761_v21 = vadd.f32 1e-05, %v2759_v15 }
 0xc57   :  { %5392 = vrsqrt.f32 %v2761_v21  ;;  %vm2769_vm15 = vweird.f32 %v2761_v21 }
 0xc5d   :  { %v5393_v17 = vpop.eup %5392 }
 0xc5e   :  { %v2764_v59 = vmul.f32 %v5393_v17, %v2761_v21  ;;  %vm2770_vm14 = vweird.f32 %v5393_v17 }
 0xc5f   :  { %vm2771_vm1 = vmor %vm2769_vm15, %vm2770_vm14 }
 0xc60   :  { %v2765_v61 = vmul.f32 %v5393_v17, %v2764_v59 }
 0xc62   :  { %v2766_v0 = vmul.f32 0.5, %v2765_v61 }
 0xc64   :  { %v2767_v4 = vsub.f32 1.5, %v2766_v0 }
 0xc66   :  { %v2768_v20 = vmul.f32 %v5393_v17, %v2767_v4 }
 0xc68   :  { %v2772_v6 = vsel %vm2771_vm1, %v5393_v17, %v2768_v20 }
 0xc69   :  { %v2783_v32 = vmul.f32 %v2772_v6, %v2749_v14 }
 0xc6b   :  { %v2786_v16 = vmul.f32 %v2785_v36, %v2783_v32 }
 0xc6d   :  { %v2789_v27 = vadd.f32 %v2788_v11, %v2786_v16 }
 0xc6f   :  { %2919 = vrot.lane.b32.xlu2 %v2789_v27, %s5509_s19  ;;  %2916 = vrot.lane.b32.xlu1 %v2789_v27, %s5511_s21  ;;  %v2791_v24 = vmul.f32 0.35355338, %v2789_v27  ;;  %v2924_v35 = vrot.slane %v2789_v27, 4 }
 0xc70   :  { %2913 = vrot.lane.b32.xlu0 %v2789_v27, %s5510_s20 }
 0xc71   :  { %v2804_v57 = vrot.slane %v2791_v24, 4 }
 0xc77   :  { %2796 = vrot.lane.b32.xlu1 %v2791_v24, %s5511_s21 }
 0xc78   :  { %2793 = vrot.lane.b32.xlu0 %v2791_v24, %s5510_s20 }
 0xc80   :  { %2799 = vrot.lane.b32.xlu0 %v2791_v24, %s5509_s19 }
 0xc88   :  { %v2701_v50 = vpop.f32.mrf.mxu0 }
 0xc89   :  { %v2702_v18 = vadd.f32 %v2701_v50, %v2674_v3 }
 0xc8b   :  { %v2705_v26 = vmax.f32 %v2702_v18, 0.0 }
 0xc8d   :  { %5248 = vmatmul.msk.f32.gmra.mxu1 %vm2706_vm8, %v2705_v26 }
 0xcc9   :  { %v2920_v34 = vpop.permute.xlu2 %2919 }
 0xcca   :  { %v2934_v5 = vrot.slane %v2920_v34, 4 }
 0xce1   :  { %v2917_v28 = vpop.permute.xlu1 %2916 }
 0xce2   :  { %v2922_v55 = vrot.slane %v2917_v28, 4  ;;  %v2925_v38 = vsel %vm154_vm5, %v2917_v28, %v2924_v35  ;;  %v2914_v40 = vpop.permute.xlu0 %2913 }
 0xce3   :  { %v2933_v44 = vperm.slane %v2925_v38, %v5633_v41  ;;  %v2935_v45 = vsel %vm154_vm5, %v2934_v5, %v2914_v40  ;;  %v2936_v39 = vrot.slane %v2914_v40, 4 }
 0xce4   :  { %v2923_v14 = vsel %vm154_vm5, %v2922_v55, %v2789_v27  ;;  %v2941_v2 = vperm.slane %v2935_v45, %v5633_v41 }
 0xce5   :  { %v2929_v3 = vperm.slane %v2923_v14, %v5633_v41  ;;  %v2960_v22 = vrot.slane %v2933_v44, 4  ;;  %v2937_v9 = vsel %vm154_vm5, %v2920_v34, %v2936_v39 }
 0xce6   :  { %v2945_v46 = vperm.slane %v2937_v9, %v5633_v41  ;;  %v2946_v47 = vrot.slane %v2941_v2, 4 }
 0xce7   :  { %v2948_v48 = vrot.slane %v2929_v3, 4 }
 0xce8   :  { %v2947_v49 = vsel %vm154_vm5, %v2946_v47, %v2929_v3  ;;  %v2958_v51 = vrot.slane %v2945_v46, 4  ;;  %v2961_v53 = vsel %vm154_vm5, %v2945_v46, %v2960_v22 }
 0xce9   :  { %v2949_v54 = vsel %vm154_vm5, %v2941_v2, %v2948_v48  ;;  %v2953_v23 = vperm.slane %v2947_v49, %v5638_v52  ;;  %v2969_v56 = vperm.slane %v2961_v53, %v5638_v52  ;;  %v2797_v43 = vpop.permute.xlu1 %2796 }
 0xcea   :  { %v2957_v58 = vperm.slane %v2949_v54, %v5638_v52  ;;  %v2959_v1 = vsel %vm154_vm5, %v2958_v51, %v2933_v44  ;;  %v2802_v10 = vrot.slane %v2797_v43, 4  ;;  %v2794_v15 = vpop.permute.xlu0 %2793  ;;  %v2805_v59 = vsel %vm154_vm5, %v2797_v43, %v2804_v57 }
 0xceb   :  { %v2965_v21 = vperm.slane %v2959_v1, %v5638_v52  ;;  %v2976_v17 = vrot.slane %v2969_v56, 4  ;;  %v2970_v61 = vrot.slane %v2953_v23, 4  ;;  %v2813_v18 = vperm.slane %v2805_v59, %v5633_v41 }
 0xcec   :  { %v2972_v0 = vrot.slane %v2957_v58, 4  ;;  %v2803_v4 = vsel %vm154_vm5, %v2802_v10, %v2791_v24  ;;  %v2816_v40 = vrot.slane %v2794_v15, 4 }
 0xced   :  { %v2974_v20 = vrot.slane %v2965_v21, 4  ;;  %v2977_v6 = vsel %vm154_vm5, 0.0, %v2976_v17  ;;  %v2989_v32 = vsel %vm154_vm5, %v2976_v17, %v2965_v21  ;;  %v2809_v5 = vperm.slane %v2803_v4, %v5633_v41 }
 0xcee   :  { %v2973_v16 = vsel %vm154_vm5, 0.0, %v2972_v0  ;;  %v2978_v27 = vsel %vm154_vm5, %v2972_v0, %v2953_v23  ;;  %v2994_v50 = vrot.slane %v2977_v6, 4  ;;  %v2971_v24 = vsel %vm154_vm5, 0.0, %v2970_v61 }
 0xcef   :  { %v2975_v26 = vsel %vm154_vm5, 0.0, %v2974_v20  ;;  %v2982_v34 = vperm.slane %v2978_v27, %v5633_v41  ;;  %v2983_v35 = vrot.slane %v2973_v16, 4  ;;  %v2993_v55 = vperm.slane %v2989_v32, %v5633_v41 }
 0xcf0   :  { %v2995_v28 = vsel %vm154_vm5, %v2994_v50, %v2975_v26  ;;  %v2840_v14 = vrot.slane %v2813_v18, 4  ;;  %v2828_v22 = vrot.slane %v2809_v5, 4 }
 0xcf1   :  { %v2984_v38 = vsel %vm154_vm5, %v2983_v35, %v2971_v24  ;;  %v2999_v44 = vperm.slane %v2995_v28, %v5633_v41  ;;  %v3002_v45 = vrot.slane %v2982_v34, 4  ;;  %v3014_v3 = vrot.slane %v2993_v55, 4 }
 0xcf2   :  { %v2988_v39 = vperm.slane %v2984_v38, %v5633_v41  ;;  %v2800_v2 = vpop.permute.xlu0 %2799 }
 0xcf3   :  { %v2814_v9 = vrot.slane %v2800_v2, 4  ;;  %v2817_v46 = vsel %vm154_vm5, %v2800_v2, %v2816_v40  ;;  %v3012_v47 = vrot.slane %v2999_v44, 4  ;;  %v3015_v53 = vsel %vm154_vm5, %v2999_v44, %v3014_v3 }
 0xcf4   :  { %v2825_v48 = vperm.slane %v2817_v46, %v5633_v41  ;;  %v3000_v49 = vrot.slane %v2988_v39, 4  ;;  %v3003_v51 = vsel %vm154_vm5, %v2988_v39, %v3002_v45  ;;  %v3023_v43 = vperm.slane %v3015_v53, %v5638_v52 }
 0xcf5   :  { %v2815_v54 = vsel %vm154_vm5, %v2814_v9, %v2794_v15  ;;  %v3013_v23 = vsel %vm154_vm5, %v3012_v47, %v2993_v55  ;;  %v3011_v56 = vperm.slane %v3003_v51, %v5638_v52 }
 0xcf6   :  { %v2821_v57 = vperm.slane %v2815_v54, %v5633_v41  ;;  %v2838_v58 = vrot.slane %v2825_v48, 4  ;;  %v2841_v1 = vsel %vm154_vm5, %v2825_v48, %v2840_v14  ;;  %v3001_v10 = vsel %vm154_vm5, %v3000_v49, %v2982_v34 }
 0xcf7   :  { %v2849_v21 = vperm.slane %v2841_v1, %v5638_v52  ;;  %v3007_v17 = vperm.slane %v3001_v10, %v5638_v52  ;;  %v3019_v59 = vperm.slane %v3013_v23, %v5638_v52  ;;  %v3028_v15 = vrot.slane %v3023_v43, 4 }
 0xcf8   :  { %v2826_v61 = vrot.slane %v2821_v57, 4  ;;  %v2829_v0 = vsel %vm154_vm5, %v2821_v57, %v2828_v22  ;;  %v2839_v4 = vsel %vm154_vm5, %v2838_v58, %v2813_v18  ;;  %v3030_v20 = vrot.slane %v3011_v56, 4 }
 0xcf9   :  { %v2837_v6 = vperm.slane %v2829_v0, %v5638_v52  ;;  %v2845_v32 = vperm.slane %v2839_v4, %v5638_v52  ;;  %v2856_v16 = vrot.slane %v2849_v21, 4  ;;  %v3024_v27 = vrot.slane %v3019_v59, 4 }
 0xcfa   :  { %v2827_v50 = vsel %vm154_vm5, %v2826_v61, %v2809_v5  ;;  %v3029_v26 = vsel %vm154_vm5, %v3028_v15, %v3011_v56  ;;  %v3031_v34 = vsel %vm154_vm5, %v3023_v43, %v3030_v20  ;;  %v3026_v35 = vrot.slane %v3007_v17, 4 }
 0xcfb   :  { %v2833_v24 = vperm.slane %v2827_v50, %v5638_v52  ;;  %v2852_v28 = vrot.slane %v2837_v6, 4  ;;  %v2854_v55 = vrot.slane %v2845_v32, 4  ;;  %v2857_v18 = vsel %vm154_vm5, 0.0, %v2856_v16 }
 0xcfc   :  { %v2869_v38 = vsel %vm154_vm5, %v2856_v16, %v2845_v32  ;;  %v2874_v40 = vrot.slane %v2857_v18, 4  ;;  %v3025_v44 = vsel %vm154_vm5, %v3024_v27, %v3007_v17  ;;  %v3027_v45 = vsel %vm154_vm5, %v3019_v59, %v3026_v35 }
 0xcfd   :  { %v2850_v39 = vrot.slane %v2833_v24, 4  ;;  %v2853_v5 = vsel %vm154_vm5, 0.0, %v2852_v28  ;;  %v2855_v14 = vsel %vm154_vm5, 0.0, %v2854_v55  ;;  %v2873_v2 = vperm.slane %v2869_v38, %v5633_v41  ;;  %5249 = vmatpush.xpose.msk.msrb.mxu2 %vm384_vm6, %v3025_v44  ;;  %3198 = vmatpush.msrb.mxu0 %v3025_v44 }
 0xcfe   :  { %v2863_v3 = vrot.slane %v2853_v5, 4  ;;  %v2875_v22 = vsel %vm154_vm5, %v2874_v40, %v2855_v14  ;;  %v2858_v9 = vsel %vm154_vm5, %v2852_v28, %v2833_v24  ;;  %5251 = vmatpush.xpose.msk.msrb.mxu3 %vm384_vm6, %v3027_v45 }
 0xcff   :  { %3267 = vmatpush.msra.mxu0 %v3031_v34  ;;  %v2851_v46 = vsel %vm154_vm5, 0.0, %v2850_v39  ;;  %v2879_v47 = vperm.slane %v2875_v22, %v5633_v41  ;;  %v2862_v48 = vperm.slane %v2858_v9, %v5633_v41  ;;  %v2894_v51 = vrot.slane %v2873_v2, 4 }
 0xd00   :  { %v2864_v49 = vsel %vm154_vm5, %v2863_v3, %v2851_v46 }
 0xd01   :  { %5253 = vmatpush.xpose.msk.msra.mxu2 %vm384_vm6, %v3029_v26  ;;  %v2868_v53 = vperm.slane %v2864_v49, %v5633_v41  ;;  %v2892_v54 = vrot.slane %v2879_v47, 4  ;;  %v2882_v43 = vrot.slane %v2862_v48, 4  ;;  %v2895_v1 = vsel %vm154_vm5, %v2879_v47, %v2894_v51 }
 0xd02   :  { %5255 = vmatpush.xpose.msk.msra.mxu3 %vm384_vm6, %v3031_v34  ;;  %v2903_v61 = vperm.slane %v2895_v1, %v5638_v52 }
 0xd03   :  { %v2880_v23 = vrot.slane %v2868_v53, 4  ;;  %v2893_v56 = vsel %vm154_vm5, %v2892_v54, %v2873_v2  ;;  %v2883_v17 = vsel %vm154_vm5, %v2868_v53, %v2882_v43 }
 0xd04   :  { %v2899_v57 = vperm.slane %v2893_v56, %v5638_v52  ;;  %v2891_v20 = vperm.slane %v2883_v17, %v5638_v52  ;;  %v2908_v32 = vrot.slane %v2903_v61, 4 }
 0xd05   :  { %v2881_v58 = vsel %vm154_vm5, %v2880_v23, %v2862_v48 }
 0xd06   :  { %v2887_v10 = vperm.slane %v2881_v58, %v5638_v52  ;;  %v2904_v21 = vrot.slane %v2899_v57, 4  ;;  %v2910_v27 = vrot.slane %v2891_v20, 4  ;;  %v2909_v34 = vsel %vm154_vm5, %v2908_v32, %v2891_v20 }
 0xd08   :  { %v2905_v59 = vsel %vm154_vm5, %v2904_v21, %v2887_v10  ;;  %v2906_v15 = vrot.slane %v2887_v10, 4  ;;  %v2911_v35 = vsel %vm154_vm5, %v2903_v61, %v2910_v27 }
 0xd09   :  { %5250 = vmatmul.msk.f32.vlgmr.msrb.gmra.mxu2 %vm384_vm6, %v2905_v59 }
 0xd0a   :  { %3221 = vmatpush.msrb.mxu2 %v3027_v45  ;;  %v2733_v0 = vpop.f32.mrf.mxu1  ;;  %v2907_v4 = vsel %vm154_vm5, %v2899_v57, %v2906_v15 }
 0xd0b   :  { %v2737_v6 = vadd.f32 %v2733_v0, %v6504_v19  ;;  %5252 = vmatmul.msk.f32.vlgmr.msrb.gmra.mxu3 %vm384_vm6, %v2907_v4 }
 0xd0c   :  { %3244 = vmatpush.msrb.mxu3 %v3029_v26 }
 0xd0d   :  { %v6646_v16 = vadd.f32 %v2738_v33, %v2737_v6 }
 0xd0f   :  { %v2744_v50 = vsel %vm84_vm0, %v6646_v16, 0.0 }
 0xd10   :  { %2745 = vadd.xlane.f32.xlu2 %v2744_v50 }
 0xd11   :  { %5254 = vmatmul.msk.f32.vlgmr.msra.gmra.mxu2 %vm384_vm6, %v2909_v34 }
 0xd13   :  { %5256 = vmatmul.msk.f32.vlgmr.msra.gmra.mxu3 %vm384_vm6, %v2911_v35 }
 0xd83   :  { %v2746_v19 = vpop.xlane.xlu2 %2745 }
 0xd84   :  { %v2748_v26 = vmul.f32 %v2746_v19, %v5598_v8 }
 0xd86   :  { %v2750_v29 = vsub.f32 %v6646_v16, %v2748_v26 }
 0xd88   :  { %v2752_v33 = vmul.f32 %v2750_v29, %v2750_v29 }
 0xd8a   :  { %v2756_v24 = vsel %vm84_vm0, %v2752_v33, 0.0 }
 0xd8b   :  { %2757 = vadd.xlane.f32.xlu1 %v2756_v24 }
 0xd8c   :  { %v3055_v28 = vpop.f32.mrf.mxu2 }
 0xd8d   :  { %v3136_v55 = vsel %vm384_vm6, %v3055_v28, -inf }
 0xd8e   :  { %v3081_v18 = vpop.f32.mrf.mxu3  ;;  %3137 = vmax.xlane.f32.xlu0 %v3136_v55 }
 0xd8f   :  { %v3139_v38 = vsel %vm384_vm6, %v3081_v18, -inf }
 0xd93   :  { %3140 = vmax.xlane.f32.xlu1 %v3139_v38 }
 0xd94   :  { %v3107_v40 = vpop.f32.mrf.mxu2 }
 0xd95   :  { %v3142_v44 = vsel %vm384_vm6, %v3107_v40, -inf }
 0xd96   :  { %v3133_v45 = vpop.f32.mrf.mxu3  ;;  %3143 = vmax.xlane.f32.xlu2 %v3142_v44 }
 0xd97   :  { %v3145_v39 = vsel %vm384_vm6, %v3133_v45, -inf }
 0xd98   :  { %3146 = vmax.xlane.f32.xlu0 %v3145_v39 }
 0xdfe   :  { %v2758_v5 = vpop.xlane.xlu1 %2757 }
 0xdff   :  { %v2760_v14 = vmul.f32 %v2758_v5, %v5598_v8 }
 0xe01   :  { %v2762_v2 = vadd.f32 1e-05, %v2760_v14  ;;  %v3138_v31 = vpop.xlane.xlu0 %3137 }
 0xe03   :  { %5394 = vrsqrt.f32 %v2762_v2  ;;  %vm2779_vm3 = vweird.f32 %v2762_v2 }
 0xe09   :  { %v5395_v3 = vpop.eup %5394  ;;  %v3144_v37 = vpop.xlane.xlu2 %3143 }
 0xe0a   :  { %v2774_v22 = vmul.f32 %v5395_v3, %v2762_v2  ;;  %vm2780_vm2 = vweird.f32 %v5395_v3  ;;  %v3150_v43 = vsub.f32 %v3107_v40, %v3144_v37 }
 0xe0b   :  { %vm2781_vm4 = vmor %vm2779_vm3, %vm2780_vm2  ;;  %v3147_v10 = vpop.xlane.xlu0 %3146 }
 0xe0c   :  { %v2775_v9 = vmul.f32 %v5395_v3, %v2774_v22  ;;  %v3156_v1 = vmul.f32 1.442695, %v3150_v43  ;;  %v3151_v21 = vsub.f32 %v3133_v45, %v3147_v10 }
 0xe0e   :  { %v2776_v46 = vmul.f32 0.5, %v2775_v9  ;;  %v3158_v17 = vmul.f32 1.442695, %v3151_v21 }
 0xe10   :  { %v2777_v47 = vsub.f32 1.5, %v2776_v46 }
 0xe12   :  { %v2778_v48 = vmul.f32 %v5395_v3, %v2777_v47 }
 0xe14   :  { %v2782_v49 = vsel %vm2781_vm4, %v5395_v3, %v2778_v48 }
 0xe15   :  { %v2784_v51 = vmul.f32 %v2782_v49, %v2750_v29 }
 0xe17   :  { %v2787_v53 = vmul.f32 %v2785_v36, %v2784_v51  ;;  %v3141_v36 = vpop.xlane.xlu1 %3140 }
 0xe18   :  { %v3149_v56 = vsub.f32 %v3081_v18, %v3141_v36 }
 0xe19   :  { %v2790_v54 = vadd.f32 %v2788_v11, %v2787_v53  ;;  %v3148_v11 = vsub.f32 %v3055_v28, %v3138_v31 }
 0xe1a   :  { %v3154_v58 = vmul.f32 1.442695, %v3149_v56 }
 0xe1b   :  { %3522 = vrot.lane.b32.xlu1 %v2790_v54, %s5511_s21  ;;  %3525 = vrot.lane.b32.xlu0 %v2790_v54, %s5509_s19  ;;  %v6669_v23 = vmul.f32 0.35355338, %v2790_v54  ;;  %v3152_v57 = vmul.f32 1.442695, %v3148_v11  ;;  %v3530_v34 = vrot.slane %v2790_v54, 4 }
 0xe1c   :  { %3519 = vrot.lane.b32.xlu2 %v2790_v54, %s5510_s20 }
 0xe1d   :  { %5396 = vpow2.f32 %v3152_v57  ;;  %v3410_v53 = vrot.slane %v6669_v23, 4 }
 0xe1e   :  { %5398 = vpow2.f32 %v3154_v58 }
 0xe1f   :  { %5400 = vpow2.f32 %v3156_v1 }
 0xe20   :  { %5402 = vpow2.f32 %v3158_v17 }
 0xe23   :  { %3405 = vrot.lane.b32.xlu1 %v6669_v23, %s5509_s19  ;;  %3402 = vrot.lane.b32.xlu0 %v6669_v23, %s5511_s21  ;;  %v6677_v59 = vpop.eup %5396 }
 0xe24   :  { %3399 = vrot.lane.b32.xlu2 %v6669_v23, %s5510_s20  ;;  %v6679_v15 = vpop.eup %5398  ;;  %v3160_v0 = vsel %vm384_vm6, %v6677_v59, 0.0 }
 0xe25   :  { %v6681_v61 = vpop.eup %5400  ;;  %v3163_v4 = vsel %vm384_vm6, %v6679_v15, 0.0 }
 0xe26   :  { %v3166_v20 = vsel %vm384_vm6, %v6681_v61, 0.0  ;;  %v6689_v6 = vpop.eup %5402 }
 0xe27   :  { %v3169_v32 = vsel %vm384_vm6, %v6689_v6, 0.0 }
 0xe4d   :  { %3161 = vadd.xlane.f32.xlu2 %v3160_v0  ;;  %3164 = vadd.xlane.f32.xlu1 %v3163_v4 }
 0xe4e   :  { %3167 = vadd.xlane.f32.xlu0 %v3166_v20 }
 0xe55   :  { %3170 = vadd.xlane.f32.xlu2 %v3169_v32 }
 0xe76   :  { %v3520_v27 = vpop.permute.xlu2 %3519 }
 0xe77   :  { %v3542_v50 = vrot.slane %v3520_v27, 4 }
 0xe7e   :  { %v3400_v5 = vpop.permute.xlu2 %3399 }
 0xe7f   :  { %v3422_v47 = vrot.slane %v3400_v5, 4 }
 0xe8d   :  { %v3523_v35 = vpop.permute.xlu1 %3522  ;;  %v3526_v19 = vpop.permute.xlu0 %3525 }
 0xe8e   :  { %v3528_v26 = vrot.slane %v3523_v35, 4  ;;  %v3531_v29 = vsel %vm154_vm5, %v3523_v35, %v3530_v34  ;;  %v3540_v33 = vrot.slane %v3526_v19, 4  ;;  %v3543_v24 = vsel %vm154_vm5, %v3526_v19, %v3542_v50 }
 0xe8f   :  { %v3539_v28 = vperm.slane %v3531_v29, %v5633_v41  ;;  %v3551_v55 = vperm.slane %v3543_v24, %v5633_v41 }
 0xe90   :  { %v3529_v18 = vsel %vm154_vm5, %v3528_v26, %v2790_v54  ;;  %v3541_v38 = vsel %vm154_vm5, %v3540_v33, %v3520_v27 }
 0xe91   :  { %v3535_v40 = vperm.slane %v3529_v18, %v5633_v41  ;;  %v3566_v44 = vrot.slane %v3539_v28, 4  ;;  %v3547_v45 = vperm.slane %v3541_v38, %v5633_v41  ;;  %v3564_v39 = vrot.slane %v3551_v55, 4 }
 0xe93   :  { %v3554_v14 = vrot.slane %v3535_v40, 4  ;;  %v3552_v2 = vrot.slane %v3547_v45, 4  ;;  %v3565_v3 = vsel %vm154_vm5, %v3564_v39, %v3539_v28  ;;  %v3567_v22 = vsel %vm154_vm5, %v3551_v55, %v3566_v44 }
 0xe94   :  { %v3571_v9 = vperm.slane %v3565_v3, %v5638_v52  ;;  %v3575_v46 = vperm.slane %v3567_v22, %v5638_v52 }
 0xe95   :  { %v3553_v48 = vsel %vm154_vm5, %v3552_v2, %v3535_v40  ;;  %v3555_v49 = vsel %vm154_vm5, %v3547_v45, %v3554_v14  ;;  %v3406_v51 = vpop.permute.xlu1 %3405  ;;  %v3403_v54 = vpop.permute.xlu0 %3402 }
 0xe96   :  { %v3559_v31 = vperm.slane %v3553_v48, %v5638_v52  ;;  %v3563_v36 = vperm.slane %v3555_v49, %v5638_v52  ;;  %v3580_v37 = vrot.slane %v3571_v9, 4  ;;  %v3582_v11 = vrot.slane %v3575_v46, 4 }
 0xe97   :  { %v3420_v56 = vrot.slane %v3406_v51, 4  ;;  %v3423_v43 = vsel %vm154_vm5, %v3406_v51, %v3422_v47  ;;  %v3408_v57 = vrot.slane %v3403_v54, 4  ;;  %v3411_v58 = vsel %vm154_vm5, %v3403_v54, %v3410_v53 }
 0xe98   :  { %v3576_v1 = vrot.slane %v3559_v31, 4  ;;  %v3578_v10 = vrot.slane %v3563_v36, 4  ;;  %v3581_v21 = vsel %vm154_vm5, 0.0, %v3580_v37  ;;  %v3583_v17 = vsel %vm154_vm5, 0.0, %v3582_v11 }
 0xe99   :  { %v3595_v0 = vsel %vm154_vm5, %v3582_v11, %v3571_v9  ;;  %v3600_v4 = vrot.slane %v3583_v17, 4  ;;  %v3421_v20 = vsel %vm154_vm5, %v3420_v56, %v3400_v5  ;;  %v3431_v32 = vperm.slane %v3423_v43, %v5633_v41 }
 0xe9a   :  { %v3577_v27 = vsel %vm154_vm5, 0.0, %v3576_v1  ;;  %v3579_v50 = vsel %vm154_vm5, 0.0, %v3578_v10  ;;  %v3584_v34 = vsel %vm154_vm5, %v3578_v10, %v3559_v31  ;;  %v3599_v35 = vperm.slane %v3595_v0, %v5633_v41 }
 0xe9b   :  { %v3589_v19 = vrot.slane %v3579_v50, 4  ;;  %v3601_v26 = vsel %vm154_vm5, %v3600_v4, %v3581_v21  ;;  %v3427_v29 = vperm.slane %v3421_v20, %v5633_v41  ;;  %v3444_v33 = vrot.slane %v3431_v32, 4 }
 0xe9c   :  { %v3605_v24 = vperm.slane %v3601_v26, %v5633_v41  ;;  %v3620_v28 = vrot.slane %v3599_v35, 4  ;;  %v3409_v55 = vsel %vm154_vm5, %v3408_v57, %v6669_v23  ;;  %v3419_v18 = vperm.slane %v3411_v58, %v5633_v41 }
 0xe9d   :  { %v3432_v38 = vrot.slane %v3427_v29, 4  ;;  %v3415_v40 = vperm.slane %v3409_v55, %v5633_v41  ;;  %v3588_v44 = vperm.slane %v3584_v34, %v5633_v41  ;;  %v3590_v45 = vsel %vm154_vm5, %v3589_v19, %v3577_v27 }
 0xe9e   :  { %v3445_v39 = vsel %vm154_vm5, %v3444_v33, %v3419_v18  ;;  %v3446_v5 = vrot.slane %v3419_v18, 4  ;;  %v3594_v14 = vperm.slane %v3590_v45, %v5633_v41  ;;  %v3621_v2 = vsel %vm154_vm5, %v3605_v24, %v3620_v28 }
 0xe9f   :  { %v3433_v3 = vsel %vm154_vm5, %v3432_v38, %v3415_v40  ;;  %v3434_v22 = vrot.slane %v3415_v40, 4  ;;  %v3451_v23 = vperm.slane %v3445_v39, %v5638_v52  ;;  %v3608_v9 = vrot.slane %v3588_v44, 4 }
 0xea0   :  { %v3439_v46 = vperm.slane %v3433_v3, %v5638_v52  ;;  %v3447_v47 = vsel %vm154_vm5, %v3431_v32, %v3446_v5  ;;  %v6738_v48 = vperm.slane %v3621_v2, %v5638_v52  ;;  %v3606_v49 = vrot.slane %v3594_v14, 4 }
 0xea1   :  { %v3435_v51 = vsel %vm154_vm5, %v3427_v29, %v3434_v22  ;;  %v3455_v53 = vperm.slane %v3447_v47, %v5638_v52  ;;  %v3609_v54 = vsel %vm154_vm5, %v3594_v14, %v3608_v9  ;;  %v3460_v11 = vrot.slane %v3451_v23, 4 }
 0xea2   :  { %v3443_v31 = vperm.slane %v3435_v51, %v5638_v52  ;;  %v6745_v36 = vperm.slane %v3609_v54, %v5638_v52  ;;  %v3634_v37 = vrot.slane %v6738_v48, 4  ;;  %v3607_v43 = vsel %vm154_vm5, %v3606_v49, %v3588_v44 }
 0xea3   :  { %v3462_v56 = vrot.slane %v3455_v53, 4  ;;  %v3618_v57 = vrot.slane %v3605_v24, 4  ;;  %v3456_v58 = vrot.slane %v3439_v46, 4  ;;  %v3613_v21 = vperm.slane %v3607_v43, %v5638_v52 }
 0xea4   :  { %v3458_v1 = vrot.slane %v3443_v31, 4  ;;  %v6751_v10 = vsel %vm154_vm5, %v3634_v37, %v6745_v36  ;;  %v3461_v27 = vsel %vm154_vm5, 0.0, %v3460_v11  ;;  %v3636_v51 = vrot.slane %v6745_v36, 4 }
 0xea5   :  { %v3463_v17 = vsel %vm154_vm5, 0.0, %v3462_v56  ;;  %5265 = vmatpush.xpose.msk.msra.mxu3 %vm384_vm6, %v6751_v10  ;;  %v3619_v0 = vsel %vm154_vm5, %v3618_v57, %v3599_v35  ;;  %v3632_v34 = vrot.slane %v3613_v21, 4  ;;  %v3457_v19 = vsel %vm154_vm5, 0.0, %v3456_v58 }
 0xea6   :  { %v3459_v4 = vsel %vm154_vm5, 0.0, %v3458_v1  ;;  %v3480_v20 = vrot.slane %v3463_v17, 4  ;;  %v3625_v32 = vperm.slane %v3619_v0, %v5638_v52  ;;  %v3475_v26 = vsel %vm154_vm5, %v3462_v56, %v3451_v23 }
 0xea7   :  { %v3469_v50 = vrot.slane %v3459_v4, 4  ;;  %v3464_v28 = vsel %vm154_vm5, %v3458_v1, %v3439_v46  ;;  %v3479_v40 = vperm.slane %v3475_v26, %v5633_v41  ;;  %v3637_v1 = vsel %vm154_vm5, %v6738_v48, %v3636_v51 }
 0xea8   :  { %v3481_v29 = vsel %vm154_vm5, %v3480_v20, %v3461_v27  ;;  %v3630_v33 = vrot.slane %v3625_v32, 4  ;;  %v3633_v35 = vsel %vm154_vm5, %v3625_v32, %v3632_v34  ;;  %v3468_v45 = vperm.slane %v3464_v28, %v5633_v41 }
 0xea9   :  { %v3485_v24 = vperm.slane %v3481_v29, %v5633_v41  ;;  %v3470_v55 = vsel %vm154_vm5, %v3469_v50, %v3457_v19  ;;  %5263 = vmatpush.xpose.msk.msra.mxu2 %vm384_vm6, %v3633_v35  ;;  %v3500_v49 = vrot.slane %v3479_v40, 4 }
 0xeaa   :  { %v3631_v18 = vsel %vm154_vm5, %v3630_v33, %v3613_v21  ;;  %v3474_v38 = vperm.slane %v3470_v55, %v5633_v41  ;;  %v3488_v11 = vrot.slane %v3468_v45, 4 }
 0xeab   :  { %v3498_v44 = vrot.slane %v3485_v24, 4  ;;  %5261 = vmatpush.xpose.msk.msrb.mxu1 %vm384_vm6, %v3631_v18  ;;  %v3501_v56 = vsel %vm154_vm5, %v3485_v24, %v3500_v49 }
 0xeac   :  { %v3486_v39 = vrot.slane %v3474_v38, 4  ;;  %v3489_v36 = vsel %vm154_vm5, %v3474_v38, %v3488_v11 }
 0xead   :  { %v3499_v5 = vsel %vm154_vm5, %v3498_v44, %v3479_v40  ;;  %v3497_v21 = vperm.slane %v3489_v36, %v5638_v52 }
 0xeae   :  { %v3487_v14 = vsel %vm154_vm5, %v3486_v39, %v3468_v45  ;;  %v3505_v2 = vperm.slane %v3499_v5, %v5638_v52 }
 0xeaf   :  { %3804 = vmatpush.msra.mxu1 %v3631_v18  ;;  %v3493_v3 = vperm.slane %v3487_v14, %v5638_v52 }
 0xeb0   :  { %v3510_v22 = vrot.slane %v3505_v2, 4 }
 0xeb2   :  { %v3511_v23 = vsel %vm154_vm5, %v3510_v22, %v3493_v3 }
 0xeb3   :  { %5262 = vmatmul.msk.f32.vlgmr.msrb.gmra.mxu1 %vm384_vm6, %v3511_v23 }
 0xeb4   :  { %5273 = vmatpush.xpose.msk.msrb.mxu1 %vm384_vm6, %v6077_v12 }
 0xec0   :  { %v3162_v9 = vpop.xlane.xlu2 %3161  ;;  %v3165_v46 = vpop.xlane.xlu1 %3164 }
 0xec1   :  { %5404 = vrcp.f32 %v3162_v9  ;;  %v3168_v47 = vpop.xlane.xlu0 %3167 }
 0xec2   :  { %5406 = vrcp.f32 %v3165_v46 }
 0xec3   :  { %5408 = vrcp.f32 %v3168_v47 }
 0xec7   :  { %v5405_v53 = vpop.eup %5404 }
 0xec8   :  { %v5407_v54 = vpop.eup %5406  ;;  %v3176_v31 = vmul.f32 %v5405_v53, %v6677_v59  ;;  %v3171_v37 = vpop.xlane.xlu2 %3170  ;;  %v3509_v59 = vperm.slane %v3501_v56, %v5638_v52 }
 0xec9   :  { %v5409_v43 = vpop.eup %5408  ;;  %v3177_v57 = vmul.f32 %v5407_v54, %v6679_v15  ;;  %5410 = vrcp.f32 %v3171_v37  ;;  %v3512_v15 = vrot.slane %v3493_v3, 4 }
 0xeca   :  { %v3178_v58 = vmul.f32 %v5409_v43, %v6681_v61  ;;  %5257 = vmatmul.msk.f32.vlgmr.msrb.gmra.mxu0 %vm384_vm6, %v3176_v31  ;;  %v3514_v17 = vrot.slane %v3509_v59, 4 }
 0xecb   :  { %5267 = vmatpush.xpose.msk.msrb.mxu0 %vm384_vm6, %v3637_v1  ;;  %5258 = vmatmul.msk.f32.vlgmr.msrb.gmra.mxu2 %vm384_vm6, %v3177_v57  ;;  %v3513_v0 = vsel %vm154_vm5, %v3505_v2, %v3512_v15 }
 0xecc   :  { %5259 = vmatmul.msk.f32.vlgmr.msrb.gmra.mxu3 %vm384_vm6, %v3178_v58  ;;  %3827 = vmatpush.msrb.mxu2 %v3633_v35  ;;  %v3515_v4 = vsel %vm154_vm5, %v3514_v17, %v3497_v21 }
 0xecd   :  { %3850 = vmatpush.msrb.mxu3 %v6751_v10  ;;  %v3516_v10 = vrot.slane %v3497_v21, 4 }
 0xecf   :  { %v5411_v61 = vpop.eup %5410 }
 0xed0   :  { %v3179_v48 = vmul.f32 %v5411_v61, %v6689_v6  ;;  %v3517_v6 = vsel %vm154_vm5, %v3509_v59, %v3516_v10 }
 0xed2   :  { %5260 = vmatmul.msk.f32.vlgmr.msra.gmra.mxu0 %vm384_vm6, %v3179_v48 }
 0xed3   :  { %3873 = vmatpush.msra.mxu0 %v3637_v1  ;;  %5264 = vmatmul.msk.f32.vlgmr.msra.gmra.mxu2 %vm384_vm6, %v3513_v0 }
 0xed4   :  { %5266 = vmatmul.msk.f32.vlgmr.msra.gmra.mxu3 %vm384_vm6, %v3515_v4  ;;  %5275 = vmatpush.xpose.msk.msra.mxu2 %vm384_vm6, %v6085_v25 }
 0xed5   :  { %5277 = vmatpush.xpose.msk.msra.mxu3 %vm384_vm6, %v6069_v42 }
 0xeda   :  { %5268 = vmatmul.msk.f32.vlgmr.msrb.gmra.mxu0 %vm384_vm6, %v3517_v6 }
 0xedb   :  { %5279 = vmatpush.xpose.msk.msrb.mxu0 %vm384_vm6, %v6074_v13 }
 0xf30   :  { %v6811_v20 = vpop.f32.mrf.mxu1 }
 0xf31   :  { %v3742_v32 = vsel %vm384_vm6, %v6811_v20, -inf }
 0xf32   :  { %3743 = vmax.xlane.f32.xlu1 %v3742_v32 }
 0xf47   :  { %v3200_v27 = vpop.f32.mrf.mxu0 }
 0xf48   :  { %v3274_v50 = vrot.slane %v3200_v27, 4 }
 0xf4e   :  { %v3223_v34 = vpop.f32.mrf.mxu2 }
 0xf4f   :  { %v3286_v19 = vrot.slane %v3223_v34, 4  ;;  %v3246_v26 = vpop.f32.mrf.mxu3  ;;  %v3269_v29 = vpop.f32.mrf.mxu0 }
 0xf50   :  { %v3272_v33 = vrot.slane %v3246_v26, 4  ;;  %v3275_v24 = vsel %vm154_vm5, %v3246_v26, %v3274_v50  ;;  %v3284_v35 = vrot.slane %v3269_v29, 4 }
 0xf51   :  { %v3283_v28 = vperm.slane %v3275_v24, %v5633_v41  ;;  %v3287_v55 = vsel %vm154_vm5, %v3269_v29, %v3286_v19 }
 0xf52   :  { %v3273_v18 = vsel %vm154_vm5, %v3272_v33, %v3200_v27  ;;  %v3285_v38 = vsel %vm154_vm5, %v3284_v35, %v3223_v34  ;;  %v3295_v40 = vperm.slane %v3287_v55, %v5633_v41 }
 0xf53   :  { %v3279_v44 = vperm.slane %v3273_v18, %v5633_v41  ;;  %v3310_v45 = vrot.slane %v3283_v28, 4  ;;  %v3291_v39 = vperm.slane %v3285_v38, %v5633_v41 }
 0xf54   :  { %v3308_v5 = vrot.slane %v3295_v40, 4 }
 0xf55   :  { %v3298_v14 = vrot.slane %v3279_v44, 4  ;;  %v3296_v2 = vrot.slane %v3291_v39, 4  ;;  %v3311_v3 = vsel %vm154_vm5, %v3295_v40, %v3310_v45 }
 0xf56   :  { %v3309_v22 = vsel %vm154_vm5, %v3308_v5, %v3283_v28  ;;  %v3319_v23 = vperm.slane %v3311_v3, %v5638_v52  ;;  %v6826_v9 = vpop.f32.mrf.mxu2 }
 0xf57   :  { %v3297_v46 = vsel %vm154_vm5, %v3296_v2, %v3279_v44  ;;  %v3299_v47 = vsel %vm154_vm5, %v3291_v39, %v3298_v14  ;;  %v3315_v49 = vperm.slane %v3309_v22, %v5638_v52  ;;  %v6831_v51 = vpop.f32.mrf.mxu0  ;;  %v3745_v53 = vsel %vm384_vm6, %v6826_v9, -inf  ;;  %v3713_v0 = vpop.f32.mrf.mxu3 }
 0xf58   :  { %v3303_v54 = vperm.slane %v3297_v46, %v5638_v52  ;;  %v3307_v31 = vperm.slane %v3299_v47, %v5638_v52  ;;  %v3326_v37 = vrot.slane %v3319_v23, 4  ;;  %3746 = vmax.xlane.f32.xlu2 %v3745_v53  ;;  %v3751_v11 = vsel %vm384_vm6, %v6831_v51, -inf }
 0xf59   :  { %v3324_v56 = vrot.slane %v3315_v49, 4  ;;  %3752 = vmax.xlane.f32.xlu0 %v3751_v11  ;;  %v3748_v34 = vsel %vm384_vm6, %v3713_v0, -inf }
 0xf5a   :  { %v3320_v43 = vrot.slane %v3303_v54, 4  ;;  %v3322_v57 = vrot.slane %v3307_v31, 4  ;;  %v3327_v58 = vsel %vm154_vm5, 0.0, %v3326_v37  ;;  %v3339_v1 = vsel %vm154_vm5, %v3326_v37, %v3315_v49 }
 0xf5b   :  { %v3325_v59 = vsel %vm154_vm5, 0.0, %v3324_v56  ;;  %v3343_v36 = vperm.slane %v3339_v1, %v5633_v41  ;;  %v3344_v15 = vrot.slane %v3327_v58, 4 }
 0xf5c   :  { %v3323_v61 = vsel %vm154_vm5, 0.0, %v3322_v57  ;;  %v3321_v21 = vsel %vm154_vm5, 0.0, %v3320_v43  ;;  %v3328_v17 = vsel %vm154_vm5, %v3322_v57, %v3303_v54 }
 0xf5d   :  { %v3333_v48 = vrot.slane %v3323_v61, 4  ;;  %v3332_v4 = vperm.slane %v3328_v17, %v5633_v41  ;;  %v3345_v10 = vsel %vm154_vm5, %v3344_v15, %v3325_v59  ;;  %v3364_v6 = vrot.slane %v3343_v36, 4 }
 0xf5e   :  { %v3349_v32 = vperm.slane %v3345_v10, %v5633_v41 }
 0xf5f   :  { %v3334_v27 = vsel %vm154_vm5, %v3333_v48, %v3321_v21  ;;  %v3352_v50 = vrot.slane %v3332_v4, 4 }
 0xf60   :  { %v3338_v19 = vperm.slane %v3334_v27, %v5633_v41  ;;  %v3365_v26 = vsel %vm154_vm5, %v3349_v32, %v3364_v6  ;;  %v3362_v29 = vrot.slane %v3349_v32, 4 }
 0xf61   :  { %3749 = vmax.xlane.f32.xlu0 %v3748_v34  ;;  %v3373_v33 = vperm.slane %v3365_v26, %v5638_v52 }
 0xf62   :  { %v3353_v24 = vsel %vm154_vm5, %v3338_v19, %v3352_v50  ;;  %v3350_v35 = vrot.slane %v3338_v19, 4  ;;  %v3363_v28 = vsel %vm154_vm5, %v3362_v29, %v3343_v36 }
 0xf63   :  { %v3361_v55 = vperm.slane %v3353_v24, %v5638_v52  ;;  %v3378_v18 = vrot.slane %v3373_v33, 4  ;;  %v3369_v38 = vperm.slane %v3363_v28, %v5638_v52 }
 0xf64   :  { %v3351_v40 = vsel %vm154_vm5, %v3350_v35, %v3332_v4 }
 0xf65   :  { %v3379_v44 = vsel %vm154_vm5, %v3378_v18, %v3361_v55  ;;  %v3357_v45 = vperm.slane %v3351_v40, %v5638_v52  ;;  %v3374_v39 = vrot.slane %v3369_v38, 4  ;;  %v3380_v3 = vrot.slane %v3361_v55, 4 }
 0xf66   :  { %3387 = vrot.lane.b32.xlu1 %v3379_v44, %s5515_s25 }
 0xf67   :  { %v3375_v5 = vsel %vm154_vm5, %v3374_v39, %v3357_v45  ;;  %v3376_v14 = vrot.slane %v3357_v45, 4  ;;  %v3381_v22 = vsel %vm154_vm5, %v3373_v33, %v3380_v3 }
 0xf69   :  { %v3377_v2 = vsel %vm154_vm5, %v3369_v38, %v3376_v14 }
 0xf70   :  { %3383 = vrot.lane.b32.xlu2 %v3377_v2, %s5516_s26 }
 0xf75   :  { %3391 = vrot.lane.b32.xlu0 %v3381_v22, %s5514_s24 }
 0xfa5   :  { %v3744_v23 = vpop.xlane.xlu1 %3743 }
 0xfa6   :  { %v3754_v46 = vsub.f32 %v6811_v20, %v3744_v23 }
 0xfa8   :  { %v3758_v47 = vmul.f32 1.442695, %v3754_v46 }
 0xfaa   :  { %5412 = vpow2.f32 %v3758_v47 }
 0xfb0   :  { %v5413_v49 = vpop.eup %5412 }
 0xfb1   :  { %v3766_v53 = vsel %vm384_vm6, %v5413_v49, 0.0 }
 0xfb2   :  { %3767 = vadd.xlane.f32.xlu1 %v3766_v53 }
 0xfcb   :  { %v3747_v54 = vpop.xlane.xlu2 %3746 }
 0xfcc   :  { %v3755_v31 = vsub.f32 %v6826_v9, %v3747_v54  ;;  %v3753_v37 = vpop.xlane.xlu0 %3752 }
 0xfcd   :  { %v3757_v58 = vsub.f32 %v6831_v51, %v3753_v37 }
 0xfce   :  { %v3760_v11 = vmul.f32 1.442695, %v3755_v31 }
 0xfcf   :  { %v3764_v59 = vmul.f32 1.442695, %v3757_v58 }
 0xfd0   :  { %5414 = vpow2.f32 %v3760_v11 }
 0xfd3   :  { %v3384_v9 = vpop.permute.xlu2 %3383 }
 0xfd4   :  { %v3750_v56 = vpop.xlane.xlu0 %3749  ;;  %v3394_v17 = vsel %vm384_vm6, %v3375_v5, %v3384_v9 }
 0xfd5   :  { %v3756_v43 = vsub.f32 %v3713_v0, %v3750_v56 }
 0xfd6   :  { %v5415_v57 = vpop.eup %5414 }
 0xfd7   :  { %v3762_v1 = vmul.f32 1.442695, %v3756_v43  ;;  %v3769_v20 = vsel %vm384_vm6, %v5415_v57, 0.0 }
 0xfd8   :  { %3770 = vadd.xlane.f32.xlu0 %v3769_v20  ;;  %v3388_v61 = vpop.permute.xlu1 %3387 }
 0xfd9   :  { %5416 = vpow2.f32 %v3762_v1  ;;  %v3395_v48 = vsel %vm748_vm10, %v3394_v17, %v3388_v61 }
 0xfda   :  { %5418 = vpow2.f32 %v3764_v59 }
 0xfdf   :  { %v5417_v36 = vpop.eup %5416 }
 0xfe0   :  { %v3772_v15 = vsel %vm384_vm6, %v5417_v36, 0.0  ;;  %v5419_v21 = vpop.eup %5418 }
 0xfe1   :  { %3773 = vadd.xlane.f32.xlu2 %v3772_v15  ;;  %v3775_v4 = vsel %vm384_vm6, %v5419_v21, 0.0 }
 0xfe7   :  { %v3392_v0 = vpop.permute.xlu0 %3391 }
 0xfe8   :  { %v3396_v51 = vsel %vm750_vm11, %v3395_v48, %v3392_v0 }
 0xfe9   :  { %v6878_v10 = vadd.f32 %v3396_v51, %v6517_v30  ;;  %3776 = vadd.xlane.f32.xlu2 %v3775_v4 }
 0xfeb   :  { %v4005_v6 = vsel %vm84_vm0, %v6878_v10, 0.0 }
 0xfec   :  { %4006 = vadd.xlane.f32.xlu0 %v4005_v6 }
0x1025   :  { %v3768_v32 = vpop.xlane.xlu1 %3767 }
0x1026   :  { %5420 = vrcp.f32 %v3768_v32 }
0x102c   :  { %v5421_v27 = vpop.eup %5420 }
0x102d   :  { %v3782_v50 = vmul.f32 %v5421_v27, %v5413_v49  ;;  %v6917_v27 = vld [vmem:[%s7316_s4] sm:$0x3] }
0x102f   :  { %5269 = vmatmul.msk.f32.vlgmr.msra.gmra.mxu1 %vm384_vm6, %v3782_v50  ;;  %v4049_v50 = vperm.slane %v6917_v27, 1 }
0x1030   :  { %4330 = vmatpush.msra.mxu1 %v6077_v12 }
0x104b   :  { %v3771_v34 = vpop.xlane.xlu0 %3770 }
0x104c   :  { %5422 = vrcp.f32 %v3771_v34 }
0x1052   :  { %v5423_v19 = vpop.eup %5422 }
0x1053   :  { %v3783_v26 = vmul.f32 %v5423_v19, %v5415_v57 }
0x1054   :  { %v3774_v29 = vpop.xlane.xlu2 %3773 }
0x1055   :  { %5424 = vrcp.f32 %v3774_v29  ;;  %5270 = vmatmul.msk.f32.vlgmr.msrb.gmra.mxu2 %vm384_vm6, %v3783_v26 }
0x1056   :  { %4353 = vmatpush.msrb.mxu2 %v6085_v25 }
0x105b   :  { %v5425_v30 = vpop.eup %5424 }
0x105c   :  { %v3784_v33 = vmul.f32 %v5425_v30, %v5417_v36  ;;  %v3777_v24 = vpop.xlane.xlu2 %3776 }
0x105d   :  { %5426 = vrcp.f32 %v3777_v24 }
0x105e   :  { %5271 = vmatmul.msk.f32.vlgmr.msrb.gmra.mxu3 %vm384_vm6, %v3784_v33 }
0x105f   :  { %4376 = vmatpush.msrb.mxu3 %v6069_v42  ;;  %v4007_v35 = vpop.xlane.xlu0 %4006 }
0x1060   :  { %v4011_v12 = vmul.f32 %v4007_v35, %v5598_v8 }
0x1062   :  { %v6890_v28 = vsub.f32 %v6878_v10, %v4011_v12 }
0x1063   :  { %v5427_v55 = vpop.eup %5426 }
0x1064   :  { %v3785_v18 = vmul.f32 %v5427_v55, %v5419_v21  ;;  %v4015_v38 = vmul.f32 %v6890_v28, %v6890_v28 }
0x1066   :  { %5272 = vmatmul.msk.f32.vlgmr.msra.gmra.mxu0 %vm384_vm6, %v3785_v18  ;;  %v4017_v25 = vsel %vm84_vm0, %v4015_v38, 0.0 }
0x1067   :  { %4399 = vmatpush.msra.mxu0 %v6074_v13  ;;  %4018 = vadd.xlane.f32.xlu1 %v4017_v25 }
0x10ac   :  { %v3806_v44 = vpop.f32.mrf.mxu1 }
0x10ad   :  { %v3880_v5 = vrot.slane %v3806_v44, 4 }
0x10d8   :  { %v3829_v39 = vpop.f32.mrf.mxu2 }
0x10d9   :  { %v3892_v2 = vrot.slane %v3829_v39, 4 }
0x10da   :  { %v4019_v40 = vpop.xlane.xlu1 %4018 }
0x10db   :  { %v4023_v42 = vmul.f32 %v4019_v40, %v5598_v8 }
0x10dd   :  { %v4025_v45 = vadd.f32 1e-05, %v4023_v42  ;;  %v6933_v42 = vld [vmem:[%s7317_s5] sm:$0x3] }
0x10df   :  { %5428 = vrsqrt.f32 %v4025_v45  ;;  %vm4033_vm9 = vweird.f32 %v4025_v45 }
0x10e1   :  { %v3852_v14 = vpop.f32.mrf.mxu3 }
0x10e2   :  { %v3878_v3 = vrot.slane %v3852_v14, 4  ;;  %v3881_v22 = vsel %vm154_vm5, %v3852_v14, %v3880_v5 }
0x10e3   :  { %v3889_v23 = vperm.slane %v3881_v22, %v5633_v41  ;;  %v3875_v46 = vpop.f32.mrf.mxu0 }
0x10e4   :  { %v3879_v47 = vsel %vm154_vm5, %v3878_v3, %v3806_v44  ;;  %v3890_v13 = vrot.slane %v3875_v46, 4  ;;  %v3893_v49 = vsel %vm154_vm5, %v3875_v46, %v3892_v2  ;;  %v4052_v44 = vperm.slane %v6933_v42, 1 }
0x10e5   :  { %v5429_v53 = vpop.eup %5428  ;;  %v3885_v54 = vperm.slane %v3879_v47, %v5633_v41  ;;  %v3916_v31 = vrot.slane %v3889_v23, 4  ;;  %v3901_v37 = vperm.slane %v3893_v49, %v5633_v41 }
0x10e6   :  { %v4028_v11 = vmul.f32 %v5429_v53, %v4025_v45  ;;  %v3891_v56 = vsel %vm154_vm5, %v3890_v13, %v3829_v39  ;;  %vm4034_vm7 = vweird.f32 %v5429_v53 }
0x10e7   :  { %v3904_v43 = vrot.slane %v3885_v54, 4  ;;  %v3897_v57 = vperm.slane %v3891_v56, %v5633_v41  ;;  %v3914_v58 = vrot.slane %v3901_v37, 4  ;;  %v3917_v1 = vsel %vm154_vm5, %v3901_v37, %v3916_v31  ;;  %vm4035_vm12 = vmor %vm4033_vm9, %vm4034_vm7 }
0x10e8   :  { %v4029_v20 = vmul.f32 %v5429_v53, %v4028_v11  ;;  %v3925_v59 = vperm.slane %v3917_v1, %v5638_v52 }
0x10e9   :  { %v3902_v36 = vrot.slane %v3897_v57, 4  ;;  %v3905_v15 = vsel %vm154_vm5, %v3897_v57, %v3904_v43  ;;  %v3915_v9 = vsel %vm154_vm5, %v3914_v58, %v3889_v23 }
0x10ea   :  { %v4030_v61 = vmul.f32 0.5, %v4029_v20  ;;  %v3913_v21 = vperm.slane %v3905_v15, %v5638_v52  ;;  %v3921_v17 = vperm.slane %v3915_v9, %v5638_v52  ;;  %v3932_v48 = vrot.slane %v3925_v59, 4 }
0x10eb   :  { %v3903_v0 = vsel %vm154_vm5, %v3902_v36, %v3885_v54 }
0x10ec   :  { %v4031_v51 = vsub.f32 1.5, %v4030_v61  ;;  %v3909_v4 = vperm.slane %v3903_v0, %v5638_v52  ;;  %v3928_v6 = vrot.slane %v3913_v21, 4  ;;  %v3930_v32 = vrot.slane %v3921_v17, 4 }
0x10ed   :  { %v3933_v34 = vsel %vm154_vm5, 0.0, %v3932_v48  ;;  %v3945_v19 = vsel %vm154_vm5, %v3932_v48, %v3921_v17 }
0x10ee   :  { %v4032_v26 = vmul.f32 %v5429_v53, %v4031_v51  ;;  %v3926_v29 = vrot.slane %v3909_v4, 4  ;;  %v3929_v30 = vsel %vm154_vm5, 0.0, %v3928_v6  ;;  %v3931_v33 = vsel %vm154_vm5, 0.0, %v3930_v32 }
0x10ef   :  { %v3939_v24 = vrot.slane %v3929_v30, 4  ;;  %v3950_v35 = vrot.slane %v3933_v34, 4  ;;  %v3934_v12 = vsel %vm154_vm5, %v3928_v6, %v3909_v4  ;;  %v3949_v55 = vperm.slane %v3945_v19, %v5633_v41 }
0x10f0   :  { %v4036_v18 = vsel %vm4035_vm12, %v5429_v53, %v4032_v26  ;;  %v3927_v38 = vsel %vm154_vm5, 0.0, %v3926_v29  ;;  %v3938_v25 = vperm.slane %v3934_v12, %v5633_v41 }
0x10f1   :  { %v4047_v40 = vmul.f32 %v4036_v18, %v6890_v28  ;;  %v3940_v45 = vsel %vm154_vm5, %v3939_v24, %v3927_v38  ;;  %v3951_v39 = vsel %vm154_vm5, %v3950_v35, %v3931_v33  ;;  %v3970_v3 = vrot.slane %v3949_v55, 4 }
0x10f2   :  { %v3944_v5 = vperm.slane %v3940_v45, %v5633_v41  ;;  %v3955_v14 = vperm.slane %v3951_v39, %v5633_v41  ;;  %v3958_v2 = vrot.slane %v3938_v25, 4 }
0x10f3   :  { %v4050_v28 = vmul.f32 %v4049_v50, %v4047_v40 }
0x10f4   :  { %v3956_v22 = vrot.slane %v3944_v5, 4  ;;  %v3968_v23 = vrot.slane %v3955_v14, 4  ;;  %v3959_v47 = vsel %vm154_vm5, %v3944_v5, %v3958_v2  ;;  %v3971_v13 = vsel %vm154_vm5, %v3955_v14, %v3970_v3 }
0x10f5   :  { %v4053_v46 = vadd.f32 %v4052_v44, %v4050_v28  ;;  %v3967_v31 = vperm.slane %v3959_v47, %v5638_v52  ;;  %v3979_v56 = vperm.slane %v3971_v13, %v5638_v52 }
0x10f6   :  { %v3957_v49 = vsel %vm154_vm5, %v3956_v22, %v3938_v25  ;;  %v3969_v53 = vsel %vm154_vm5, %v3968_v23, %v3949_v55 }
0x10f7   :  { %v4055_v54 = vmul.f32 0.35355338, %v4053_v46  ;;  %v3963_v37 = vperm.slane %v3957_v49, %v5638_v52  ;;  %v3975_v11 = vperm.slane %v3969_v53, %v5638_v52  ;;  %v3986_v57 = vrot.slane %v3967_v31, 4 }
0x10f8   :  { %v3984_v20 = vrot.slane %v3979_v56, 4 }
0x10f9   :  { %4063 = vrot.lane.b32.xlu1 %v4055_v54, %s5509_s19  ;;  %4060 = vrot.lane.b32.xlu0 %v4055_v54, %s5511_s21  ;;  %v3980_v43 = vrot.slane %v3975_v11, 4  ;;  %v3982_v58 = vrot.slane %v3963_v37, 4  ;;  %v3987_v59 = vsel %vm154_vm5, %v3979_v56, %v3986_v57  ;;  %v4068_v21 = vrot.slane %v4055_v54, 4 }
0x10fa   :  { %4057 = vrot.lane.b32.xlu2 %v4055_v54, %s5510_s20  ;;  %v3985_v15 = vsel %vm154_vm5, %v3984_v20, %v3967_v31 }
0x10fb   :  { %v3981_v1 = vsel %vm154_vm5, %v3980_v43, %v3963_v37  ;;  %v3983_v36 = vsel %vm154_vm5, %v3975_v11, %v3982_v58 }
0x1101   :  { %3997 = vrot.lane.b32.xlu1 %v3987_v59, %s5514_s24  ;;  %3989 = vrot.lane.b32.xlu0 %v3983_v36, %s5516_s26 }
0x1102   :  { %3993 = vrot.lane.b32.xlu2 %v3985_v15, %s5515_s25 }
0x1154   :  { %v4058_v9 = vpop.permute.xlu2 %4057 }
0x1155   :  { %v4080_v61 = vrot.slane %v4058_v9, 4 }
0x115c   :  { %v3994_v22 = vpop.permute.xlu2 %3993 }
0x116b   :  { %v4064_v17 = vpop.permute.xlu1 %4063  ;;  %v4061_v48 = vpop.permute.xlu0 %4060 }
0x116c   :  { %v4078_v0 = vrot.slane %v4064_v17, 4  ;;  %v4081_v51 = vsel %vm154_vm5, %v4064_v17, %v4080_v61  ;;  %v4066_v4 = vrot.slane %v4061_v48, 4  ;;  %v4069_v6 = vsel %vm154_vm5, %v4061_v48, %v4068_v21 }
0x116d   :  { %v4089_v32 = vperm.slane %v4081_v51, %v5633_v41  ;;  %v4077_v34 = vperm.slane %v4069_v6, %v5633_v41 }
0x116e   :  { %v4079_v19 = vsel %vm154_vm5, %v4078_v0, %v4058_v9  ;;  %v4067_v26 = vsel %vm154_vm5, %v4066_v4, %v4055_v54 }
0x116f   :  { %v4085_v29 = vperm.slane %v4079_v19, %v5633_v41  ;;  %v4102_v30 = vrot.slane %v4089_v32, 4  ;;  %v4073_v33 = vperm.slane %v4067_v26, %v5633_v41  ;;  %v4104_v24 = vrot.slane %v4077_v34, 4 }
0x1171   :  { %v4090_v35 = vrot.slane %v4085_v29, 4  ;;  %v4092_v12 = vrot.slane %v4073_v33, 4  ;;  %v4103_v55 = vsel %vm154_vm5, %v4102_v30, %v4077_v34  ;;  %v4105_v18 = vsel %vm154_vm5, %v4089_v32, %v4104_v24 }
0x1172   :  { %v4109_v38 = vperm.slane %v4103_v55, %v5638_v52  ;;  %v4113_v25 = vperm.slane %v4105_v18, %v5638_v52 }
0x1173   :  { %v4091_v40 = vsel %vm154_vm5, %v4090_v35, %v4073_v33  ;;  %v4093_v45 = vsel %vm154_vm5, %v4085_v29, %v4092_v12  ;;  %v3990_v39 = vpop.permute.xlu0 %3989  ;;  %v3998_v56 = vpop.permute.xlu1 %3997 }
0x1174   :  { %v4097_v5 = vperm.slane %v4091_v40, %v5638_v52  ;;  %v4101_v14 = vperm.slane %v4093_v45, %v5638_v52  ;;  %v4118_v2 = vrot.slane %v4109_v38, 4  ;;  %v4120_v3 = vrot.slane %v4113_v25, 4 }
0x1175   :  { %v4000_v28 = vsel %vm384_vm6, %v3981_v1, %v3990_v39 }
0x1176   :  { %v4114_v23 = vrot.slane %v4097_v5, 4  ;;  %v4116_v46 = vrot.slane %v4101_v14, 4  ;;  %v4121_v47 = vsel %vm154_vm5, 0.0, %v4120_v3  ;;  %v4133_v13 = vsel %vm154_vm5, %v4120_v3, %v4109_v38 }
0x1177   :  { %v4138_v49 = vrot.slane %v4121_v47, 4  ;;  %v4001_v53 = vsel %vm748_vm10, %v4000_v28, %v3994_v22  ;;  %v4119_v31 = vsel %vm154_vm5, 0.0, %v4118_v2  ;;  %v4137_v11 = vperm.slane %v4133_v13, %v5633_v41 }
0x1178   :  { %v4117_v54 = vsel %vm154_vm5, 0.0, %v4116_v46  ;;  %v4122_v37 = vsel %vm154_vm5, %v4116_v46, %v4097_v5  ;;  %v4002_v58 = vsel %vm750_vm11, %v4001_v53, %v3998_v56  ;;  %v4115_v20 = vsel %vm154_vm5, 0.0, %v4114_v23 }
0x1179   :  { %v4127_v43 = vrot.slane %v4117_v54, 4  ;;  %v4139_v57 = vsel %vm154_vm5, %v4138_v49, %v4119_v31  ;;  %v4126_v1 = vperm.slane %v4122_v37, %v5633_v41  ;;  %v4158_v36 = vrot.slane %v4137_v11, 4 }
0x117a   :  { %v4143_v59 = vperm.slane %v4139_v57, %v5633_v41  ;;  %v6992_v15 = vadd.f32 %v4002_v58, %v6646_v16 }
0x117b   :  { %v4128_v9 = vsel %vm154_vm5, %v4127_v43, %v4115_v20  ;;  %v4146_v61 = vrot.slane %v4126_v1, 4 }
0x117c   :  { %v4156_v21 = vrot.slane %v4143_v59, 4  ;;  %v4008_v17 = vsel %vm84_vm0, %v6992_v15, 0.0  ;;  %v4132_v48 = vperm.slane %v4128_v9, %v5633_v41  ;;  %v4159_v0 = vsel %vm154_vm5, %v4143_v59, %v4158_v36 }
0x117d   :  { %4009 = vadd.xlane.f32.xlu0 %v4008_v17  ;;  %v4167_v51 = vperm.slane %v4159_v0, %v5638_v52 }
0x117e   :  { %v4147_v4 = vsel %vm154_vm5, %v4132_v48, %v4146_v61  ;;  %v4144_v6 = vrot.slane %v4132_v48, 4  ;;  %v4157_v16 = vsel %vm154_vm5, %v4156_v21, %v4137_v11 }
0x117f   :  { %v4155_v32 = vperm.slane %v4147_v4, %v5638_v52  ;;  %v4172_v34 = vrot.slane %v4167_v51, 4  ;;  %v4163_v19 = vperm.slane %v4157_v16, %v5638_v52 }
0x1180   :  { %v4145_v26 = vsel %vm154_vm5, %v4144_v6, %v4126_v1 }
0x1181   :  { %v4173_v29 = vsel %vm154_vm5, %v4172_v34, %v4155_v32  ;;  %v4151_v30 = vperm.slane %v4145_v26, %v5638_v52  ;;  %v4168_v33 = vrot.slane %v4163_v19, 4  ;;  %v4174_v24 = vrot.slane %v4155_v32, 4 }
0x1182   :  { %5278 = vmatmul.msk.f32.vlgmr.msra.gmra.mxu3 %vm384_vm6, %v4173_v29 }
0x1183   :  { %5289 = vmatpush.xpose.msk.msra.mxu3 %vm384_vm6, %v6227_v60  ;;  %v4169_v35 = vsel %vm154_vm5, %v4168_v33, %v4151_v30  ;;  %v4175_v12 = vsel %vm154_vm5, %v4167_v51, %v4174_v24  ;;  %v4170_v55 = vrot.slane %v4151_v30, 4 }
0x1184   :  { %5274 = vmatmul.msk.f32.vlgmr.msrb.gmra.mxu1 %vm384_vm6, %v4169_v35  ;;  %5280 = vmatmul.msk.f32.vlgmr.msrb.gmra.mxu0 %vm384_vm6, %v4175_v12 }
0x1185   :  { %5285 = vmatpush.xpose.msk.msrb.mxu1 %vm384_vm6, %v6233_v62  ;;  %5291 = vmatpush.xpose.msk.msrb.mxu0 %vm384_vm6, %v6236_v63  ;;  %v4171_v18 = vsel %vm154_vm5, %v4163_v19, %v4170_v55 }
0x1186   :  { %5276 = vmatmul.msk.f32.vlgmr.msra.gmra.mxu2 %vm384_vm6, %v4171_v18 }
0x1187   :  { %5287 = vmatpush.xpose.msk.msra.mxu2 %vm384_vm6, %v6244_v7 }
0x11f0   :  { %v4010_v38 = vpop.xlane.xlu0 %4009 }
0x11f1   :  { %v4012_v25 = vmul.f32 %v4010_v38, %v5598_v8 }
0x11f3   :  { %v4014_v40 = vsub.f32 %v6992_v15, %v4012_v25 }
0x11f5   :  { %v4016_v45 = vmul.f32 %v4014_v40, %v4014_v40 }
0x11f7   :  { %v4020_v39 = vsel %vm84_vm0, %v4016_v45, 0.0 }
0x11f8   :  { %4021 = vadd.xlane.f32.xlu2 %v4020_v39 }
0x1201   :  { %v4196_v5 = vpop.f32.mrf.mxu1  ;;  %v4265_v14 = vpop.f32.mrf.mxu0 }
0x1202   :  { %v4277_v2 = vsel %vm384_vm6, %v4265_v14, -inf  ;;  %v4268_v3 = vsel %vm384_vm6, %v4196_v5, -inf }
0x1203   :  { %4278 = vmax.xlane.f32.xlu1 %v4277_v2  ;;  %4269 = vmax.xlane.f32.xlu2 %v4268_v3 }
0x1205   :  { %v4242_v28 = vpop.f32.mrf.mxu3 }
0x1206   :  { %v4274_v23 = vsel %vm384_vm6, %v4242_v28, -inf }
0x1209   :  { %v4219_v22 = vpop.f32.mrf.mxu2 }
0x120a   :  { %v4271_v46 = vsel %vm384_vm6, %v4219_v22, -inf }
0x120b   :  { %4275 = vmax.xlane.f32.xlu1 %v4274_v23  ;;  %4272 = vmax.xlane.f32.xlu0 %v4271_v46 }
0x126b   :  { %v4022_v47 = vpop.xlane.xlu2 %4021 }
0x126c   :  { %v4024_v13 = vmul.f32 %v4022_v47, %v5598_v8 }
0x126e   :  { %v4026_v49 = vadd.f32 1e-05, %v4024_v13 }
0x1270   :  { %5430 = vrsqrt.f32 %v4026_v49  ;;  %vm4043_vm14 = vweird.f32 %v4026_v49 }
0x1276   :  { %v5431_v53 = vpop.eup %5430  ;;  %v4279_v59 = vpop.xlane.xlu1 %4278 }
0x1277   :  { %v4038_v54 = vmul.f32 %v5431_v53, %v4026_v49  ;;  %vm4044_vm13 = vweird.f32 %v5431_v53  ;;  %v4270_v9 = vpop.xlane.xlu2 %4269  ;;  %v4283_v42 = vsub.f32 %v4265_v14, %v4279_v59 }
0x1278   :  { %vm4045_vm15 = vmor %vm4043_vm14, %vm4044_vm13  ;;  %v4280_v17 = vsub.f32 %v4196_v5, %v4270_v9 }
0x1279   :  { %v4039_v31 = vmul.f32 %v5431_v53, %v4038_v54  ;;  %v4290_v51 = vmul.f32 1.442695, %v4283_v42 }
0x127a   :  { %v4284_v27 = vmul.f32 1.442695, %v4280_v17 }
0x127b   :  { %v4040_v37 = vmul.f32 0.5, %v4039_v31 }
0x127d   :  { %v4041_v11 = vsub.f32 1.5, %v4040_v37 }
0x127e   :  { %v4273_v36 = vpop.xlane.xlu0 %4272  ;;  %v4276_v61 = vpop.xlane.xlu1 %4275 }
0x127f   :  { %v4042_v56 = vmul.f32 %v5431_v53, %v4041_v11  ;;  %v4281_v21 = vsub.f32 %v4219_v22, %v4273_v36  ;;  %v4282_v48 = vsub.f32 %v4242_v28, %v4276_v61 }
0x1281   :  { %v4046_v43 = vsel %vm4045_vm15, %v5431_v53, %v4042_v56  ;;  %v4286_v0 = vmul.f32 1.442695, %v4281_v21 }
0x1282   :  { %v4048_v57 = vmul.f32 %v4046_v43, %v4014_v40 }
0x1283   :  { %5432 = vpow2.f32 %v4286_v0 }
0x1284   :  { %v4051_v58 = vmul.f32 %v4049_v50, %v4048_v57  ;;  %v4288_v50 = vmul.f32 1.442695, %v4282_v48  ;;  %5434 = vpow2.f32 %v4284_v27 }
0x1286   :  { %v4054_v1 = vadd.f32 %v4052_v44, %v4051_v58  ;;  %5436 = vpow2.f32 %v4288_v50 }
0x1287   :  { %5438 = vpow2.f32 %v4290_v51 }
0x1288   :  { %v4529_v20 = vmul.f32 0.35355338, %v4054_v1 }
0x1289   :  { %v7037_v44 = vpop.eup %5432 }
0x128a   :  { %4537 = vrot.lane.b32.xlu1 %v4529_v20, %s5509_s19  ;;  %4534 = vrot.lane.b32.xlu2 %v4529_v20, %s5511_s21  ;;  %v7039_v4 = vpop.eup %5434  ;;  %v4295_v16 = vsel %vm384_vm6, %v7037_v44, 0.0  ;;  %v4542_v12 = vrot.slane %v4529_v20, 4 }
0x128b   :  { %4531 = vrot.lane.b32.xlu0 %v4529_v20, %s5510_s20  ;;  %v4292_v32 = vsel %vm384_vm6, %v7039_v4, 0.0 }
0x128c   :  { %v7041_v6 = vpop.eup %5436 }
0x128d   :  { %v4298_v34 = vsel %vm384_vm6, %v7041_v6, 0.0  ;;  %v7049_v19 = vpop.eup %5438 }
0x128e   :  { %v4301_v26 = vsel %vm384_vm6, %v7049_v19, 0.0 }
0x12b3   :  { %4296 = vadd.xlane.f32.xlu2 %v4295_v16 }
0x12b4   :  { %4293 = vadd.xlane.f32.xlu1 %v4292_v32 }
0x12b5   :  { %4299 = vadd.xlane.f32.xlu0 %v4298_v34 }
0x12bd   :  { %4302 = vadd.xlane.f32.xlu0 %v4301_v26 }
0x12e4   :  { %v4535_v29 = vpop.permute.xlu2 %4534 }
0x12e5   :  { %v4540_v33 = vrot.slane %v4535_v29, 4  ;;  %v4543_v38 = vsel %vm154_vm5, %v4535_v29, %v4542_v12 }
0x12e6   :  { %v4551_v39 = vperm.slane %v4543_v38, %v5633_v41 }
0x12e7   :  { %v4541_v18 = vsel %vm154_vm5, %v4540_v33, %v4529_v20 }
0x12e8   :  { %v4547_v40 = vperm.slane %v4541_v18, %v5633_v41  ;;  %v4578_v3 = vrot.slane %v4551_v39, 4 }
0x12ea   :  { %v4566_v2 = vrot.slane %v4547_v40, 4 }
0x12fc   :  { %v4538_v30 = vpop.permute.xlu1 %4537 }
0x12fd   :  { %v4532_v24 = vpop.permute.xlu0 %4531  ;;  %v4552_v35 = vrot.slane %v4538_v30, 4 }
0x12fe   :  { %v4554_v55 = vrot.slane %v4532_v24, 4 }
0x12ff   :  { %v4553_v25 = vsel %vm154_vm5, %v4552_v35, %v4532_v24 }
0x1300   :  { %v4555_v45 = vsel %vm154_vm5, %v4538_v30, %v4554_v55  ;;  %v4559_v5 = vperm.slane %v4553_v25, %v5633_v41 }
0x1301   :  { %v4563_v14 = vperm.slane %v4555_v45, %v5633_v41 }
0x1302   :  { %v4564_v28 = vrot.slane %v4559_v5, 4  ;;  %v4567_v22 = vsel %vm154_vm5, %v4559_v5, %v4566_v2 }
0x1303   :  { %v4576_v23 = vrot.slane %v4563_v14, 4  ;;  %v4579_v46 = vsel %vm154_vm5, %v4563_v14, %v4578_v3  ;;  %v4575_v47 = vperm.slane %v4567_v22, %v5638_v52 }
0x1304   :  { %v4565_v13 = vsel %vm154_vm5, %v4564_v28, %v4547_v40  ;;  %v4587_v49 = vperm.slane %v4579_v46, %v5638_v52 }
0x1305   :  { %v4577_v53 = vsel %vm154_vm5, %v4576_v23, %v4551_v39  ;;  %v4571_v54 = vperm.slane %v4565_v13, %v5638_v52  ;;  %v4590_v31 = vrot.slane %v4575_v47, 4 }
0x1306   :  { %v4583_v37 = vperm.slane %v4577_v53, %v5638_v52  ;;  %v4594_v11 = vrot.slane %v4587_v49, 4 }
0x1307   :  { %v4588_v56 = vrot.slane %v4571_v54, 4  ;;  %v4591_v43 = vsel %vm154_vm5, 0.0, %v4590_v31  ;;  %v4596_v50 = vsel %vm154_vm5, %v4590_v31, %v4571_v54 }
0x1308   :  { %v4592_v57 = vrot.slane %v4583_v37, 4  ;;  %v4595_v58 = vsel %vm154_vm5, 0.0, %v4594_v11  ;;  %v4601_v1 = vrot.slane %v4591_v43, 4  ;;  %v4607_v21 = vsel %vm154_vm5, %v4594_v11, %v4583_v37 }
0x1309   :  { %v4589_v20 = vsel %vm154_vm5, 0.0, %v4588_v56  ;;  %v4612_v59 = vrot.slane %v4595_v58, 4  ;;  %v4611_v27 = vperm.slane %v4607_v21, %v5633_v41  ;;  %v4600_v34 = vperm.slane %v4596_v50, %v5633_v41 }
0x130a   :  { %v4593_v36 = vsel %vm154_vm5, 0.0, %v4592_v57  ;;  %v4602_v9 = vsel %vm154_vm5, %v4601_v1, %v4589_v20 }
0x130b   :  { %v4613_v61 = vsel %vm154_vm5, %v4612_v59, %v4593_v36  ;;  %v4606_v17 = vperm.slane %v4602_v9, %v5633_v41  ;;  %v4632_v26 = vrot.slane %v4611_v27, 4  ;;  %v4620_v39 = vrot.slane %v4600_v34, 4 }
0x130c   :  { %v4617_v48 = vperm.slane %v4613_v61, %v5633_v41 }
0x130d   :  { %v4618_v16 = vrot.slane %v4606_v17, 4  ;;  %v4621_v5 = vsel %vm154_vm5, %v4606_v17, %v4620_v39 }
0x130e   :  { %v4630_v32 = vrot.slane %v4617_v48, 4  ;;  %v4633_v12 = vsel %vm154_vm5, %v4617_v48, %v4632_v26 }
0x130f   :  { %v4619_v29 = vsel %vm154_vm5, %v4618_v16, %v4600_v34 }
0x1310   :  { %v4631_v33 = vsel %vm154_vm5, %v4630_v32, %v4611_v27  ;;  %v4625_v38 = vperm.slane %v4619_v29, %v5638_v52 }
0x1311   :  { %v4637_v45 = vperm.slane %v4631_v33, %v5638_v52 }
0x1326   :  { %v4297_v0 = vpop.xlane.xlu2 %4296 }
0x1327   :  { %5440 = vrcp.f32 %v4297_v0  ;;  %v4294_v42 = vpop.xlane.xlu1 %4293 }
0x1328   :  { %5442 = vrcp.f32 %v4294_v42  ;;  %v4300_v51 = vpop.xlane.xlu0 %4299 }
0x1329   :  { %5444 = vrcp.f32 %v4300_v51 }
0x132d   :  { %v5441_v30 = vpop.eup %5440 }
0x132e   :  { %v5443_v24 = vpop.eup %5442  ;;  %v4309_v35 = vmul.f32 %v5441_v30, %v7037_v44  ;;  %v4641_v44 = vperm.slane %v4633_v12, %v5638_v52 }
0x132f   :  { %v5445_v55 = vpop.eup %5444  ;;  %v4308_v18 = vmul.f32 %v5443_v24, %v7039_v4  ;;  %v4644_v4 = vrot.slane %v4625_v38, 4 }
0x1330   :  { %v4310_v25 = vmul.f32 %v5445_v55, %v7041_v6  ;;  %v4303_v40 = vpop.xlane.xlu0 %4302  ;;  %5282 = vmatmul.msk.f32.vlgmr.msrb.gmra.mxu2 %vm384_vm6, %v4309_v35  ;;  %v4642_v6 = vrot.slane %v4637_v45, 4  ;;  %v4646_v14 = vrot.slane %v4641_v44, 4 }
0x1331   :  { %5446 = vrcp.f32 %v4303_v40  ;;  %4827 = vmatpush.msrb.mxu2 %v6244_v7  ;;  %5281 = vmatmul.msk.f32.vlgmr.msra.gmra.mxu1 %vm384_vm6, %v4308_v18  ;;  %v4645_v3 = vsel %vm154_vm5, %v4637_v45, %v4644_v4  ;;  %v4629_v7 = vperm.slane %v4621_v5, %v5638_v52 }
0x1332   :  { %5283 = vmatmul.msk.f32.vlgmr.msrb.gmra.mxu3 %vm384_vm6, %v4310_v25  ;;  %4804 = vmatpush.msra.mxu1 %v6233_v62  ;;  %v4643_v22 = vsel %vm154_vm5, %v4642_v6, %v4625_v38 }
0x1333   :  { %4850 = vmatpush.msrb.mxu3 %v6227_v60  ;;  %v4647_v60 = vsel %vm154_vm5, %v4646_v14, %v4629_v7  ;;  %v4648_v62 = vrot.slane %v4629_v7, 4 }
0x1335   :  { %v4649_v23 = vsel %vm154_vm5, %v4641_v44, %v4648_v62 }
0x1337   :  { %v5447_v2 = vpop.eup %5446 }
0x1338   :  { %v4311_v28 = vmul.f32 %v5447_v2, %v7049_v19  ;;  %5288 = vmatmul.msk.f32.vlgmr.msra.gmra.mxu2 %vm384_vm6, %v4645_v3 }
0x1339   :  { %5286 = vmatmul.msk.f32.vlgmr.msrb.gmra.mxu1 %vm384_vm6, %v4643_v22 }
0x133a   :  { %5284 = vmatmul.msk.f32.vlgmr.msra.gmra.mxu0 %vm384_vm6, %v4311_v28  ;;  %5290 = vmatmul.msk.f32.vlgmr.msra.gmra.mxu3 %vm384_vm6, %v4647_v60 }
0x133b   :  { %4873 = vmatpush.msra.mxu0 %v6236_v63 }
0x1342   :  { %5292 = vmatmul.msk.f32.vlgmr.msrb.gmra.mxu0 %vm384_vm6, %v4649_v23 }
0x13ae   :  { %v4332_v19 = vpop.f32.mrf.mxu1 }
0x13af   :  { %v4406_v47 = vrot.slane %v4332_v19, 4 }
0x13b3   :  { %v4355_v46 = vpop.f32.mrf.mxu2 }
0x13b4   :  { %v4418_v13 = vrot.slane %v4355_v46, 4 }
0x13b5   :  { %v4378_v49 = vpop.f32.mrf.mxu3 }
0x13b6   :  { %v4404_v53 = vrot.slane %v4378_v49, 4  ;;  %v4407_v54 = vsel %vm154_vm5, %v4378_v49, %v4406_v47  ;;  %v7110_v31 = vpop.f32.mrf.mxu1 }
0x13b7   :  { %v4415_v37 = vperm.slane %v4407_v54, %v5633_v41  ;;  %v4401_v11 = vpop.f32.mrf.mxu0  ;;  %v4742_v63 = vsel %vm384_vm6, %v7110_v31, -inf }
0x13b8   :  { %v4405_v56 = vsel %vm154_vm5, %v4404_v53, %v4332_v19  ;;  %v4416_v43 = vrot.slane %v4401_v11, 4  ;;  %v4419_v57 = vsel %vm154_vm5, %v4401_v11, %v4418_v13  ;;  %4743 = vmax.xlane.f32.xlu1 %v4742_v63 }
0x13b9   :  { %v4411_v58 = vperm.slane %v4405_v56, %v5633_v41  ;;  %v4442_v1 = vrot.slane %v4415_v37, 4  ;;  %v4427_v20 = vperm.slane %v4419_v57, %v5633_v41 }
0x13ba   :  { %v4417_v59 = vsel %vm154_vm5, %v4416_v43, %v4355_v46 }
0x13bb   :  { %v4430_v36 = vrot.slane %v4411_v58, 4  ;;  %v4423_v9 = vperm.slane %v4417_v59, %v5633_v41  ;;  %v4440_v61 = vrot.slane %v4427_v20, 4  ;;  %v4443_v21 = vsel %vm154_vm5, %v4427_v20, %v4442_v1  ;;  %v4693_v17 = vpop.f32.mrf.mxu2 }
0x13bc   :  { %v4451_v48 = vperm.slane %v4443_v21, %v5638_v52  ;;  %v4745_v0 = vsel %vm384_vm6, %v4693_v17, -inf }
0x13bd   :  { %v4428_v27 = vrot.slane %v4423_v9, 4  ;;  %v4431_v50 = vsel %vm154_vm5, %v4423_v9, %v4430_v36  ;;  %v4441_v42 = vsel %vm154_vm5, %v4440_v61, %v4415_v37  ;;  %v4716_v51 = vpop.f32.mrf.mxu3  ;;  %4746 = vmax.xlane.f32.xlu0 %v4745_v0 }
0x13be   :  { %v4439_v16 = vperm.slane %v4431_v50, %v5638_v52  ;;  %v4447_v32 = vperm.slane %v4441_v42, %v5638_v52  ;;  %v4458_v34 = vrot.slane %v4451_v48, 4  ;;  %v4748_v26 = vsel %vm384_vm6, %v4716_v51, -inf }
0x13bf   :  { %v4429_v29 = vsel %vm154_vm5, %v4428_v27, %v4411_v58  ;;  %4749 = vmax.xlane.f32.xlu2 %v4748_v26  ;;  %v4739_v45 = vpop.f32.mrf.mxu0 }
0x13c0   :  { %v4435_v30 = vperm.slane %v4429_v29, %v5638_v52  ;;  %v4454_v33 = vrot.slane %v4439_v16, 4  ;;  %v4456_v24 = vrot.slane %v4447_v32, 4  ;;  %v4459_v35 = vsel %vm154_vm5, 0.0, %v4458_v34 }
0x13c1   :  { %v4471_v12 = vsel %vm154_vm5, %v4458_v34, %v4447_v32  ;;  %v4476_v55 = vrot.slane %v4459_v35, 4  ;;  %v4751_v3 = vsel %vm384_vm6, %v4739_v45, -inf }
0x13c2   :  { %v4452_v18 = vrot.slane %v4435_v30, 4  ;;  %v4455_v38 = vsel %vm154_vm5, 0.0, %v4454_v33  ;;  %v4457_v25 = vsel %vm154_vm5, 0.0, %v4456_v24  ;;  %v4475_v40 = vperm.slane %v4471_v12, %v5633_v41 }
0x13c3   :  { %v4465_v39 = vrot.slane %v4455_v38, 4  ;;  %v4460_v44 = vsel %vm154_vm5, %v4454_v33, %v4435_v30  ;;  %v4477_v4 = vsel %vm154_vm5, %v4476_v55, %v4457_v25 }
0x13c4   :  { %v4453_v6 = vsel %vm154_vm5, 0.0, %v4452_v18  ;;  %v4464_v5 = vperm.slane %v4460_v44, %v5633_v41  ;;  %v4481_v14 = vperm.slane %v4477_v4, %v5633_v41  ;;  %v4496_v2 = vrot.slane %v4475_v40, 4 }
0x13c5   :  { %v4466_v7 = vsel %vm154_vm5, %v4465_v39, %v4453_v6 }
0x13c6   :  { %v4470_v28 = vperm.slane %v4466_v7, %v5633_v41  ;;  %v4484_v22 = vrot.slane %v4464_v5, 4  ;;  %v4497_v60 = vsel %vm154_vm5, %v4481_v14, %v4496_v2  ;;  %v4494_v62 = vrot.slane %v4481_v14, 4 }
0x13c7   :  { %4752 = vmax.xlane.f32.xlu2 %v4751_v3  ;;  %v4505_v23 = vperm.slane %v4497_v60, %v5638_v52 }
0x13c8   :  { %v4485_v19 = vsel %vm154_vm5, %v4470_v28, %v4484_v22  ;;  %v4482_v46 = vrot.slane %v4470_v28, 4  ;;  %v4495_v47 = vsel %vm154_vm5, %v4494_v62, %v4475_v40 }
0x13c9   :  { %v4493_v13 = vperm.slane %v4485_v19, %v5638_v52  ;;  %v4510_v49 = vrot.slane %v4505_v23, 4  ;;  %v4501_v53 = vperm.slane %v4495_v47, %v5638_v52 }
0x13ca   :  { %v4483_v54 = vsel %vm154_vm5, %v4482_v46, %v4464_v5 }
0x13cb   :  { %v4511_v37 = vsel %vm154_vm5, %v4510_v49, %v4493_v13  ;;  %v4489_v11 = vperm.slane %v4483_v54, %v5638_v52  ;;  %v4506_v63 = vrot.slane %v4501_v53, 4  ;;  %v4512_v56 = vrot.slane %v4493_v13, 4 }
0x13cd   :  { %v4508_v43 = vrot.slane %v4489_v11, 4  ;;  %v4513_v57 = vsel %vm154_vm5, %v4505_v23, %v4512_v56  ;;  %v7155_v58 = vsel %vm154_vm5, %v4506_v63, %v4489_v11 }
0x13cf   :  { %v4509_v1 = vsel %vm154_vm5, %v4501_v53, %v4508_v43 }
0x142b   :  { %v4744_v20 = vpop.xlane.xlu1 %4743 }
0x142c   :  { %v4754_v59 = vsub.f32 %v7110_v31, %v4744_v20 }
0x142e   :  { %v4758_v36 = vmul.f32 1.442695, %v4754_v59 }
0x1430   :  { %5448 = vpow2.f32 %v4758_v36  ;;  %v4747_v9 = vpop.xlane.xlu0 %4746 }
0x1431   :  { %v4755_v61 = vsub.f32 %v4693_v17, %v4747_v9 }
0x1432   :  { %v4750_v21 = vpop.xlane.xlu2 %4749 }
0x1433   :  { %v4760_v48 = vmul.f32 1.442695, %v4755_v61  ;;  %v4756_v0 = vsub.f32 %v4716_v51, %v4750_v21 }
0x1435   :  { %5450 = vpow2.f32 %v4760_v48  ;;  %v4762_v27 = vmul.f32 1.442695, %v4756_v0 }
0x1436   :  { %v5449_v50 = vpop.eup %5448 }
0x1437   :  { %5452 = vpow2.f32 %v4762_v27  ;;  %v4766_v42 = vsel %vm384_vm6, %v5449_v50, 0.0 }
0x1438   :  { %4767 = vadd.xlane.f32.xlu2 %v4766_v42 }
0x143a   :  { %v4753_v16 = vpop.xlane.xlu2 %4752 }
0x143b   :  { %v5451_v32 = vpop.eup %5450  ;;  %v4757_v34 = vsub.f32 %v4739_v45, %v4753_v16 }
0x143c   :  { %v4769_v26 = vsel %vm384_vm6, %v5451_v32, 0.0 }
0x143d   :  { %v5453_v31 = vpop.eup %5452  ;;  %v4764_v29 = vmul.f32 1.442695, %v4757_v34  ;;  %4770 = vadd.xlane.f32.xlu1 %v4769_v26 }
0x143e   :  { %v4772_v17 = vsel %vm384_vm6, %v5453_v31, 0.0 }
0x143f   :  { %5454 = vpow2.f32 %v4764_v29  ;;  %4773 = vadd.xlane.f32.xlu0 %v4772_v17 }
0x1445   :  { %v5455_v51 = vpop.eup %5454 }
0x1446   :  { %v4775_v30 = vsel %vm384_vm6, %v5455_v51, 0.0 }
0x1447   :  { %4776 = vadd.xlane.f32.xlu0 %v4775_v30 }
0x1450   :  { %4519 = vrot.lane.b32.xlu2 %v4511_v37, %s5515_s25 }
0x1456   :  { %4515 = vrot.lane.b32.xlu1 %v4509_v1, %s5516_s26 }
0x145b   :  { %4523 = vrot.lane.b32.xlu0 %v4513_v57, %s5514_s24 }
0x14ab   :  { %v4768_v33 = vpop.xlane.xlu2 %4767 }
0x14ac   :  { %5456 = vrcp.f32 %v4768_v33 }
0x14b0   :  { %v4771_v24 = vpop.xlane.xlu1 %4770 }
0x14b1   :  { %5458 = vrcp.f32 %v4771_v24 }
0x14b2   :  { %v5457_v35 = vpop.eup %5456  ;;  %v4774_v12 = vpop.xlane.xlu0 %4773 }
0x14b3   :  { %v4782_v55 = vmul.f32 %v5457_v35, %v5449_v50  ;;  %5460 = vrcp.f32 %v4774_v12 }
0x14b5   :  { %5293 = vmatmul.msk.f32.vlgmr.msra.gmra.mxu1 %vm384_vm6, %v4782_v55 }
0x14b7   :  { %v5459_v18 = vpop.eup %5458 }
0x14b8   :  { %v4783_v38 = vmul.f32 %v5459_v18, %v5451_v32 }
0x14b9   :  { %v5461_v25 = vpop.eup %5460 }
0x14ba   :  { %v4784_v40 = vmul.f32 %v5461_v25, %v5453_v31  ;;  %v4777_v45 = vpop.xlane.xlu0 %4776  ;;  %5294 = vmatmul.msk.f32.vlgmr.msrb.gmra.mxu2 %vm384_vm6, %v4783_v38 }
0x14bb   :  { %5462 = vrcp.f32 %v4777_v45 }
0x14bc   :  { %5295 = vmatmul.msk.f32.vlgmr.msrb.gmra.mxu3 %vm384_vm6, %v4784_v40 }
0x14c1   :  { %v5463_v39 = vpop.eup %5462 }
0x14c2   :  { %v4785_v44 = vmul.f32 %v5463_v39, %v5455_v51 }
0x14c4   :  { %5296 = vmatmul.msk.f32.vlgmr.msra.gmra.mxu0 %vm384_vm6, %v4785_v44 }
0x1532   :  { %v4806_v4 = vpop.f32.mrf.mxu1 }
0x1533   :  { %v4880_v5 = vrot.slane %v4806_v4, 4 }
0x153d   :  { %v4829_v6 = vpop.f32.mrf.mxu2 }
0x153e   :  { %v4892_v14 = vrot.slane %v4829_v6, 4 }
0x153f   :  { %v4852_v2 = vpop.f32.mrf.mxu3 }
0x1540   :  { %v4878_v3 = vrot.slane %v4852_v2, 4  ;;  %v4881_v7 = vsel %vm154_vm5, %v4852_v2, %v4880_v5 }
0x1541   :  { %v4889_v28 = vperm.slane %v4881_v7, %v5633_v41  ;;  %v4875_v22 = vpop.f32.mrf.mxu0 }
0x1542   :  { %v4879_v60 = vsel %vm154_vm5, %v4878_v3, %v4806_v4  ;;  %v4890_v62 = vrot.slane %v4875_v22, 4  ;;  %v4893_v23 = vsel %vm154_vm5, %v4875_v22, %v4892_v14 }
0x1543   :  { %v4885_v19 = vperm.slane %v4879_v60, %v5633_v41  ;;  %v4916_v46 = vrot.slane %v4889_v28, 4  ;;  %v4901_v47 = vperm.slane %v4893_v23, %v5633_v41  ;;  %v4524_v60 = vpop.permute.xlu0 %4523 }
0x1544   :  { %v4891_v13 = vsel %vm154_vm5, %v4890_v62, %v4829_v6 }
0x1545   :  { %v4904_v49 = vrot.slane %v4885_v19, 4  ;;  %v4897_v53 = vperm.slane %v4891_v13, %v5633_v41  ;;  %v4914_v54 = vrot.slane %v4901_v47, 4  ;;  %v4917_v37 = vsel %vm154_vm5, %v4901_v47, %v4916_v46 }
0x1546   :  { %v4925_v11 = vperm.slane %v4917_v37, %v5638_v52 }
0x1547   :  { %v4902_v63 = vrot.slane %v4897_v53, 4  ;;  %v4905_v56 = vsel %vm154_vm5, %v4897_v53, %v4904_v49  ;;  %v4915_v43 = vsel %vm154_vm5, %v4914_v54, %v4889_v28  ;;  %v4516_v28 = vpop.permute.xlu1 %4515 }
0x1548   :  { %v4913_v57 = vperm.slane %v4905_v56, %v5638_v52  ;;  %v4921_v1 = vperm.slane %v4915_v43, %v5638_v52  ;;  %v4932_v20 = vrot.slane %v4925_v11, 4  ;;  %v4526_v22 = vsel %vm384_vm6, %v7155_v58, %v4516_v28 }
0x1549   :  { %v4903_v59 = vsel %vm154_vm5, %v4902_v63, %v4885_v19 }
0x154a   :  { %v4909_v36 = vperm.slane %v4903_v59, %v5638_v52  ;;  %v4928_v9 = vrot.slane %v4913_v57, 4  ;;  %v4930_v61 = vrot.slane %v4921_v1, 4  ;;  %v4933_v21 = vsel %vm154_vm5, 0.0, %v4932_v20 }
0x154b   :  { %v4945_v48 = vsel %vm154_vm5, %v4932_v20, %v4921_v1  ;;  %v4950_v0 = vrot.slane %v4933_v21, 4  ;;  %v63_v21 = vld [vmem:[%s7320_s8 + $0x28] sm:$0xff] }
0x154c   :  { %v4926_v27 = vrot.slane %v4909_v36, 4  ;;  %v4929_v50 = vsel %vm154_vm5, 0.0, %v4928_v9  ;;  %v4931_v42 = vsel %vm154_vm5, 0.0, %v4930_v61  ;;  %v4949_v16 = vperm.slane %v4945_v48, %v5633_v41  ;;  %v64_v61 = vld [vmem:[%s7320_s8 + $0x30] sm:$0xff]  ;;  %v62_v48 = vld [vmem:[%s7320_s8 + $0x20] sm:$0xff] }
0x154d   :  { %v4939_v32 = vrot.slane %v4929_v50, 4  ;;  %v4934_v34 = vsel %vm154_vm5, %v4928_v9, %v4909_v36  ;;  %v4951_v26 = vsel %vm154_vm5, %v4950_v0, %v4931_v42  ;;  %v65_v9 = vld [vmem:[%s7320_s8 + $0x38] sm:$0xff] }
0x154e   :  { %v4927_v31 = vsel %vm154_vm5, 0.0, %v4926_v27  ;;  %v4938_v29 = vperm.slane %v4934_v34, %v5633_v41  ;;  %v4955_v17 = vperm.slane %v4951_v26, %v5633_v41  ;;  %v4970_v51 = vrot.slane %v4949_v16, 4  ;;  %5074 = vmatpush.msrb.mxu1 %v65_v9 }
0x154f   :  { %v4940_v30 = vsel %vm154_vm5, %v4939_v32, %v4927_v31 }
0x1550   :  { %v4944_v33 = vperm.slane %v4940_v30, %v5633_v41  ;;  %v4958_v24 = vrot.slane %v4938_v29, 4  ;;  %v4971_v35 = vsel %vm154_vm5, %v4955_v17, %v4970_v51  ;;  %v4968_v12 = vrot.slane %v4955_v17, 4  ;;  %5075 = vmatpush.msrb.mxu1 %v64_v61 }
0x1551   :  { %v4979_v55 = vperm.slane %v4971_v35, %v5638_v52 }
0x1552   :  { %v4959_v18 = vsel %vm154_vm5, %v4944_v33, %v4958_v24  ;;  %v4956_v38 = vrot.slane %v4944_v33, 4  ;;  %v4969_v25 = vsel %vm154_vm5, %v4968_v12, %v4949_v16  ;;  %5076 = vmatpush.msrb.mxu1 %v63_v21  ;;  %v5479_v33 = vld [vmem:[%s7319_s7] sm:$0x3] }
0x1553   :  { %v4967_v40 = vperm.slane %v4959_v18, %v5638_v52  ;;  %v4984_v45 = vrot.slane %v4979_v55, 4  ;;  %v4975_v39 = vperm.slane %v4969_v25, %v5638_v52  ;;  %v5052_v24 = vperm.slane %v5479_v33, 1  ;;  %v81_v18 = vld [vmem:[%s7322_s10 + $0x70] sm:$0xff] }
0x1554   :  { %v4957_v44 = vsel %vm154_vm5, %v4956_v38, %v4938_v29  ;;  %5077 = vmatpush.msrb.mxu1 %v62_v48  ;;  %v5478_v29 = vld [vmem:[%s7318_s6] sm:$0x3]  ;;  %v80_v38 = vld [vmem:[%s7322_s10 + $0x68] sm:$0xff] }
0x1555   :  { %v4985_v41 = vsel %vm154_vm5, %v4984_v45, %v4967_v40  ;;  %v4986_v4 = vrot.slane %v4967_v40, 4  ;;  %v4963_v6 = vperm.slane %v4957_v44, %v5638_v52  ;;  %v4980_v5 = vrot.slane %v4975_v39, 4  ;;  %v4520_v52 = vpop.permute.xlu2 %4519  ;;  %v79_v45 = vld [vmem:[%s7322_s10 + $0x60] sm:$0xff]  ;;  %v78_v44 = vld [vmem:[%s7322_s10 + $0x58] sm:$0xff] }
0x1556   :  { %4993 = vrot.lane.b32.xlu1 %v4985_v41, %s5515_s25  ;;  %v4527_v62 = vsel %vm748_vm10, %v4526_v22, %v4520_v52  ;;  %v5049_v17 = vperm.slane %v5478_v29, 1  ;;  %v76_v52 = vld [vmem:[%s7322_s10 + $0x48] sm:$0xff] }
0x1557   :  { %v4987_v14 = vsel %vm154_vm5, %v4979_v55, %v4986_v4  ;;  %v4982_v2 = vrot.slane %v4963_v6, 4  ;;  %v4981_v3 = vsel %vm154_vm5, %v4980_v5, %v4963_v6  ;;  %v4528_v23 = vsel %vm750_vm11, %v4527_v62, %v4524_v60  ;;  %v82_v55 = vld [vmem:[%s7322_s10 + $0x78] sm:$0xff]  ;;  %v77_v60 = vld [vmem:[%s7322_s10 + $0x50] sm:$0xff]  ;;  %v75_v62 = vld [vmem:[%s7322_s10 + $0x40] sm:$0xff] }
0x1558   :  { %4997 = vrot.lane.b32.xlu2 %v4987_v14, %s5514_s24  ;;  %v7218_v19 = vadd.f32 %v4528_v23, %v6878_v10  ;;  %5101 = vmatpush.msra.mxu2 %v82_v55  ;;  %v5480_v23 = vld [vmem:[%s7321_s9] sm:$0x3] }
0x1559   :  { %v4983_v7 = vsel %vm154_vm5, %v4975_v39, %v4982_v2 }
0x155a   :  { %4989 = vrot.lane.b32.xlu0 %v4983_v7, %s5516_s26  ;;  %v5005_v46 = vsel %vm84_vm0, %v7218_v19, 0.0  ;;  %5102 = vmatpush.msra.mxu2 %v81_v18 }
0x155c   :  { %5103 = vmatpush.msra.mxu2 %v80_v38 }
0x155e   :  { %5104 = vmatpush.msra.mxu2 %v79_v45 }
0x1560   :  { %5105 = vmatpush.msra.mxu2 %v78_v44 }
0x1562   :  { %5106 = vmatpush.msra.mxu2 %v77_v60 }
0x1564   :  { %5107 = vmatpush.msra.mxu2 %v76_v52 }
0x1566   :  { %5108 = vmatpush.msra.mxu2 %v75_v62 }
0x1584   :  { %5006 = vadd.xlane.f32.xlu0 %v5005_v46  ;;  %v5055_v46 = vperm.slane %v5480_v23, 1 }
0x15b2   :  { %v4998_v53 = vpop.permute.xlu2 %4997 }
0x15c8   :  { %v4994_v13 = vpop.permute.xlu1 %4993 }
0x15cc   :  { %v4990_v47 = vpop.permute.xlu0 %4989 }
0x15cd   :  { %v5000_v49 = vsel %vm384_vm6, %v4981_v3, %v4990_v47 }
0x15ce   :  { %v5001_v58 = vsel %vm748_vm10, %v5000_v49, %v4994_v13 }
0x15cf   :  { %v5002_v54 = vsel %vm750_vm11, %v5001_v58, %v4998_v53 }
0x15d0   :  { %v7226_v37 = vadd.f32 %v5002_v54, %v6992_v15 }
0x15d2   :  { %v5008_v10 = vsel %vm84_vm0, %v7226_v37, 0.0 }
0x15d3   :  { %5009 = vadd.xlane.f32.xlu1 %v5008_v10  ;;  %v5481_v10 = vld [vmem:[%s7323_s11] sm:$0x3] }
0x15f7   :  { %v5007_v11 = vpop.xlane.xlu0 %5006 }
0x15f8   :  { %v5011_v63 = vmul.f32 %v5007_v11, %v5598_v8  ;;  %v5118_v11 = vperm.slane %v5481_v10, 1 }
0x15fa   :  { %v5013_v56 = vsub.f32 %v7218_v19, %v5011_v63 }
0x15fc   :  { %v5015_v43 = vmul.f32 %v5013_v56, %v5013_v56 }
0x15fe   :  { %v5017_v57 = vsel %vm84_vm0, %v5015_v43, 0.0 }
0x15ff   :  { %5018 = vadd.xlane.f32.xlu2 %v5017_v57 }
0x1646   :  { %v5010_v1 = vpop.xlane.xlu1 %5009 }
0x1647   :  { %v5012_v20 = vmul.f32 %v5010_v1, %v5598_v8 }
0x1649   :  { %v5014_v59 = vsub.f32 %v7226_v37, %v5012_v20 }
0x164b   :  { %v5016_v15 = vmul.f32 %v5014_v59, %v5014_v59 }
0x164d   :  { %v5020_v36 = vsel %vm84_vm0, %v5016_v15, 0.0 }
0x164e   :  { %5021 = vadd.xlane.f32.xlu2 %v5020_v36 }
0x1672   :  { %v5019_v0 = vpop.xlane.xlu2 %5018 }
0x1673   :  { %v5023_v27 = vmul.f32 %v5019_v0, %v5598_v8 }
0x1675   :  { %v5025_v50 = vadd.f32 1e-05, %v5023_v27 }
0x1677   :  { %5464 = vrsqrt.f32 %v5025_v50  ;;  %vm5033_vm6 = vweird.f32 %v5025_v50 }
0x167d   :  { %v5465_v42 = vpop.eup %5464 }
0x167e   :  { %v5028_v16 = vmul.f32 %v5465_v42, %v5025_v50  ;;  %vm5034_vm5 = vweird.f32 %v5465_v42 }
0x167f   :  { %vm5035_vm10 = vmor %vm5033_vm6, %vm5034_vm5 }
0x1680   :  { %v5029_v32 = vmul.f32 %v5465_v42, %v5028_v16 }
0x1682   :  { %v5030_v34 = vmul.f32 0.5, %v5029_v32 }
0x1684   :  { %v5031_v26 = vsub.f32 1.5, %v5030_v34 }
0x1686   :  { %v5032_v31 = vmul.f32 %v5465_v42, %v5031_v26 }
0x1688   :  { %v5036_v51 = vsel %vm5035_vm10, %v5465_v42, %v5032_v31 }
0x1689   :  { %v5047_v30 = vmul.f32 %v5036_v51, %v5013_v56 }
0x168b   :  { %v5050_v35 = vmul.f32 %v5049_v17, %v5047_v30  ;;  %v5312_v30 = vld [vmem:[%s7324_s12] ss:$0 sm:$0xff]  ;;  %s5517_s12 = smov [#allocation2]  }
0x168d   :  { %v5053_v12 = vadd.f32 %v5052_v24, %v5050_v35  ;;  %v5313_v35 = vld [vmem:[%s7325_s13] ss:$0 sm:$0xff]  ;;  %s5183_s13 = sshll.u32 %s5517_s12, 4  ;;  %s5184_s13 = int_to_ptr.vmem [resolvable:$true] %s5183_s13 }
0x168f   :  { %5297 = vmatmul.msk.f32.vlgmr.msrb.gmra.mxu1 %vm84_vm0, %v5053_v12 }
0x16c1   :  { %v5022_v25 = vpop.xlane.xlu2 %5021 }
0x16c2   :  { %v5024_v40 = vmul.f32 %v5022_v25, %v5598_v8 }
0x16c4   :  { %v5026_v39 = vadd.f32 1e-05, %v5024_v40 }
0x16c6   :  { %5466 = vrsqrt.f32 %v5026_v39  ;;  %vm5043_vm1 = vweird.f32 %v5026_v39 }
0x16cc   :  { %v5467_v41 = vpop.eup %5466 }
0x16cd   :  { %v5038_v4 = vmul.f32 %v5467_v41, %v5026_v39  ;;  %vm5044_vm11 = vweird.f32 %v5467_v41 }
0x16ce   :  { %vm5045_vm2 = vmor %vm5043_vm1, %vm5044_vm11 }
0x16cf   :  { %v5039_v6 = vmul.f32 %v5467_v41, %v5038_v4 }
0x16d1   :  { %v5040_v5 = vmul.f32 0.5, %v5039_v6 }
0x16d3   :  { %v5041_v14 = vsub.f32 1.5, %v5040_v5 }
0x16d5   :  { %v5042_v2 = vmul.f32 %v5467_v41, %v5041_v14 }
0x16d7   :  { %v5046_v3 = vsel %vm5045_vm2, %v5467_v41, %v5042_v2 }
0x16d8   :  { %v5048_v7 = vmul.f32 %v5046_v3, %v5014_v59 }
0x16da   :  { %v5051_v28 = vmul.f32 %v5049_v17, %v5048_v7 }
0x16dc   :  { %v5054_v22 = vadd.f32 %v5052_v24, %v5051_v28 }
0x16de   :  { %5298 = vmatmul.msk.f32.gmra.mxu1 %vm84_vm0, %v5054_v22 }
0x170c   :  { %v5079_v47 = vpop.f32.mrf.mxu1 }
0x170d   :  { %v5080_v13 = vadd.f32 %v5079_v47, %v5055_v46 }
0x170f   :  { %v5085_v49 = vmax.f32 %v5080_v13, 0.0 }
0x1711   :  { %5299 = vmatmul.msk.f32.vlgmr.msra.gmra.mxu2 %vm2706_vm8, %v5085_v49 }
0x175b   :  { %v5082_v53 = vpop.f32.mrf.mxu1 }
0x175c   :  { %v5083_v58 = vadd.f32 %v5082_v53, %v5055_v46 }
0x175e   :  { %v5086_v54 = vmax.f32 %v5083_v58, 0.0 }
0x1760   :  { %5300 = vmatmul.msk.f32.gmra.mxu2 %vm2706_vm8, %v5086_v54 }
0x1794   :  { %v5110_v63 = vpop.f32.mrf.mxu2 }
0x1795   :  { %v5116_v56 = vadd.f32 %v5110_v63, %v7218_v19 }
0x1797   :  { %v5119_v43 = vadd.f32 %v5118_v11, %v5116_v56 }
0x1799   :  { %v5123_v57 = vsel %vm84_vm0, %v5119_v43, 0.0 }
0x179a   :  { %5124 = vadd.xlane.f32.xlu0 %v5123_v57 }
0x17e3   :  { %v5113_v1 = vpop.f32.mrf.mxu2 }
0x17e4   :  { %v5117_v20 = vadd.f32 %v5113_v1, %v7226_v37 }
0x17e6   :  { %v5120_v59 = vadd.f32 %v5118_v11, %v5117_v20 }
0x17e8   :  { %v5126_v15 = vsel %vm84_vm0, %v5120_v59, 0.0 }
0x17e9   :  { %5127 = vadd.xlane.f32.xlu1 %v5126_v15 }
0x180d   :  { %v5125_v36 = vpop.xlane.xlu0 %5124 }
0x180e   :  { %v5129_v9 = vmul.f32 %v5125_v36, %v5598_v8 }
0x1810   :  { %v5131_v61 = vsub.f32 %v5119_v43, %v5129_v9 }
0x1812   :  { %v5133_v21 = vmul.f32 %v5131_v61, %v5131_v61 }
0x1814   :  { %v5135_v48 = vsel %vm84_vm0, %v5133_v21, 0.0 }
0x1815   :  { %5136 = vadd.xlane.f32.xlu2 %v5135_v48 }
0x185c   :  { %v5128_v19 = vpop.xlane.xlu1 %5127 }
0x185d   :  { %v5130_v0 = vmul.f32 %v5128_v19, %v5598_v8 }
0x185f   :  { %v5132_v27 = vsub.f32 %v5120_v59, %v5130_v0 }
0x1861   :  { %v5134_v50 = vmul.f32 %v5132_v27, %v5132_v27 }
0x1863   :  { %v5138_v42 = vsel %vm84_vm0, %v5134_v50, 0.0 }
0x1864   :  { %5139 = vadd.xlane.f32.xlu0 %v5138_v42 }
0x1888   :  { %v5137_v37 = vpop.xlane.xlu2 %5136 }
0x1889   :  { %v5141_v16 = vmul.f32 %v5137_v37, %v5598_v8 }
0x188b   :  { %v5143_v32 = vadd.f32 1e-05, %v5141_v16 }
0x188d   :  { %5468 = vrsqrt.f32 %v5143_v32  ;;  %vm5151_vm3 = vweird.f32 %v5143_v32 }
0x1893   :  { %v5469_v34 = vpop.eup %5468 }
0x1894   :  { %v5146_v26 = vmul.f32 %v5469_v34, %v5143_v32  ;;  %vm5152_vm8 = vweird.f32 %v5469_v34 }
0x1895   :  { %vm5153_vm4 = vmor %vm5151_vm3, %vm5152_vm8 }
0x1896   :  { %v5147_v31 = vmul.f32 %v5469_v34, %v5146_v26 }
0x1898   :  { %v5148_v29 = vmul.f32 0.5, %v5147_v31 }
0x189a   :  { %v5149_v17 = vsub.f32 1.5, %v5148_v29 }
0x189c   :  { %v5150_v51 = vmul.f32 %v5469_v34, %v5149_v17 }
0x189e   :  { %v5154_v33 = vsel %vm5153_vm4, %v5469_v34, %v5150_v51 }
0x189f   :  { %v5165_v24 = vmul.f32 %v5154_v33, %v5131_v61 }
0x18a1   :  { %v5170_v12 = vmul.f32 %v5312_v30, %v5165_v24 }
0x18a3   :  { %v5175_v55 = vadd.f32 %v5313_v35, %v5170_v12 }
0x18a5   :  { %5177 = vst.msk [vmem:[#allocation2] sm:$0xff] %vm84_vm0, %v5175_v55 }
0x18d7   :  { %v5140_v18 = vpop.xlane.xlu0 %5139 }
0x18d8   :  { %v5142_v38 = vmul.f32 %v5140_v18, %v5598_v8 }
0x18da   :  { %v5144_v25 = vadd.f32 1e-05, %v5142_v38 }
0x18dc   :  { %5470 = vrsqrt.f32 %v5144_v25  ;;  %vm5161_vm9 = vweird.f32 %v5144_v25 }
0x18e2   :  { %v5471_v40 = vpop.eup %5470 }
0x18e3   :  { %v5156_v45 = vmul.f32 %v5471_v40, %v5144_v25  ;;  %vm5162_vm7 = vweird.f32 %v5471_v40 }
0x18e4   :  { %vm5163_vm12 = vmor %vm5161_vm9, %vm5162_vm7 }
0x18e5   :  { %v5157_v39 = vmul.f32 %v5471_v40, %v5156_v45 }
0x18e7   :  { %v5158_v44 = vmul.f32 0.5, %v5157_v39 }
0x18e9   :  { %v5159_v41 = vsub.f32 1.5, %v5158_v44 }
0x18eb   :  { %v5160_v4 = vmul.f32 %v5471_v40, %v5159_v41 }
0x18ed   :  { %v5164_v6 = vsel %vm5163_vm12, %v5471_v40, %v5160_v4 }
0x18ee   :  { %v5166_v5 = vmul.f32 %v5164_v6, %v5132_v27 }
0x18f0   :  { %v5171_v8 = vmul.f32 %v5312_v30, %v5166_v5 }
0x18f2   :  { %v5176_v14 = vadd.f32 %v5313_v35, %v5171_v8 }
0x18f4   :  { %5178 = vst.msk [vmem:[#allocation2 + $0x8] sm:$0xff] %vm84_vm0, %v5176_v14 }
0x18f5   :  { %5191 = dma.vmem_to_hbm [thread:$0]  %s5184_s13, 256, %s5186_s16, [#allocation3], %s5518_s17, %s5518_s17, %s5516_s26  }
0x18f6   :  { %5506 = dma.done.wait [#allocation3], 256  }
0x18f7   :  { %5507 = vsyncadd [#allocation3], 4294967040 }
0x18f8   :  { %5196 = vsyncpa [#allocation3], 1 }

</bundles_post_ra>
